<compile_context>
chip_gen: v7x
topology: tpu7x:2x2x1
jax: 0.10.0
libtpu: 0.0.40
codegen_flags: <defaults>
</compile_context>

<pallas_src>
import functools
import math

import numpy as np
import jax
import jax.numpy as jnp
from jax import lax
from jax.experimental import pallas as pl
from jax.experimental.pallas import tpu as pltpu


# ------------------------- fused per-branch kernel --------------------------

def branch_kernel(p1_ref, w1_ref, b1_ref, w2_ref, b2_ref,
                  wf1_ref, bf1_ref, wf2_ref, bf2_ref, out_ref, *, batch):
    B = batch
    Mq = 12 * B          # rows per pooling quadrant of the conv1 output
    R2 = 8 * B           # conv2 output rows, ordered (oh, b)

    # ---- conv1: ONE lane-dense matmul; rows=(quadrant,h,b), lanes=(w,co) ----
    y1 = jnp.dot(p1_ref[...], w1_ref[0],
                 preferred_element_type=jnp.float32) + b1_ref[0]     # (4*Mq, 384)

    # ---- pool1: max over the 4 contiguous quadrant row blocks (pure VPU) ----
    t1 = jnp.maximum(jnp.maximum(y1[0 * Mq:1 * Mq], y1[1 * Mq:2 * Mq]),
                     jnp.maximum(y1[2 * Mq:3 * Mq], y1[3 * Mq:4 * Mq]))  # (12B, 384)

    # ---- conv2: 5 banded matmuls over kh (kw & ow folded into the weights) ----
    acc = None
    for kh in range(5):
        win = t1[kh * B: kh * B + R2, :]                 # rows (oh, b) for this kh
        d = jnp.dot(win, w2_ref[0, kh], preferred_element_type=jnp.float32)
        acc = d if acc is None else acc + d
    y2 = acc + b2_ref[0]                                 # (8B, 512), lanes (t, owp, co)

    # ---- pool2: width max = two vreg-aligned lane halves; height = row pairs ----
    pw = jnp.maximum(y2[:, :256], y2[:, 256:])           # (8B, 256), lanes (owp, co)
    z = pw.reshape(4, 2, B, 256)                         # (ohp, s, b, owp*64+co)
    pooled = jnp.maximum(z[:, 0], z[:, 1])               # (4, B, 256)

    # ---- fc1: flatten (ohp, owp, co) into lanes, ONE (B,1024)x(1024,256) dot ----
    flat = jnp.concatenate([pooled[0], pooled[1], pooled[2], pooled[3]],
                           axis=-1)                      # (B, 1024)
    h1 = jnp.dot(flat, wf1_ref[0],
                 preferred_element_type=jnp.float32) + bf1_ref[0]    # (B, 256)

    # ---- fc2 (N padded to 128 lanes, pad bias = -1e30) + softmax ----
    logits = jnp.dot(h1, wf2_ref[0],
                     preferred_element_type=jnp.float32) + bf2_ref[0]  # (B, 128)
    m = jnp.max(logits, axis=-1, keepdims=True)
    e = jnp.exp(logits - m)
    out_ref[0] = e * pl.reciprocal(jnp.sum(e, axis=-1, keepdims=True), approx=False)


# ------------------------------ wrapper glue ---------------------------------

def _build_conv1_patches(x_nchw):
    """Shared conv1 im2col: rows = (quadrant q=2*qh+qw, pooled-h, b), lanes =
    (pooled-w, k) with k = kh*5+kw zero-padded 25 -> 32.  With this layout the
    conv1 weight is block-diagonal and pool1 is a max over 4 row blocks."""
    B = x_nchw.shape[0]
    xs = x_nchw[:, 0]                                                    # (B, 28, 28)
    cols = jnp.stack([xs[:, kh:kh + 24, kw:kw + 24]
                      for kh in range(5) for kw in range(5)], axis=-1)   # (B,24,24,25)
    cols = cols.reshape(B, 12, 2, 12, 2, 25)                             # (b,h,qh,w,qw,k)
    cols = jnp.pad(cols, ((0, 0), (0, 0), (0, 0), (0, 0), (0, 0), (0, 7)))
    cols = jnp.transpose(cols, (2, 4, 1, 0, 3, 5))                       # (qh,qw,h,b,w,k)
    return cols.reshape(4 * 12 * B, 12 * 32)                             # (48B, 384)


def _pack_branch(p):
    """One-time host-side weight repacking (numpy, outside jit)."""
    # conv1: block-diagonal (384, 384); block w maps padded K(25->32) -> 32 co.
    w1k = np.asarray(p["w1"], np.float32).reshape(32, 25).T              # (k, co)
    w1p = np.zeros((32, 32), np.float32)
    w1p[:25] = w1k
    W1 = np.zeros((384, 384), np.float32)
    for w in range(12):
        W1[w * 32:(w + 1) * 32, w * 32:(w + 1) * 32] = w1p
    b1t = np.tile(np.asarray(p["b1"], np.float32), 12).reshape(1, 384)

    # conv2: per-kh band matrix; rows = (w, ci), cols = (t=ow%2, owp=ow//2, co).
    w2 = np.asarray(p["w2"], np.float32)                                 # (64,32,5,5)
    W2 = np.zeros((5, 384, 512), np.float32)
    for kh in range(5):
        for ow in range(8):
            owp, t = divmod(ow, 2)
            c0 = t * 256 + owp * 64
            for kw in range(5):
                w = ow + kw
                W2[kh, w * 32:(w + 1) * 32, c0:c0 + 64] = w2[:, :, kh, kw].T
    b2t = np.tile(np.asarray(p["b2"], np.float32), 8).reshape(1, 512)

    # fc1: permute 1024 input features from CHW flatten order to (ohp,owp,co).
    wf1 = np.asarray(p["fc1_w"], np.float32).reshape(256, 64, 4, 4)      # (o,co,ohp,owp)
    wf1 = np.ascontiguousarray(wf1.transpose(2, 3, 1, 0)).reshape(1024, 256)
    bf1 = np.asarray(p["fc1_b"], np.float32).reshape(1, 256)

    # fc2: pad N 10 -> 128 lanes; pad logits pinned to -1e30 (softmax -> 0).
    wf2 = np.zeros((256, 128), np.float32)
    wf2[:, :10] = np.asarray(p["fc2_w"], np.float32).T
    bf2 = np.full((1, 128), -1e30, np.float32)
    bf2[0, :10] = np.asarray(p["fc2_b"], np.float32)
    return (W1, b1t, W2, b2t, wf1, bf1, wf2, bf2)


def pack_params(params):
    m1 = _pack_branch(params["M1"])
    m2 = _pack_branch(params["M2"])
    return tuple(jnp.asarray(np.stack([a, b], axis=0)) for a, b in zip(m1, m2))


def model_forward(x_nchw, packed):
    B = x_nchw.shape[0]
    p1 = _build_conv1_patches(x_nchw)                                    # (48B, 384)
    w1s, b1s, w2s, b2s, wf1s, bf1s, wf2s, bf2s = packed
    out = pl.pallas_call(
        functools.partial(branch_kernel, batch=B),
        out_shape=jax.ShapeDtypeStruct((2, B, 128), jnp.float32),
        grid=(2,),                                                       # one step / branch
        in_specs=[
            pl.BlockSpec((48 * B, 384), lambda g: (0, 0)),               # shared im2col
            pl.BlockSpec((1, 384, 384), lambda g: (g, 0, 0)),            # conv1 W (blockdiag)
            pl.BlockSpec((1, 1, 384), lambda g: (g, 0, 0)),              # conv1 b (tiled)
            pl.BlockSpec((1, 5, 384, 512), lambda g: (g, 0, 0, 0)),      # conv2 band W
            pl.BlockSpec((1, 1, 512), lambda g: (g, 0, 0)),              # conv2 b (tiled)
            pl.BlockSpec((1, 1024, 256), lambda g: (g, 0, 0)),           # fc1 W (permuted)
            pl.BlockSpec((1, 1, 256), lambda g: (g, 0, 0)),              # fc1 b
            pl.BlockSpec((1, 256, 128), lambda g: (g, 0, 0)),            # fc2 W (padded)
            pl.BlockSpec((1, 1, 128), lambda g: (g, 0, 0)),              # fc2 b (padded)
        ],
        out_specs=pl.BlockSpec((1, B, 128), lambda g: (g, 0, 0)),
        compiler_params=pltpu.CompilerParams(
            dimension_semantics=("parallel",),       # v7x: one branch per TensorCore
            vmem_limit_bytes=40 * 1024 * 1024),
    )(p1, w1s, b1s, w2s, b2s, wf1s, bf1s, wf2s, bf2s)
    return out[0, :, :10], out[1, :, :10]


# ------------------------------ param init ----------------------------------

def _init_conv(key, cin, cout, K):
    k1, k2 = jax.random.split(key)
    bound = 1.0 / math.sqrt(cin * K * K)
    w = jax.random.uniform(k1, (cout, cin, K, K), jnp.float32, -bound, bound)
    b = jax.random.uniform(k2, (cout,), jnp.float32, -bound, bound)
    return w, b


def _init_linear(key, fin, fout):
    k1, k2 = jax.random.split(key)
    bound = 1.0 / math.sqrt(fin)
    w = jax.random.uniform(k1, (fout, fin), jnp.float32, -bound, bound)
    b = jax.random.uniform(k2, (fout,), jnp.float32, -bound, bound)
    return w, b


def init_branch(key):
    ks = jax.random.split(key, 4)
    w1, b1 = _init_conv(ks[0], 1, 32, 5)
    w2, b2 = _init_conv(ks[1], 32, 64, 5)
    fc1_w, fc1_b = _init_linear(ks[2], 1024, 256)
    fc2_w, fc2_b = _init_linear(ks[3], 256, 10)
    return dict(w1=w1, b1=b1, w2=w2, b2=b2,
                fc1_w=fc1_w, fc1_b=fc1_b, fc2_w=fc2_w, fc2_b=fc2_b)


# ------------------------------ pure-JAX ref ---------------------------------

def ref_branch(x, p):
    dn = ("NCHW", "OIHW", "NCHW")
    y = lax.conv_general_dilated(x, p["w1"], (1, 1), "VALID",
                                 dimension_numbers=dn) + p["b1"][None, :, None, None]
    y = lax.reduce_window(y, -jnp.inf, lax.max, (1, 1, 2, 2), (1, 1, 2, 2), "VALID")
    y = lax.conv_general_dilated(y, p["w2"], (1, 1), "VALID",
                                 dimension_numbers=dn) + p["b2"][None, :, None, None]
    y = lax.reduce_window(y, -jnp.inf, lax.max, (1, 1, 2, 2), (1, 1, 2, 2), "VALID")
    flat = y.reshape(x.shape[0], -1)
    h = flat @ p["fc1_w"].T + p["fc1_b"]
    logits = h @ p["fc2_w"].T + p["fc2_b"]
    return jax.nn.softmax(logits, axis=1)


# ---------------------------------- main -------------------------------------

if __name__ == "__main__":
    key = jax.random.PRNGKey(0)
    k_x, k_m1, k_m2 = jax.random.split(key, 3)

    # fc1 in_features=1024 = 64*4*4 forces a 28x28 spatial input (MNIST-style)
    x = jax.random.normal(k_x, (2, 1, 28, 28), dtype=jnp.float32)

    params = {"M1": init_branch(k_m1), "M2": init_branch(k_m2)}
    packed = pack_params(params)          # one-time host-side weight repacking

    fwd = jax.jit(model_forward)
    out1, out2 = fwd(x, packed)
    jax.block_until_ready((out1, out2))

    # correctness check against a pure-JAX reference
    ref1 = ref_branch(x, params["M1"])
    ref2 = ref_branch(x, params["M2"])
    assert out1.shape == (2, 10) and out2.shape == (2, 10)
    assert jnp.allclose(out1, ref1, rtol=1e-4, atol=1e-4)
    assert jnp.allclose(out2, ref2, rtol=1e-4, atol=1e-4)

    print("KERNEL_OK")
</pallas_src>

<mosaic_0001>
module attributes {stable_mosaic.version = 11 : i64} {
  func.func @branch_kernel(%arg0: i32, %arg1: memref<96x384xf32, #tpu.memory_space<vmem>>, %arg2: memref<1x384x384xf32, #tpu.memory_space<vmem>>, %arg3: memref<1x1x384xf32, #tpu.memory_space<vmem>>, %arg4: memref<1x5x384x512xf32, #tpu.memory_space<vmem>>, %arg5: memref<1x1x512xf32, #tpu.memory_space<vmem>>, %arg6: memref<1x1024x256xf32, #tpu.memory_space<vmem>>, %arg7: memref<1x1x256xf32, #tpu.memory_space<vmem>>, %arg8: memref<1x256x128xf32, #tpu.memory_space<vmem>>, %arg9: memref<1x1x128xf32, #tpu.memory_space<vmem>>, %arg10: memref<1x2x128xf32, #tpu.memory_space<vmem>>) attributes {dimension_semantics = [#tpu.dimension_semantics<parallel>], iteration_bounds = array<i64: 2>, scalar_prefetch = 0 : i64, scratch_operands = 0 : i64, tpu.core_type = #tpu.core_type<tc>, window_params = [{pipeline_mode = #tpu.pipeline_mode<synchronous>, transform_indices = @transform_0, window_bounds = array<i64: 96, 384>}, {transform_indices = @transform_1, window_bounds = array<i64: 1, 384, 384>}, {transform_indices = @transform_2, window_bounds = array<i64: 1, 1, 384>}, {transform_indices = @transform_3, window_bounds = array<i64: 1, 5, 384, 512>}, {transform_indices = @transform_4, window_bounds = array<i64: 1, 1, 512>}, {transform_indices = @transform_5, window_bounds = array<i64: 1, 1024, 256>}, {transform_indices = @transform_6, window_bounds = array<i64: 1, 1, 256>}, {transform_indices = @transform_7, window_bounds = array<i64: 1, 256, 128>}, {transform_indices = @transform_8, window_bounds = array<i64: 1, 1, 128>}, {transform_indices = @transform_9, window_bounds = array<i64: 1, 2, 128>}]} {
    %c0 = arith.constant 0 : index
    %c0_0 = arith.constant 0 : index
    %0 = vector.load %arg1[%c0, %c0_0] : memref<96x384xf32, #tpu.memory_space<vmem>>, vector<96x384xf32>
    %c0_1 = arith.constant 0 : index
    %c0_2 = arith.constant 0 : index
    %c0_3 = arith.constant 0 : index
    %1 = vector.load %arg2[%c0_1, %c0_2, %c0_3] : memref<1x384x384xf32, #tpu.memory_space<vmem>>, vector<1x384x384xf32>
    %2 = vector.shape_cast %1 : vector<1x384x384xf32> to vector<384x384xf32>
    %cst = arith.constant dense<0.000000e+00> : vector<96x384xf32>
    %3 = tpu.matmul %0, %2, %cst {dimension_numbers = #tpu.dot_dimension_numbers<[1], [0], [0], [1], [0, 0, 1, 1], [], []>} : vector<96x384xf32>, vector<384x384xf32>, vector<96x384xf32> -> vector<96x384xf32>
    %c0_4 = arith.constant 0 : index
    %c0_5 = arith.constant 0 : index
    %c0_6 = arith.constant 0 : index
    %4 = vector.load %arg3[%c0_4, %c0_5, %c0_6] : memref<1x1x384xf32, #tpu.memory_space<vmem>>, vector<1x1x384xf32>
    %5 = vector.shape_cast %4 : vector<1x1x384xf32> to vector<1x384xf32>
    %6 = vector.broadcast %5 : vector<1x384xf32> to vector<96x384xf32>
    %7 = arith.addf %3, %6 : vector<96x384xf32>
    %8 = vector.extract_strided_slice %7 {offsets = [0, 0], sizes = [24, 384], strides = [1, 1]} : vector<96x384xf32> to vector<24x384xf32>
    %9 = vector.extract_strided_slice %7 {offsets = [24, 0], sizes = [24, 384], strides = [1, 1]} : vector<96x384xf32> to vector<24x384xf32>
    %10 = arith.maximumf %8, %9 : vector<24x384xf32>
    %11 = vector.extract_strided_slice %7 {offsets = [48, 0], sizes = [24, 384], strides = [1, 1]} : vector<96x384xf32> to vector<24x384xf32>
    %12 = vector.extract_strided_slice %7 {offsets = [72, 0], sizes = [24, 384], strides = [1, 1]} : vector<96x384xf32> to vector<24x384xf32>
    %13 = arith.maximumf %11, %12 : vector<24x384xf32>
    %14 = arith.maximumf %10, %13 : vector<24x384xf32>
    %15 = vector.extract_strided_slice %14 {offsets = [0, 0], sizes = [16, 384], strides = [1, 1]} : vector<24x384xf32> to vector<16x384xf32>
    %c0_7 = arith.constant 0 : index
    %c0_8 = arith.constant 0 : index
    %c0_9 = arith.constant 0 : index
    %c0_10 = arith.constant 0 : index
    %16 = vector.load %arg4[%c0_7, %c0_8, %c0_9, %c0_10] : memref<1x5x384x512xf32, #tpu.memory_space<vmem>>, vector<1x1x384x512xf32>
    %17 = vector.shape_cast %16 : vector<1x1x384x512xf32> to vector<384x512xf32>
    %cst_11 = arith.constant dense<0.000000e+00> : vector<16x512xf32>
    %18 = tpu.matmul %15, %17, %cst_11 {dimension_numbers = #tpu.dot_dimension_numbers<[1], [0], [0], [1], [0, 0, 1, 1], [], []>} : vector<16x384xf32>, vector<384x512xf32>, vector<16x512xf32> -> vector<16x512xf32>
    %19 = vector.extract_strided_slice %14 {offsets = [2, 0], sizes = [16, 384], strides = [1, 1]} : vector<24x384xf32> to vector<16x384xf32>
    %c0_12 = arith.constant 0 : index
    %c1 = arith.constant 1 : index
    %c0_13 = arith.constant 0 : index
    %c0_14 = arith.constant 0 : index
    %20 = vector.load %arg4[%c0_12, %c1, %c0_13, %c0_14] : memref<1x5x384x512xf32, #tpu.memory_space<vmem>>, vector<1x1x384x512xf32>
    %21 = vector.shape_cast %20 : vector<1x1x384x512xf32> to vector<384x512xf32>
    %cst_15 = arith.constant dense<0.000000e+00> : vector<16x512xf32>
    %22 = tpu.matmul %19, %21, %cst_15 {dimension_numbers = #tpu.dot_dimension_numbers<[1], [0], [0], [1], [0, 0, 1, 1], [], []>} : vector<16x384xf32>, vector<384x512xf32>, vector<16x512xf32> -> vector<16x512xf32>
    %23 = arith.addf %18, %22 : vector<16x512xf32>
    %24 = vector.extract_strided_slice %14 {offsets = [4, 0], sizes = [16, 384], strides = [1, 1]} : vector<24x384xf32> to vector<16x384xf32>
    %c0_16 = arith.constant 0 : index
    %c2 = arith.constant 2 : index
    %c0_17 = arith.constant 0 : index
    %c0_18 = arith.constant 0 : index
    %25 = vector.load %arg4[%c0_16, %c2, %c0_17, %c0_18] : memref<1x5x384x512xf32, #tpu.memory_space<vmem>>, vector<1x1x384x512xf32>
    %26 = vector.shape_cast %25 : vector<1x1x384x512xf32> to vector<384x512xf32>
    %cst_19 = arith.constant dense<0.000000e+00> : vector<16x512xf32>
    %27 = tpu.matmul %24, %26, %cst_19 {dimension_numbers = #tpu.dot_dimension_numbers<[1], [0], [0], [1], [0, 0, 1, 1], [], []>} : vector<16x384xf32>, vector<384x512xf32>, vector<16x512xf32> -> vector<16x512xf32>
    %28 = arith.addf %23, %27 : vector<16x512xf32>
    %29 = vector.extract_strided_slice %14 {offsets = [6, 0], sizes = [16, 384], strides = [1, 1]} : vector<24x384xf32> to vector<16x384xf32>
    %c0_20 = arith.constant 0 : index
    %c3 = arith.constant 3 : index
    %c0_21 = arith.constant 0 : index
    %c0_22 = arith.constant 0 : index
    %30 = vector.load %arg4[%c0_20, %c3, %c0_21, %c0_22] : memref<1x5x384x512xf32, #tpu.memory_space<vmem>>, vector<1x1x384x512xf32>
    %31 = vector.shape_cast %30 : vector<1x1x384x512xf32> to vector<384x512xf32>
    %cst_23 = arith.constant dense<0.000000e+00> : vector<16x512xf32>
    %32 = tpu.matmul %29, %31, %cst_23 {dimension_numbers = #tpu.dot_dimension_numbers<[1], [0], [0], [1], [0, 0, 1, 1], [], []>} : vector<16x384xf32>, vector<384x512xf32>, vector<16x512xf32> -> vector<16x512xf32>
    %33 = arith.addf %28, %32 : vector<16x512xf32>
    %34 = vector.extract_strided_slice %14 {offsets = [8, 0], sizes = [16, 384], strides = [1, 1]} : vector<24x384xf32> to vector<16x384xf32>
    %c0_24 = arith.constant 0 : index
    %c4 = arith.constant 4 : index
    %c0_25 = arith.constant 0 : index
    %c0_26 = arith.constant 0 : index
    %35 = vector.load %arg4[%c0_24, %c4, %c0_25, %c0_26] : memref<1x5x384x512xf32, #tpu.memory_space<vmem>>, vector<1x1x384x512xf32>
    %36 = vector.shape_cast %35 : vector<1x1x384x512xf32> to vector<384x512xf32>
    %cst_27 = arith.constant dense<0.000000e+00> : vector<16x512xf32>
    %37 = tpu.matmul %34, %36, %cst_27 {dimension_numbers = #tpu.dot_dimension_numbers<[1], [0], [0], [1], [0, 0, 1, 1], [], []>} : vector<16x384xf32>, vector<384x512xf32>, vector<16x512xf32> -> vector<16x512xf32>
    %38 = arith.addf %33, %37 : vector<16x512xf32>
    %c0_28 = arith.constant 0 : index
    %c0_29 = arith.constant 0 : index
    %c0_30 = arith.constant 0 : index
    %39 = vector.load %arg5[%c0_28, %c0_29, %c0_30] : memref<1x1x512xf32, #tpu.memory_space<vmem>>, vector<1x1x512xf32>
    %40 = vector.shape_cast %39 : vector<1x1x512xf32> to vector<1x512xf32>
    %41 = vector.broadcast %40 : vector<1x512xf32> to vector<16x512xf32>
    %42 = arith.addf %38, %41 : vector<16x512xf32>
    %43 = vector.extract_strided_slice %42 {offsets = [0, 0], sizes = [16, 256], strides = [1, 1]} : vector<16x512xf32> to vector<16x256xf32>
    %44 = vector.extract_strided_slice %42 {offsets = [0, 256], sizes = [16, 256], strides = [1, 1]} : vector<16x512xf32> to vector<16x256xf32>
    %45 = arith.maximumf %43, %44 : vector<16x256xf32>
    %46 = vector.shape_cast %45 : vector<16x256xf32> to vector<4x2x2x256xf32>
    %47 = vector.extract_strided_slice %46 {offsets = [0, 0, 0, 0], sizes = [4, 1, 2, 256], strides = [1, 1, 1, 1]} : vector<4x2x2x256xf32> to vector<4x1x2x256xf32>
    %48 = vector.shape_cast %47 : vector<4x1x2x256xf32> to vector<4x2x256xf32>
    %49 = vector.extract_strided_slice %46 {offsets = [0, 1, 0, 0], sizes = [4, 1, 2, 256], strides = [1, 1, 1, 1]} : vector<4x2x2x256xf32> to vector<4x1x2x256xf32>
    %50 = vector.shape_cast %49 : vector<4x1x2x256xf32> to vector<4x2x256xf32>
    %51 = arith.maximumf %48, %50 : vector<4x2x256xf32>
    %52 = vector.extract_strided_slice %51 {offsets = [0, 0, 0], sizes = [1, 2, 256], strides = [1, 1, 1]} : vector<4x2x256xf32> to vector<1x2x256xf32>
    %53 = vector.shape_cast %52 : vector<1x2x256xf32> to vector<2x256xf32>
    %54 = vector.extract_strided_slice %51 {offsets = [1, 0, 0], sizes = [1, 2, 256], strides = [1, 1, 1]} : vector<4x2x256xf32> to vector<1x2x256xf32>
    %55 = vector.shape_cast %54 : vector<1x2x256xf32> to vector<2x256xf32>
    %56 = vector.extract_strided_slice %51 {offsets = [2, 0, 0], sizes = [1, 2, 256], strides = [1, 1, 1]} : vector<4x2x256xf32> to vector<1x2x256xf32>
    %57 = vector.shape_cast %56 : vector<1x2x256xf32> to vector<2x256xf32>
    %58 = vector.extract_strided_slice %51 {offsets = [3, 0, 0], sizes = [1, 2, 256], strides = [1, 1, 1]} : vector<4x2x256xf32> to vector<1x2x256xf32>
    %59 = vector.shape_cast %58 : vector<1x2x256xf32> to vector<2x256xf32>
    %60 = tpu.concatenate %53, %55, %57, %59 in 1 : vector<2x256xf32>, vector<2x256xf32>, vector<2x256xf32>, vector<2x256xf32> -> vector<2x1024xf32>
    %c0_31 = arith.constant 0 : index
    %c0_32 = arith.constant 0 : index
    %c0_33 = arith.constant 0 : index
    %61 = vector.load %arg6[%c0_31, %c0_32, %c0_33] : memref<1x1024x256xf32, #tpu.memory_space<vmem>>, vector<1x1024x256xf32>
    %62 = vector.shape_cast %61 : vector<1x1024x256xf32> to vector<1024x256xf32>
    %cst_34 = arith.constant dense<0.000000e+00> : vector<2x256xf32>
    %63 = tpu.matmul %60, %62, %cst_34 {dimension_numbers = #tpu.dot_dimension_numbers<[1], [0], [0], [1], [0, 0, 1, 1], [], []>} : vector<2x1024xf32>, vector<1024x256xf32>, vector<2x256xf32> -> vector<2x256xf32>
    %c0_35 = arith.constant 0 : index
    %c0_36 = arith.constant 0 : index
    %c0_37 = arith.constant 0 : index
    %64 = vector.load %arg7[%c0_35, %c0_36, %c0_37] : memref<1x1x256xf32, #tpu.memory_space<vmem>>, vector<1x1x256xf32>
    %65 = vector.shape_cast %64 : vector<1x1x256xf32> to vector<1x256xf32>
    %66 = vector.broadcast %65 : vector<1x256xf32> to vector<2x256xf32>
    %67 = arith.addf %63, %66 : vector<2x256xf32>
    %c0_38 = arith.constant 0 : index
    %c0_39 = arith.constant 0 : index
    %c0_40 = arith.constant 0 : index
    %68 = vector.load %arg8[%c0_38, %c0_39, %c0_40] : memref<1x256x128xf32, #tpu.memory_space<vmem>>, vector<1x256x128xf32>
    %69 = vector.shape_cast %68 : vector<1x256x128xf32> to vector<256x128xf32>
    %cst_41 = arith.constant dense<0.000000e+00> : vector<2x128xf32>
    %70 = tpu.matmul %67, %69, %cst_41 {dimension_numbers = #tpu.dot_dimension_numbers<[1], [0], [0], [1], [0, 0, 1, 1], [], []>} : vector<2x256xf32>, vector<256x128xf32>, vector<2x128xf32> -> vector<2x128xf32>
    %c0_42 = arith.constant 0 : index
    %c0_43 = arith.constant 0 : index
    %c0_44 = arith.constant 0 : index
    %71 = vector.load %arg9[%c0_42, %c0_43, %c0_44] : memref<1x1x128xf32, #tpu.memory_space<vmem>>, vector<1x1x128xf32>
    %72 = vector.shape_cast %71 : vector<1x1x128xf32> to vector<1x128xf32>
    %73 = vector.broadcast %72 : vector<1x128xf32> to vector<2x128xf32>
    %74 = arith.addf %70, %73 : vector<2x128xf32>
    %cst_45 = arith.constant dense<0xFF800000> : vector<2xf32>
    %75 = vector.multi_reduction <maximumf>, %74, %cst_45 [1] : vector<2x128xf32> to vector<2xf32>
    %76 = vector.shape_cast %75 : vector<2xf32> to vector<2x1xf32>
    %77 = vector.broadcast %76 : vector<2x1xf32> to vector<2x128xf32>
    %78 = arith.subf %74, %77 : vector<2x128xf32>
    %79 = math.exp %78 : vector<2x128xf32>
    %cst_46 = arith.constant dense<0.000000e+00> : vector<2xf32>
    %80 = vector.multi_reduction <add>, %79, %cst_46 [1] : vector<2x128xf32> to vector<2xf32>
    %81 = vector.shape_cast %80 : vector<2xf32> to vector<2x1xf32>
    %82 = tpu.reciprocal %81 : vector<2x1xf32> -> vector<2x1xf32>
    %83 = vector.broadcast %82 : vector<2x1xf32> to vector<2x128xf32>
    %84 = arith.mulf %79, %83 : vector<2x128xf32>
    %c0_47 = arith.constant 0 : index
    %c0_48 = arith.constant 0 : index
    %c0_49 = arith.constant 0 : index
    %85 = vector.load %arg10[%c0_47, %c0_48, %c0_49] : memref<1x2x128xf32, #tpu.memory_space<vmem>>, vector<1x2x128xf32>
    %86 = vector.shape_cast %85 : vector<1x2x128xf32> to vector<2x128xf32>
    %87 = vector.shape_cast %84 : vector<2x128xf32> to vector<1x2x128xf32>
    tpu.vector_store %arg10[%c0_47, %c0_48, %c0_49], %87 {strides = array<i32>} : memref<1x2x128xf32, #tpu.memory_space<vmem>>, vector<1x2x128xf32>,
    return
  }
  func.func @transform_0(%arg0: i32) -> (i32, i32) {
    %c0_i32 = arith.constant 0 : i32
    %c0_i32_0 = arith.constant 0 : i32
    %c0_i32_1 = arith.constant 0 : i32
    return %c0_i32, %c0_i32_0 : i32, i32
  }
  func.func @transform_1(%arg0: i32) -> (i32, i32, i32) {
    %c0_i32 = arith.constant 0 : i32
    %c0_i32_0 = arith.constant 0 : i32
    %c0_i32_1 = arith.constant 0 : i32
    return %arg0, %c0_i32, %c0_i32_0 : i32, i32, i32
  }
  func.func @transform_2(%arg0: i32) -> (i32, i32, i32) {
    %c0_i32 = arith.constant 0 : i32
    %c0_i32_0 = arith.constant 0 : i32
    %c0_i32_1 = arith.constant 0 : i32
    return %arg0, %c0_i32, %c0_i32_0 : i32, i32, i32
  }
  func.func @transform_3(%arg0: i32) -> (i32, i32, i32, i32) {
    %c0_i32 = arith.constant 0 : i32
    %c0_i32_0 = arith.constant 0 : i32
    %c0_i32_1 = arith.constant 0 : i32
    %c0_i32_2 = arith.constant 0 : i32
    return %arg0, %c0_i32, %c0_i32_0, %c0_i32_1 : i32, i32, i32, i32
  }
  func.func @transform_4(%arg0: i32) -> (i32, i32, i32) {
    %c0_i32 = arith.constant 0 : i32
    %c0_i32_0 = arith.constant 0 : i32
    %c0_i32_1 = arith.constant 0 : i32
    return %arg0, %c0_i32, %c0_i32_0 : i32, i32, i32
  }
  func.func @transform_5(%arg0: i32) -> (i32, i32, i32) {
    %c0_i32 = arith.constant 0 : i32
    %c0_i32_0 = arith.constant 0 : i32
    %c0_i32_1 = arith.constant 0 : i32
    return %arg0, %c0_i32, %c0_i32_0 : i32, i32, i32
  }
  func.func @transform_6(%arg0: i32) -> (i32, i32, i32) {
    %c0_i32 = arith.constant 0 : i32
    %c0_i32_0 = arith.constant 0 : i32
    %c0_i32_1 = arith.constant 0 : i32
    return %arg0, %c0_i32, %c0_i32_0 : i32, i32, i32
  }
  func.func @transform_7(%arg0: i32) -> (i32, i32, i32) {
    %c0_i32 = arith.constant 0 : i32
    %c0_i32_0 = arith.constant 0 : i32
    %c0_i32_1 = arith.constant 0 : i32
    return %arg0, %c0_i32, %c0_i32_0 : i32, i32, i32
  }
  func.func @transform_8(%arg0: i32) -> (i32, i32, i32) {
    %c0_i32 = arith.constant 0 : i32
    %c0_i32_0 = arith.constant 0 : i32
    %c0_i32_1 = arith.constant 0 : i32
    return %arg0, %c0_i32, %c0_i32_0 : i32, i32, i32
  }
  func.func @transform_9(%arg0: i32) -> (i32, i32, i32) {
    %c0_i32 = arith.constant 0 : i32
    %c0_i32_0 = arith.constant 0 : i32
    %c0_i32_1 = arith.constant 0 : i32
    return %arg0, %c0_i32, %c0_i32_0 : i32, i32, i32
  }
}

</mosaic_0001>

<bundles_post_ra>
// kernel: model_forward.1
= control target key start
LH: loop header
LB: loop body
LE: loop exit
PB: predicated region body
PF: predicated region fallthrough
CT: control target
= control target key end

     0   :  { %s7325_s30 = smov 0   ;;  %s9260_s0 = inlined_call_operand.vmem [shape: f32[96,384], index: 0, kind: input, shape index: {}]   ;;  %s9261_s1 = inlined_call_operand.vmem [shape: f32[2,384,384], index: 1, kind: input, shape index: {}]   ;;  %s9262_s2 = inlined_call_operand.vmem [shape: f32[2,1,384], index: 2, kind: input, shape index: {}]   ;;  %s9263_s3 = inlined_call_operand.vmem [shape: f32[2,5,384,512], index: 3, kind: input, shape index: {}]   ;;  %s9264_s4 = inlined_call_operand.vmem [shape: f32[2,1,512], index: 4, kind: input, shape index: {}]   ;;  %s9265_s5 = inlined_call_operand.vmem [shape: f32[2,1024,256], index: 5, kind: input, shape index: {}]   ;;  %s9266_s6 = inlined_call_operand.vmem [shape: f32[2,1,256], index: 6, kind: input, shape index: {}]   ;;  %s9267_s7 = inlined_call_operand.vmem [shape: f32[2,256,128], index: 7, kind: input, shape index: {}]   ;;  %s9268_s8 = inlined_call_operand.vmem [shape: f32[2,1,128], index: 8, kind: input, shape index: {}]   ;;  %s9269_s9 = inlined_call_operand.vmem [shape: f32[2,2,128], index: 9, kind: output, shape index: {}]  }
   0x1 LB: > { %s4744_s10 = sadd.s32 4294967295, %s7271_s30   ;;  %p4748_p0 = scmp.ge.s32.totalorder %s7271_s30, 1  ;;  %s7271_s30 = sphi %s7325_s30, %s19_s30  }
   0x2   : > { %p352_p1 = scmp.lt.s32.totalorder %s7271_s30, 3 }
   0x4   : > { %p353_p2 = pnand %p4748_p0, %p352_p1 }
   0x5   : > { %p417_p3 = scmp.lt.s32.totalorder (!%p353_p2), %s4744_s10, 1  ;;  %v457_v0 = vld [vmem:[%s9260_s0 + $0x8] sm:$0xff] (!%p353_p2)  ;;  %vm1598_vm0 = vcmask (!%p353_p2), 1045504   ;;  %vm2429_vm1 = vcmask (!%p353_p2), 1043456   ;;  %vm2960_vm2 = vcmask (!%p353_p2), 1041408  }
   0x6   : > { %356 = sbr.rel (%p353_p2) target bundleno = 2077 (0x81d), region = 56  ;;  %991 = vmatprep.mubr.f32.mxu1 (!%p353_p2), %v457_v0  ;;  %717 = vmatprep.mubr.f32.mxu0 (!%p353_p2), %v457_v0 }
   0xd   : > { %s9271_s10 = smov (!%p417_p3, %s4744_s10), 1 }
   0xe   : > { %s7248_s13 = smul.u32 1152, %s9271_s10  ;;  %s5529_s21 = sshll.u32 %s9271_s10, 11 }
   0xf   : > { %s7249_s18 = smul.u32 3, %s9271_s10  ;;  %s8800_s24 = scalar_lea.vmem %s9265_s5, %s5529_s21 }
  0x10   : > { %s7342_s16 = scalar_lea.vmem %s9261_s1, %s7248_s13  ;;  %s7250_s13 = smul.u32 7680, %s9271_s10 }
  0x11   : > { %v493_v1 = vld [vmem:[%s7342_s16 + $0x8] sm:$0xff]  ;;  %v496_v2 = vld [vmem:[%s7342_s16 + $0x20] sm:$0xff]  ;;  %v495_v5 = vld [vmem:[%s7342_s16 + $0x18] sm:$0xff]  ;;  %s425_s20 = scalar_lea.vmem %s9262_s2, %s7249_s18  ;;  %s4751_s25 = sshll.u32 %s9271_s10, 2 }
  0x12   : > { %v492_v3 = vld [vmem:[%s7342_s16] sm:$0xff]  ;;  %v5712_v4 = vpack.c.bf16 %v496_v2, %v493_v1  ;;  %v499_v6 = vld [vmem:[%s7342_s16 + $0x38] sm:$0xff]  ;;  %v502_v7 = vld [vmem:[%s7342_s16 + $0x50] sm:$0xff]  ;;  %s7683_s17 = scalar_lea.vmem %s9263_s3, %s7250_s13  ;;  %s434_s28 = scalar_lea.vmem %s9264_s4, %s4751_s25 }
  0x13   : > { %v5714_v8 = vpack.c.bf16 %v495_v5, %v492_v3  ;;  %v5716_v9 = vpack.c.bf16 %v502_v7, %v499_v6  ;;  %v498_v10 = vld [vmem:[%s7342_s16 + $0x30] sm:$0xff]  ;;  %v501_v11 = vld [vmem:[%s7342_s16 + $0x48] sm:$0xff]  ;;  %v508_v13 = vld [vmem:[%s7342_s16 + $0x80] sm:$0xff]  ;;  %s5530_s29 = sshll.u32 %s9271_s10, 8  ;;  %s4754_s14 = sshll.u32 %s9271_s10, 1 }
  0x14   : > { %v505_v12 = vld [vmem:[%s7342_s16 + $0x68] sm:$0xff]  ;;  %5713 = vmatprep.subr.bf16.mxu0 %v5712_v4  ;;  %v5718_v14 = vpack.c.bf16 %v501_v11, %v498_v10  ;;  %v504_v16 = vld [vmem:[%s7342_s16 + $0x60] sm:$0xff]  ;;  %v507_v17 = vld [vmem:[%s7342_s16 + $0x78] sm:$0xff]  ;;  %s9086_s13 = scalar_lea.vmem %s9267_s7, %s5530_s29  ;;  %s443_s18 = scalar_lea.vmem %s9266_s6, %s4754_s14 }
  0x15   : > { %5715 = vmatpush1.bf16.msra.mxu0 %v5714_v8  ;;  %v5720_v15 = vpack.c.bf16 %v508_v13, %v505_v12  ;;  %v511_v18 = vld [vmem:[%s7342_s16 + $0x98] sm:$0xff]  ;;  %v514_v19 = vld [vmem:[%s7342_s16 + $0xb0] sm:$0xff]  ;;  %v5722_v20 = vpack.c.bf16 %v507_v17, %v504_v16  ;;  %v545_v22 = vld [vmem:[%s7342_s16 + $0x1a8] sm:$0xff]  ;;  %s455_s23 = scalar_lea.vmem %s9269_s9, %s4754_s14 }
  0x16   : > { %5717 = vmatprep.subr.bf16.mxu0 %v5716_v9  ;;  %v542_v21 = vld [vmem:[%s7342_s16 + $0x190] sm:$0xff]  ;;  %v5724_v24 = vpack.c.bf16 %v514_v19, %v511_v18  ;;  %v513_v26 = vld [vmem:[%s7342_s16 + $0xa8] sm:$0xff]  ;;  %v520_v30 = vld [vmem:[%s7342_s16 + $0xe0] sm:$0xff] }
  0x17   : > { %v494_v23 = vld [vmem:[%s7342_s16 + $0x10] sm:$0xff]  ;;  %v5808_v27 = vpack.c.bf16 %v545_v22, %v542_v21  ;;  %v497_v28 = vld [vmem:[%s7342_s16 + $0x28] sm:$0xff]  ;;  %v548_v32 = vld [vmem:[%s7342_s16 + $0x1c0] sm:$0xff] }
  0x18   : > { %v510_v25 = vld [vmem:[%s7342_s16 + $0x90] sm:$0xff]  ;;  %v517_v29 = vld [vmem:[%s7342_s16 + $0xc8] sm:$0xff]  ;;  %v5810_v31 = vpack.c.bf16 %v497_v28, %v494_v23  ;;  %v551_v33 = vld [vmem:[%s7342_s16 + $0x1d8] sm:$0xff] }
  0x19   : > { %5719 = vmatpush1.bf16.msra.mxu0 %v5718_v14  ;;  %5809 = vmatprep.subr.bf16.mxu1 %v5808_v27  ;;  %v500_v34 = vld [vmem:[%s7342_s16 + $0x40] sm:$0xff]  ;;  %v503_v35 = vld [vmem:[%s7342_s16 + $0x58] sm:$0xff]  ;;  %v5726_v36 = vpack.c.bf16 %v513_v26, %v510_v25  ;;  %v5812_v39 = vpack.c.bf16 %v551_v33, %v548_v32  ;;  %v5728_v41 = vpack.c.bf16 %v520_v30, %v517_v29  ;;  %v554_v43 = vld [vmem:[%s7342_s16 + $0x1f0] sm:$0xff] }
  0x1a   : > { %5721 = vmatprep.subr.bf16.mxu0 %v5720_v15  ;;  %v516_v37 = vld [vmem:[%s7342_s16 + $0xc0] sm:$0xff]  ;;  %v519_v38 = vld [vmem:[%s7342_s16 + $0xd8] sm:$0xff]  ;;  %5811 = vmatpush3.bf16.msra.mxu1 %v5810_v31  ;;  %v5814_v40 = vpack.c.bf16 %v503_v35, %v500_v34  ;;  %v557_v44 = vld [vmem:[%s7342_s16 + $0x208] sm:$0xff] }
  0x1b   : > { %v523_v42 = vld [vmem:[%s7342_s16 + $0xf8] sm:$0xff]  ;;  %v526_v45 = vld [vmem:[%s7342_s16 + $0x110] sm:$0xff]  ;;  %5813 = vmatprep.subr.bf16.mxu1 %v5812_v39  ;;  %v5816_v46 = vpack.c.bf16 %v557_v44, %v554_v43  ;;  %v509_v48 = vld [vmem:[%s7342_s16 + $0x88] sm:$0xff]  ;;  %v5730_v49 = vpack.c.bf16 %v519_v38, %v516_v37 }
  0x1c   : > { %v506_v47 = vld [vmem:[%s7342_s16 + $0x70] sm:$0xff]  ;;  %v560_v52 = vld [vmem:[%s7342_s16 + $0x220] sm:$0xff]  ;;  %v563_v53 = vld [vmem:[%s7342_s16 + $0x238] sm:$0xff]  ;;  %v5732_v54 = vpack.c.bf16 %v526_v45, %v523_v42 }
  0x1d   : > { %5723 = vmatpush1.bf16.msra.mxu0 %v5722_v20  ;;  %v522_v50 = vld [vmem:[%s7342_s16 + $0xf0] sm:$0xff]  ;;  %v5818_v51 = vpack.c.bf16 %v509_v48, %v506_v47  ;;  %v525_v55 = vld [vmem:[%s7342_s16 + $0x108] sm:$0xff]  ;;  %v5820_v56 = vpack.c.bf16 %v563_v53, %v560_v52  ;;  %v512_v57 = vld [vmem:[%s7342_s16 + $0xa0] sm:$0xff] }
  0x1e   : > { %5725 = vmatprep.subr.bf16.mxu0 %v5724_v24  ;;  %5815 = vmatpush3.bf16.msra.mxu1 %v5814_v40  ;;  %v515_v58 = vld [vmem:[%s7342_s16 + $0xb8] sm:$0xff]  ;;  %v529_v59 = vld [vmem:[%s7342_s16 + $0x128] sm:$0xff]  ;;  %v532_v60 = vld [vmem:[%s7342_s16 + $0x140] sm:$0xff]  ;;  %v5734_v63 = vpack.c.bf16 %v525_v55, %v522_v50 }
  0x1f   : > { %5817 = vmatprep.subr.bf16.mxu1 %v5816_v46  ;;  %v566_v61 = vld [vmem:[%s7342_s16 + $0x250] sm:$0xff]  ;;  %v569_v62 = vld [vmem:[%s7342_s16 + $0x268] sm:$0xff]  ;;  %v528_v0 = vld [vmem:[%s7342_s16 + $0x120] sm:$0xff]  ;;  %v5822_v2 = vpack.c.bf16 %v515_v58, %v512_v57  ;;  %v5736_v3 = vpack.c.bf16 %v532_v60, %v529_v59 }
  0x20   : > { %v531_v1 = vld [vmem:[%s7342_s16 + $0x138] sm:$0xff]  ;;  %v5824_v5 = vpack.c.bf16 %v569_v62, %v566_v61  ;;  %v518_v6 = vld [vmem:[%s7342_s16 + $0xd0] sm:$0xff]  ;;  %v521_v7 = vld [vmem:[%s7342_s16 + $0xe8] sm:$0xff] }
  0x21   : > { %5727 = vmatpush1.bf16.msra.mxu0 %v5726_v36  ;;  %v535_v4 = vld [vmem:[%s7342_s16 + $0x158] sm:$0xff]  ;;  %v538_v8 = vld [vmem:[%s7342_s16 + $0x170] sm:$0xff]  ;;  %v572_v9 = vld [vmem:[%s7342_s16 + $0x280] sm:$0xff]  ;;  %v5738_v11 = vpack.c.bf16 %v531_v1, %v528_v0  ;;  %v5826_v14 = vpack.c.bf16 %v521_v7, %v518_v6 }
  0x22   : > { %5729 = vmatprep.subr.bf16.mxu0 %v5728_v41  ;;  %5819 = vmatpush3.bf16.msra.mxu1 %v5818_v51  ;;  %v575_v10 = vld [vmem:[%s7342_s16 + $0x298] sm:$0xff]  ;;  %v534_v12 = vld [vmem:[%s7342_s16 + $0x150] sm:$0xff]  ;;  %v537_v13 = vld [vmem:[%s7342_s16 + $0x168] sm:$0xff]  ;;  %v5740_v15 = vpack.c.bf16 %v538_v8, %v535_v4 }
  0x23   : > { %5821 = vmatprep.subr.bf16.mxu1 %v5820_v56  ;;  %v541_v16 = vld [vmem:[%s7342_s16 + $0x188] sm:$0xff]  ;;  %v5828_v17 = vpack.c.bf16 %v575_v10, %v572_v9  ;;  %v524_v18 = vld [vmem:[%s7342_s16 + $0x100] sm:$0xff]  ;;  %v527_v19 = vld [vmem:[%s7342_s16 + $0x118] sm:$0xff]  ;;  %v5742_v23 = vpack.c.bf16 %v537_v13, %v534_v12 }
  0x24   : > { %v544_v20 = vld [vmem:[%s7342_s16 + $0x1a0] sm:$0xff]  ;;  %v578_v21 = vld [vmem:[%s7342_s16 + $0x2b0] sm:$0xff]  ;;  %v581_v22 = vld [vmem:[%s7342_s16 + $0x2c8] sm:$0xff]  ;;  %v5830_v26 = vpack.c.bf16 %v527_v19, %v524_v18 }
  0x25   : > { %5731 = vmatpush1.bf16.msra.mxu0 %v5730_v49  ;;  %v540_v24 = vld [vmem:[%s7342_s16 + $0x180] sm:$0xff]  ;;  %v543_v25 = vld [vmem:[%s7342_s16 + $0x198] sm:$0xff]  ;;  %v5744_v27 = vpack.c.bf16 %v544_v20, %v541_v16  ;;  %v5832_v29 = vpack.c.bf16 %v581_v22, %v578_v21  ;;  %v530_v30 = vld [vmem:[%s7342_s16 + $0x130] sm:$0xff] }
  0x26   : > { %5733 = vmatprep.subr.bf16.mxu0 %v5732_v54  ;;  %5823 = vmatpush3.bf16.msra.mxu1 %v5822_v2  ;;  %v547_v28 = vld [vmem:[%s7342_s16 + $0x1b8] sm:$0xff]  ;;  %v533_v31 = vld [vmem:[%s7342_s16 + $0x148] sm:$0xff]  ;;  %v550_v32 = vld [vmem:[%s7342_s16 + $0x1d0] sm:$0xff]  ;;  %v5746_v35 = vpack.c.bf16 %v543_v25, %v540_v24 }
  0x27   : > { %5825 = vmatprep.subr.bf16.mxu1 %v5824_v5  ;;  %v584_v33 = vld [vmem:[%s7342_s16 + $0x2e0] sm:$0xff]  ;;  %v587_v34 = vld [vmem:[%s7342_s16 + $0x2f8] sm:$0xff]  ;;  %v546_v36 = vld [vmem:[%s7342_s16 + $0x1b0] sm:$0xff]  ;;  %v5834_v38 = vpack.c.bf16 %v533_v31, %v530_v30  ;;  %v5748_v39 = vpack.c.bf16 %v550_v32, %v547_v28 }
  0x28   : > { %v549_v37 = vld [vmem:[%s7342_s16 + $0x1c8] sm:$0xff]  ;;  %v5836_v41 = vpack.c.bf16 %v587_v34, %v584_v33  ;;  %v536_v42 = vld [vmem:[%s7342_s16 + $0x160] sm:$0xff]  ;;  %v539_v43 = vld [vmem:[%s7342_s16 + $0x178] sm:$0xff] }
  0x29   : > { %5735 = vmatpush1.bf16.msra.mxu0 %v5734_v63  ;;  %v553_v40 = vld [vmem:[%s7342_s16 + $0x1e8] sm:$0xff]  ;;  %v556_v44 = vld [vmem:[%s7342_s16 + $0x200] sm:$0xff]  ;;  %v590_v45 = vld [vmem:[%s7342_s16 + $0x310] sm:$0xff]  ;;  %v5750_v47 = vpack.c.bf16 %v549_v37, %v546_v36  ;;  %v5838_v48 = vpack.c.bf16 %v539_v43, %v536_v42 }
  0x2a   : > { %5737 = vmatprep.subr.bf16.mxu0 %v5736_v3  ;;  %5827 = vmatpush3.bf16.msra.mxu1 %v5826_v14  ;;  %v593_v46 = vld [vmem:[%s7342_s16 + $0x328] sm:$0xff]  ;;  %v5752_v49 = vpack.c.bf16 %v556_v44, %v553_v40  ;;  %v552_v50 = vld [vmem:[%s7342_s16 + $0x1e0] sm:$0xff]  ;;  %v555_v51 = vld [vmem:[%s7342_s16 + $0x1f8] sm:$0xff] }
  0x2b   : > { %5829 = vmatprep.subr.bf16.mxu1 %v5828_v17  ;;  %v5840_v52 = vpack.c.bf16 %v593_v46, %v590_v45  ;;  %v559_v53 = vld [vmem:[%s7342_s16 + $0x218] sm:$0xff]  ;;  %v562_v54 = vld [vmem:[%s7342_s16 + $0x230] sm:$0xff]  ;;  %v596_v55 = vld [vmem:[%s7342_s16 + $0x340] sm:$0xff]  ;;  %v5754_v57 = vpack.c.bf16 %v555_v51, %v552_v50 }
  0x2c   : > { %v599_v56 = vld [vmem:[%s7342_s16 + $0x358] sm:$0xff]  ;;  %v7429_v58 = vld [vmem:[%s9260_s0] sm:$0xff]  ;;  %v5756_v59 = vpack.c.bf16 %v562_v54, %v559_v53  ;;  %v558_v60 = vld [vmem:[%s7342_s16 + $0x210] sm:$0xff] }
  0x2d   : > { %5739 = vmatpush1.bf16.msra.mxu0 %v5738_v11  ;;  %v561_v61 = vld [vmem:[%s7342_s16 + $0x228] sm:$0xff]  ;;  %v7436_v62 = vld [vmem:[%s9260_s0 + $0x20] sm:$0xff]  ;;  %v5844_v1 = vpack.c.bf16 %v599_v56, %v596_v55  ;;  %v602_v2 = vld [vmem:[%s7342_s16 + $0x370] sm:$0xff] }
  0x2e   : > { %5741 = vmatprep.subr.bf16.mxu0 %v5740_v15  ;;  %5831 = vmatpush3.bf16.msra.mxu1 %v5830_v26  ;;  %v565_v63 = vld [vmem:[%s7342_s16 + $0x248] sm:$0xff]  ;;  %v568_v0 = vld [vmem:[%s7342_s16 + $0x260] sm:$0xff]  ;;  %v5758_v4 = vpack.c.bf16 %v561_v61, %v558_v60  ;;  %v7447_v5 = vld [vmem:[%s9260_s0 + $0x18] sm:$0xff] }
  0x2f   : > { %5833 = vmatprep.subr.bf16.mxu1 %v5832_v29  ;;  %v605_v3 = vld [vmem:[%s7342_s16 + $0x388] sm:$0xff]  ;;  %v5760_v6 = vpack.c.bf16 %v568_v0, %v565_v63  ;;  %v564_v7 = vld [vmem:[%s7342_s16 + $0x240] sm:$0xff]  ;;  %v567_v8 = vld [vmem:[%s7342_s16 + $0x258] sm:$0xff] }
  0x30   : > { %v7454_v9 = vld [vmem:[%s9260_s0 + $0x38] sm:$0xff]  ;;  %v574_v11 = vld [vmem:[%s7342_s16 + $0x290] sm:$0xff]  ;;  %v5848_v12 = vpack.c.bf16 %v605_v3, %v602_v2  ;;  %v608_v13 = vld [vmem:[%s7342_s16 + $0x3a0] sm:$0xff]  ;;  %v5762_v15 = vpack.c.bf16 %v567_v8, %v564_v7 }
  0x31   : > { %5743 = vmatpush1.bf16.msra.mxu0 %v5742_v23  ;;  %v571_v10 = vld [vmem:[%s7342_s16 + $0x278] sm:$0xff]  ;;  %v7465_v16 = vld [vmem:[%s9260_s0 + $0x30] sm:$0xff]  ;;  %v573_v19 = vld [vmem:[%s7342_s16 + $0x288] sm:$0xff] }
  0x32   : > { %5745 = vmatprep.subr.bf16.mxu0 %v5744_v27  ;;  %5835 = vmatpush3.bf16.msra.mxu1 %v5834_v38  ;;  %v611_v14 = vld [vmem:[%s7342_s16 + $0x3b8] sm:$0xff]  ;;  %v5764_v17 = vpack.c.bf16 %v574_v11, %v571_v10  ;;  %v570_v18 = vld [vmem:[%s7342_s16 + $0x270] sm:$0xff]  ;;  %v577_v21 = vld [vmem:[%s7342_s16 + $0x2a8] sm:$0xff] }
  0x33   : > { %5837 = vmatprep.subr.bf16.mxu1 %v5836_v41  ;;  %v7472_v20 = vld [vmem:[%s9260_s0 + $0x50] sm:$0xff]  ;;  %v580_v22 = vld [vmem:[%s7342_s16 + $0x2c0] sm:$0xff]  ;;  %v5852_v23 = vpack.c.bf16 %v611_v14, %v608_v13  ;;  %v617_v25 = vld [vmem:[%s7342_s16 + $0x3e8] sm:$0xff]  ;;  %v5766_v26 = vpack.c.bf16 %v573_v19, %v570_v18 }
  0x34   : > { %v614_v24 = vld [vmem:[%s7342_s16 + $0x3d0] sm:$0xff]  ;;  %v7483_v27 = vld [vmem:[%s9260_s0 + $0x48] sm:$0xff]  ;;  %v5768_v28 = vpack.c.bf16 %v580_v22, %v577_v21  ;;  %v576_v29 = vld [vmem:[%s7342_s16 + $0x2a0] sm:$0xff] }
  0x35   : > { %5747 = vmatpush1.bf16.msra.mxu0 %v5746_v35  ;;  %v579_v30 = vld [vmem:[%s7342_s16 + $0x2b8] sm:$0xff]  ;;  %v7490_v31 = vld [vmem:[%s9260_s0 + $0x68] sm:$0xff]  ;;  %v586_v33 = vld [vmem:[%s7342_s16 + $0x2f0] sm:$0xff]  ;;  %v5856_v34 = vpack.c.bf16 %v617_v25, %v614_v24 }
  0x36   : > { %5749 = vmatprep.subr.bf16.mxu0 %v5748_v39  ;;  %5839 = vmatpush3.bf16.msra.mxu1 %v5838_v48  ;;  %v583_v32 = vld [vmem:[%s7342_s16 + $0x2d8] sm:$0xff]  ;;  %v620_v35 = vld [vmem:[%s7342_s16 + $0x400] sm:$0xff]  ;;  %v5770_v37 = vpack.c.bf16 %v579_v30, %v576_v29  ;;  %v582_v40 = vld [vmem:[%s7342_s16 + $0x2d0] sm:$0xff] }
  0x37   : > { %5841 = vmatprep.subr.bf16.mxu1 %v5840_v52  ;;  %v623_v36 = vld [vmem:[%s7342_s16 + $0x418] sm:$0xff]  ;;  %v7501_v38 = vld [vmem:[%s9260_s0 + $0x60] sm:$0xff]  ;;  %v5772_v39 = vpack.c.bf16 %v586_v33, %v583_v32  ;;  %v585_v41 = vld [vmem:[%s7342_s16 + $0x2e8] sm:$0xff] }
  0x38   : > { %v7508_v42 = vld [vmem:[%s9260_s0 + $0x80] sm:$0xff]  ;;  %v589_v43 = vld [vmem:[%s7342_s16 + $0x308] sm:$0xff]  ;;  %v5860_v45 = vpack.c.bf16 %v623_v36, %v620_v35  ;;  %v626_v46 = vld [vmem:[%s7342_s16 + $0x430] sm:$0xff]  ;;  %v5774_v48 = vpack.c.bf16 %v585_v41, %v582_v40 }
  0x39   : > { %5751 = vmatpush1.bf16.msra.mxu0 %v5750_v47  ;;  %992 = vmatmul.mubr.f32.vlgmr.msra.gmra.mrb[0].mxu1 %v7429_v58  ;;  %v592_v44 = vld [vmem:[%s7342_s16 + $0x320] sm:$0xff]  ;;  %v629_v47 = vld [vmem:[%s7342_s16 + $0x448] sm:$0xff]  ;;  %v7526_v53 = vld [vmem:[%s9260_s0 + $0x98] sm:$0xff] }
  0x3a   : > { %5753 = vmatprep.subr.bf16.mxu0 %v5752_v49  ;;  %996 = vmatprep.mubr.f32.mxu1 %v7436_v62  ;;  %v7519_v49 = vld [vmem:[%s9260_s0 + $0x78] sm:$0xff]  ;;  %v5776_v50 = vpack.c.bf16 %v592_v44, %v589_v43  ;;  %v588_v51 = vld [vmem:[%s7342_s16 + $0x300] sm:$0xff]  ;;  %v598_v55 = vld [vmem:[%s7342_s16 + $0x350] sm:$0xff]  ;;  %v5864_v56 = vpack.c.bf16 %v629_v47, %v626_v46 }
  0x3b   : > { %5843 = vmatpush3.bf16.msra.mxu1 %v5840_v52  ;;  %v591_v52 = vld [vmem:[%s7342_s16 + $0x318] sm:$0xff]  ;;  %v594_v61 = vld [vmem:[%s7342_s16 + $0x330] sm:$0xff]  ;;  %v597_v63 = vld [vmem:[%s7342_s16 + $0x348] sm:$0xff] }
  0x3c   : > { %5845 = vmatprep.subr.bf16.mxu1 %v5844_v1  ;;  %v595_v54 = vld [vmem:[%s7342_s16 + $0x338] sm:$0xff]  ;;  %v601_v0 = vld [vmem:[%s7342_s16 + $0x368] sm:$0xff]  ;;  %v7544_v2 = vld [vmem:[%s9260_s0 + $0xb0] sm:$0xff] }
  0x3d   : > { %5755 = vmatpush1.bf16.msra.mxu0 %v5754_v57  ;;  %997 = vmatmul.mubr.f32.gmra.mrb[2].mxu1 %v7447_v5  ;;  %v5778_v57 = vpack.c.bf16 %v591_v52, %v588_v51  ;;  %v5780_v60 = vpack.c.bf16 %v598_v55, %v595_v54  ;;  %v632_v3 = vld [vmem:[%s7342_s16 + $0x460] sm:$0xff]  ;;  %v7554_v7 = vld [vmem:[%s9260_s0 + $0xa8] sm:$0xff]  ;;  %v603_v11 = vld [vmem:[%s7342_s16 + $0x378] sm:$0xff] }
  0x3e   : > { %5757 = vmatprep.subr.bf16.mxu0 %v5756_v59  ;;  %1001 = vmatprep.mubr.f32.mxu1 %v7454_v9  ;;  %v7535_v59 = vld [vmem:[%s9260_s0 + $0x90] sm:$0xff]  ;;  %v600_v10 = vld [vmem:[%s7342_s16 + $0x360] sm:$0xff]  ;;  %v609_v19 = vld [vmem:[%s7342_s16 + $0x3a8] sm:$0xff] }
  0x3f   : > { %5847 = vmatpush3.bf16.msra.mxu1 %v5844_v1  ;;  %v604_v1 = vld [vmem:[%s7342_s16 + $0x380] sm:$0xff]  ;;  %v5786_v14 = vpack.c.bf16 %v603_v11, %v600_v10  ;;  %v606_v18 = vld [vmem:[%s7342_s16 + $0x390] sm:$0xff]  ;;  %v627_v41 = vld [vmem:[%s7342_s16 + $0x438] sm:$0xff] }
  0x40   : > { %5849 = vmatprep.subr.bf16.mxu1 %v5848_v12  ;;  %v5784_v8 = vpack.c.bf16 %v604_v1, %v601_v0  ;;  %v616_v21 = vld [vmem:[%s7342_s16 + $0x3e0] sm:$0xff]  ;;  %v5790_v22 = vpack.c.bf16 %v609_v19, %v606_v18  ;;  %v486_v30 = vld [vmem:[%s9260_s0 + $0xf0] sm:$0xff]  ;;  %v631_v43 = vld [vmem:[%s7342_s16 + $0x458] sm:$0xff] }
  0x41   : > { %5759 = vmatpush1.bf16.msra.mxu0 %v5758_v4  ;;  %1002 = vmatmul.mubr.f32.gmra.mrb[4].mxu1 %v7465_v16  ;;  %v635_v4 = vld [vmem:[%s7342_s16 + $0x478] sm:$0xff]  ;;  %v612_v25 = vld [vmem:[%s7342_s16 + $0x3c0] sm:$0xff]  ;;  %v618_v33 = vld [vmem:[%s7342_s16 + $0x3f0] sm:$0xff] }
  0x42   : > { %5761 = vmatprep.subr.bf16.mxu0 %v5760_v6  ;;  %1006 = vmatprep.mubr.f32.mxu1 %v7472_v20  ;;  %v5782_v6 = vpack.c.bf16 %v597_v63, %v594_v61  ;;  %v5868_v13 = vpack.c.bf16 %v635_v4, %v632_v3  ;;  %v628_v35 = vld [vmem:[%s7342_s16 + $0x440] sm:$0xff]  ;;  %v634_v44 = vld [vmem:[%s7342_s16 + $0x470] sm:$0xff]  ;;  %v479_v55 = vld [vmem:[%s9260_s0 + $0xb8] sm:$0xff]  ;;  %v7273_v61 = vmov 0.0  }
  0x43   : > { %5851 = vmatpush3.bf16.msra.mxu1 %v5848_v12  ;;  %v610_v12 = vld [vmem:[%s7342_s16 + $0x3b0] sm:$0xff]  ;;  %v624_v40 = vld [vmem:[%s7342_s16 + $0x420] sm:$0xff]  ;;  %v5804_v46 = vpack.c.bf16 %v634_v44, %v631_v43  ;;  %v1205_v63 = vld [vmem:[%s7683_s17 + $0x8] sm:$0xff] }
  0x44   : > { %5853 = vmatprep.subr.bf16.mxu1 %v5852_v23  ;;  %v630_v47 = vld [vmem:[%s7342_s16 + $0x450] sm:$0xff]  ;;  %v476_v54 = vld [vmem:[%s9260_s0 + $0xa0] sm:$0xff]  ;;  %v1209_v0 = vld [vmem:[%s7683_s17 + $0x28] sm:$0xff] }
  0x45   : > { %5763 = vmatpush1.bf16.msra.mxu0 %v5762_v15  ;;  %1007 = vmatmul.mubr.f32.gmra.mrb[6].mxu1 %v7483_v27  ;;  %v7572_v15 = vld [vmem:[%s9260_s0 + $0xc0] sm:$0xff]  ;;  %v470_v52 = vld [vmem:[%s9260_s0 + $0x70] sm:$0xff]  ;;  %v6064_v1 = vpack.c.bf16 %v1209_v0, %v1205_v63  ;;  %v1225_v19 = vld [vmem:[%s7683_s17 + $0xa8] sm:$0xff] }
  0x46   : > { %5765 = vmatprep.subr.bf16.mxu0 %v5764_v17  ;;  %1011 = vmatprep.mubr.f32.mxu1 %v7490_v31  ;;  %v1208_v3 = vld [vmem:[%s7683_s17 + $0x20] sm:$0xff] }
  0x47   : > { %5855 = vmatpush3.bf16.msra.mxu1 %v5852_v23  ;;  %v7590_v23 = vld [vmem:[%s9260_s0 + $0xd8] sm:$0xff]  ;;  %v1212_v10 = vld [vmem:[%s7683_s17 + $0x40] sm:$0xff] }
  0x48   : > { %5857 = vmatprep.subr.bf16.mxu1 %v5856_v34  ;;  %v1216_v11 = vld [vmem:[%s7683_s17 + $0x60] sm:$0xff] }
  0x49   : > { %5767 = vmatpush1.bf16.msra.mxu0 %v5766_v26  ;;  %1012 = vmatmul.mubr.f32.gmra.mrb[8].mxu1 %v7501_v38  ;;  %v615_v26 = vld [vmem:[%s7342_s16 + $0x3d8] sm:$0xff]  ;;  %v1236_v43 = vld [vmem:[%s7683_s17 + $0x100] sm:$0xff] }
  0x4a   : > { %5769 = vmatprep.subr.bf16.mxu0 %v5768_v28  ;;  %1016 = vmatprep.mubr.f32.mxu1 %v7508_v42  ;;  %v622_v28 = vld [vmem:[%s7342_s16 + $0x410] sm:$0xff]  ;;  %v5794_v29 = vpack.c.bf16 %v615_v26, %v612_v25  ;;  %v4766_v26 = vld [vmem:[%s7683_s17 + $0x640] sm:$0xff] }
  0x4b   : > { %5859 = vmatpush3.bf16.msra.mxu1 %v5856_v34  ;;  %v621_v34 = vld [vmem:[%s7342_s16 + $0x408] sm:$0xff]  ;;  %v1240_v44 = vld [vmem:[%s7683_s17 + $0x120] sm:$0xff] }
  0x4c   : > { %5861 = vmatprep.subr.bf16.mxu1 %v5860_v45  ;;  %v5798_v36 = vpack.c.bf16 %v621_v34, %v618_v33  ;;  %v1232_v33 = vld [vmem:[%s7683_s17 + $0xe0] sm:$0xff] }
  0x4d   : > { %5771 = vmatpush1.bf16.msra.mxu0 %v5770_v37  ;;  %1017 = vmatmul.mubr.f32.gmra.mrb[10].mxu1 %v7519_v49  ;;  %v489_v37 = vld [vmem:[%s9260_s0 + $0x108] sm:$0xff]  ;;  %v4790_v63 = vld [vmem:[%s7683_s17 + $0x700] sm:$0xff] }
  0x4e   : > { %5773 = vmatprep.subr.bf16.mxu0 %v5772_v39  ;;  %1021 = vmatprep.mubr.f32.mxu1 %v7526_v53  ;;  %v4794_v0 = vld [vmem:[%s7683_s17 + $0x720] sm:$0xff] }
  0x4f   : > { %5863 = vmatpush3.bf16.msra.mxu1 %v5860_v45  ;;  %v461_v45 = vld [vmem:[%s9260_s0 + $0x28] sm:$0xff] }
  0x50   : > { %5865 = vmatprep.subr.bf16.mxu1 %v5864_v56 }
  0x51   : > { %5775 = vmatpush1.bf16.msra.mxu0 %v5774_v48  ;;  %1022 = vmatmul.mubr.f32.gmra.mrb[12].mxu1 %v7535_v59  ;;  %v633_v48 = vld [vmem:[%s7342_s16 + $0x468] sm:$0xff] }
  0x52   : > { %5777 = vmatprep.subr.bf16.mxu0 %v5776_v50  ;;  %1026 = vmatprep.mubr.f32.mxu1 %v7544_v2  ;;  %v464_v50 = vld [vmem:[%s9260_s0 + $0x40] sm:$0xff]  ;;  %v5806_v51 = vpack.c.bf16 %v633_v48, %v630_v47 }
  0x53   : > { %5867 = vmatpush3.bf16.msra.mxu1 %v5864_v56  ;;  %v482_v56 = vld [vmem:[%s9260_s0 + $0xd0] sm:$0xff]  ;;  %v4782_v48 = vld [vmem:[%s7683_s17 + $0x6c0] sm:$0xff] }
  0x54   : > { %718 = vmatmul.mubr.f32.vlgmr.msra.gmra.mrb[0].mxu0 %v7429_v58  ;;  %v607_v58 = vld [vmem:[%s7342_s16 + $0x398] sm:$0xff]  ;;  %5869 = vmatprep.subr.bf16.mxu1 %v5868_v13 }
  0x55   : > { %5779 = vmatpush1.bf16.msra.mxu0 %v5778_v57  ;;  %723 = vmatprep.mubr.f32.mxu0 %v7436_v62  ;;  %v7564_v62 = vld [vmem:[%s9260_s0 + $0xc8] sm:$0xff]  ;;  %v5788_v17 = vpack.c.bf16 %v610_v12, %v607_v58  ;;  %v6070_v58 = vpack.c.bf16 %v1216_v11, %v1212_v10 }
  0x56   : > { %5781 = vmatprep.subr.bf16.mxu0 %v5780_v60  ;;  %1027 = vmatmul.mubr.f32.gmra.mrb[14].mxu1 %v7554_v7  ;;  %v485_v57 = vld [vmem:[%s9260_s0 + $0xe8] sm:$0xff]  ;;  %v491_v60 = vld [vmem:[%s9260_s0 + $0x118] sm:$0xff] }
  0x57   : > { %1031 = vmatprep.mubr.f32.mxu1 %v7564_v62  ;;  %5871 = vmatpush3.bf16.msra.mxu1 %v5868_v13  ;;  %v4759_v12 = vld [vmem:[%s7683_s17 + $0x608] sm:$0xff] }
  0x58   : > { %724 = vmatmul.mubr.f32.gmra.mrb[2].mxu0 %v7447_v5  ;;  %v613_v5 = vld [vmem:[%s7342_s16 + $0x3c8] sm:$0xff]  ;;  %6065 = vmatprep.subr.bf16.mxu1 %v6064_v1 }
  0x59   : > { %729 = vmatprep.mubr.f32.mxu0 %v7454_v9  ;;  %5783 = vmatpush1.bf16.msra.mxu0 %v5782_v6  ;;  %v7582_v9 = vld [vmem:[%s9260_s0 + $0xe0] sm:$0xff]  ;;  %v5792_v24 = vpack.c.bf16 %v616_v21, %v613_v5  ;;  %v1213_v6 = vld [vmem:[%s7683_s17 + $0x48] sm:$0xff] }
  0x5a   : > { %5785 = vmatprep.subr.bf16.mxu0 %v5784_v8  ;;  %1032 = vmatmul.mubr.f32.gmra.mrb[16].mxu1 %v7572_v15  ;;  %v1220_v21 = vld [vmem:[%s7683_s17 + $0x80] sm:$0xff]  ;;  %v1253_v1 = vld [vmem:[%s7683_s17 + $0x188] sm:$0xff] }
  0x5b   : > { %1036 = vmatprep.mubr.f32.mxu1 %v7582_v9  ;;  %v4799_v10 = vld [vmem:[%s7683_s17 + $0x748] sm:$0xff] }
  0x5c   : > { %730 = vmatmul.mubr.f32.gmra.mrb[4].mxu0 %v7465_v16  ;;  %v7598_v16 = vld [vmem:[%s9260_s0 + $0xf8] sm:$0xff]  ;;  %v4803_v11 = vld [vmem:[%s7683_s17 + $0x768] sm:$0xff] }
  0x5d   : > { %735 = vmatprep.mubr.f32.mxu0 %v7472_v20  ;;  %5787 = vmatpush1.bf16.msra.mxu0 %v5786_v14  ;;  %v619_v20 = vld [vmem:[%s7342_s16 + $0x3f8] sm:$0xff]  ;;  %v4758_v14 = vld [vmem:[%s7683_s17 + $0x600] sm:$0xff] }
  0x5e   : > { %5789 = vmatprep.subr.bf16.mxu0 %v5788_v17  ;;  %1037 = vmatmul.mubr.f32.gmra.mrb[18].mxu1 %v7590_v23  ;;  %v5796_v32 = vpack.c.bf16 %v622_v28, %v619_v20  ;;  %v1221_v17 = vld [vmem:[%s7683_s17 + $0x88] sm:$0xff] }
  0x5f   : > { %1041 = vmatprep.mubr.f32.mxu1 %v7598_v16  ;;  %v6072_v5 = vpack.c.bf16 %v1225_v19, %v1221_v17  ;;  %v1229_v20 = vld [vmem:[%s7683_s17 + $0xc8] sm:$0xff]  ;;  %v1260_v17 = vld [vmem:[%s7683_s17 + $0x1c0] sm:$0xff] }
  0x60   : > { %736 = vmatmul.mubr.f32.gmra.mrb[6].mxu0 %v7483_v27  ;;  %v490_v27 = vld [vmem:[%s9260_s0 + $0x110] sm:$0xff] }
  0x61   : > { %741 = vmatprep.mubr.f32.mxu0 %v7490_v31  ;;  %5791 = vmatpush1.bf16.msra.mxu0 %v5790_v22  ;;  %v625_v31 = vld [vmem:[%s7342_s16 + $0x428] sm:$0xff] }
  0x62   : > { %5793 = vmatprep.subr.bf16.mxu0 %v5792_v24  ;;  %1042 = vmatmul.mubr.f32.gmra.mrb[20].mxu1 %v486_v30  ;;  %v5800_v39 = vpack.c.bf16 %v628_v35, %v625_v31  ;;  %v4771_v24 = vld [vmem:[%s7683_s17 + $0x668] sm:$0xff] }
  0x63   : > { %1046 = vmatprep.mubr.f32.mxu1 %v490_v27  ;;  %v4779_v31 = vld [vmem:[%s7683_s17 + $0x6a8] sm:$0xff] }
  0x64   : > { %742 = vmatmul.mubr.f32.gmra.mrb[8].mxu0 %v7501_v38  ;;  %v458_v38 = vld [vmem:[%s9260_s0 + $0x10] sm:$0xff] }
  0x65   : > { %747 = vmatprep.mubr.f32.mxu0 %v7508_v42  ;;  %5795 = vmatpush1.bf16.msra.mxu0 %v5794_v29  ;;  %v5802_v42 = vpack.c.bf16 %v627_v41, %v624_v40  ;;  %v1233_v29 = vld [vmem:[%s7683_s17 + $0xe8] sm:$0xff] }
  0x66   : > { %5797 = vmatprep.subr.bf16.mxu0 %v5796_v32  ;;  %1047 = vmatmul.mubr.f32.gmra.mrb[22].mxu1 %v489_v37  ;;  %v1228_v32 = vld [vmem:[%s7683_s17 + $0xc0] sm:$0xff]  ;;  %v1241_v41 = vld [vmem:[%s7683_s17 + $0x128] sm:$0xff] }
  0x67   : > { %5694 = vmatprep.mubr.f32.mxu1 %v458_v38  ;;  %v6078_v34 = vpack.c.bf16 %v1232_v33, %v1228_v32  ;;  %v4815_v32 = vld [vmem:[%s7683_s17 + $0x7c8] sm:$0xff] }
  0x68   : > { %748 = vmatmul.mubr.f32.gmra.mrb[10].mxu0 %v7519_v49  ;;  %v467_v49 = vld [vmem:[%s9260_s0 + $0x58] sm:$0xff]  ;;  %v4819_v33 = vld [vmem:[%s7683_s17 + $0x7e8] sm:$0xff] }
  0x69   : > { %753 = vmatprep.mubr.f32.mxu0 %v7526_v53  ;;  %5799 = vmatpush1.bf16.msra.mxu0 %v5798_v36  ;;  %v473_v53 = vld [vmem:[%s9260_s0 + $0x88] sm:$0xff]  ;;  %v4774_v36 = vld [vmem:[%s7683_s17 + $0x680] sm:$0xff] }
  0x6a   : > { %5801 = vmatprep.subr.bf16.mxu0 %v5800_v39  ;;  %5695 = vmatmul.mubr.f32.vlgmr.msra.gmra.mrb[24].mxu1 %v461_v45  ;;  %v1237_v39 = vld [vmem:[%s7683_s17 + $0x108] sm:$0xff] }
  0x6b   : > { %5697 = vmatprep.mubr.f32.mxu1 %v464_v50 }
  0x6c   : > { %754 = vmatmul.mubr.f32.gmra.mrb[12].mxu0 %v7535_v59  ;;  %v488_v59 = vld [vmem:[%s9260_s0 + $0x100] sm:$0xff] }
  0x6d   : > { %759 = vmatprep.mubr.f32.mxu0 %v7544_v2  ;;  %5803 = vmatpush1.bf16.msra.mxu0 %v5802_v42  ;;  %v1204_v2 = vld [vmem:[%s7683_s17] sm:$0xff]  ;;  %v6082_v42 = vpack.c.bf16 %v1240_v44, %v1236_v43  ;;  %v4823_v43 = vld [vmem:[%s7683_s17 + $0x808] sm:$0xff] }
  0x6e   : > { %5805 = vmatprep.subr.bf16.mxu0 %v5804_v46  ;;  %5698 = vmatmul.mubr.f32.gmra.mrb[26].mxu1 %v467_v49  ;;  %v6066_v4 = vpack.c.bf16 %v1208_v3, %v1204_v2  ;;  %v4787_v46 = vld [vmem:[%s7683_s17 + $0x6e8] sm:$0xff]  ;;  %v5890_v2 = vpack.c.bf16 %v4794_v0, %v4790_v63 }
  0x6f   : > { %5700 = vmatprep.mubr.f32.mxu1 %v470_v52  ;;  %v1257_v3 = vld [vmem:[%s7683_s17 + $0x1a8] sm:$0xff] }
  0x70   : > { %760 = vmatmul.mubr.f32.gmra.mrb[14].mxu0 %v7554_v7  ;;  %6067 = vmatpush1.bf16.msra.mxu1 %v6066_v4  ;;  %v1217_v7 = vld [vmem:[%s7683_s17 + $0x68] sm:$0xff]  ;;  %v1252_v4 = vld [vmem:[%s7683_s17 + $0x180] sm:$0xff] }
  0x71   : > { %765 = vmatprep.mubr.f32.mxu0 %v7564_v62  ;;  %5807 = vmatpush1.bf16.msra.mxu0 %v5806_v51  ;;  %v6068_v8 = vpack.c.bf16 %v1217_v7, %v1213_v6  ;;  %v4763_v62 = vld [vmem:[%s7683_s17 + $0x628] sm:$0xff]  ;;  %v1256_v6 = vld [vmem:[%s7683_s17 + $0x1a0] sm:$0xff]  ;;  %v6088_v7 = vpack.c.bf16 %v1257_v3, %v1253_v1 }
  0x72   : > { %5701 = vmatmul.mubr.f32.gmra.mrb[28].mxu1 %v473_v53  ;;  %v5872_v13 = vpack.c.bf16 %v4763_v62, %v4759_v12  ;;  %v4798_v12 = vld [vmem:[%s7683_s17 + $0x740] sm:$0xff]  ;;  %v4827_v44 = vld [vmem:[%s7683_s17 + $0x828] sm:$0xff] }
  0x73   : > { %5703 = vmatprep.mubr.f32.mxu1 %v476_v54  ;;  %6069 = vmatprep.subr.bf16.mxu1 %v6068_v8  ;;  %v6090_v8 = vpack.c.bf16 %v1256_v6, %v1252_v4  ;;  %v4802_v62 = vld [vmem:[%s7683_s17 + $0x760] sm:$0xff]  ;;  %v1297_v0 = vld [vmem:[%s7683_s17 + $0x2e8] sm:$0xff] }
  0x74   : > { %766 = vmatmul.mubr.f32.gmra.mrb[16].mxu0 %v7572_v15  ;;  %6071 = vmatpush1.bf16.msra.mxu1 %v6070_v58  ;;  %v4762_v15 = vld [vmem:[%s7683_s17 + $0x620] sm:$0xff]  ;;  %v5892_v58 = vpack.c.bf16 %v4803_v11, %v4799_v10  ;;  %v4839_v6 = vld [vmem:[%s7683_s17 + $0x888] sm:$0xff] }
  0x75   : > { %771 = vmatprep.mubr.f32.mxu0 %v7582_v9  ;;  %5873 = vmatprep.subr.bf16.mxu0 %v5872_v13  ;;  %v5874_v18 = vpack.c.bf16 %v4762_v15, %v4758_v14  ;;  %v1224_v9 = vld [vmem:[%s7683_s17 + $0xa0] sm:$0xff]  ;;  %v1261_v13 = vld [vmem:[%s7683_s17 + $0x1c8] sm:$0xff]  ;;  %v5894_v14 = vpack.c.bf16 %v4802_v62, %v4798_v12 }
  0x76   : > { %5704 = vmatmul.mubr.f32.gmra.mrb[30].mxu1 %v479_v55  ;;  %v6074_v22 = vpack.c.bf16 %v1224_v9, %v1220_v21  ;;  %6073 = vmatprep.subr.bf16.mxu1 %v6072_v5  ;;  %v1265_v15 = vld [vmem:[%s7683_s17 + $0x1e8] sm:$0xff]  ;;  %v1292_v1 = vld [vmem:[%s7683_s17 + $0x2c0] sm:$0xff] }
  0x77   : > { %5706 = vmatprep.mubr.f32.mxu1 %v482_v56  ;;  %v6092_v19 = vpack.c.bf16 %v1265_v15, %v1261_v13  ;;  %v4807_v21 = vld [vmem:[%s7683_s17 + $0x788] sm:$0xff]  ;;  %v4838_v10 = vld [vmem:[%s7683_s17 + $0x880] sm:$0xff] }
  0x78   : > { %772 = vmatmul.mubr.f32.gmra.mrb[18].mxu0 %v7590_v23  ;;  %6075 = vmatpush1.bf16.msra.mxu1 %v6074_v22  ;;  %v4767_v23 = vld [vmem:[%s7683_s17 + $0x648] sm:$0xff]  ;;  %v4842_v11 = vld [vmem:[%s7683_s17 + $0x8a0] sm:$0xff] }
  0x79   : > { %777 = vmatprep.mubr.f32.mxu0 %v7598_v16  ;;  %v5876_v25 = vpack.c.bf16 %v4771_v24, %v4767_v23  ;;  %v4770_v16 = vld [vmem:[%s7683_s17 + $0x660] sm:$0xff]  ;;  %v4811_v9 = vld [vmem:[%s7683_s17 + $0x7a8] sm:$0xff]  ;;  %v5914_v12 = vpack.c.bf16 %v4842_v11, %v4838_v10 }
  0x7a   : > { %5707 = vmatmul.mubr.f32.gmra.mrb[32].mxu1 %v485_v57  ;;  %v5878_v28 = vpack.c.bf16 %v4770_v16, %v4766_v26  ;;  %v5896_v22 = vpack.c.bf16 %v4811_v9, %v4807_v21  ;;  %v4806_v23 = vld [vmem:[%s7683_s17 + $0x780] sm:$0xff]  ;;  %v1273_v16 = vld [vmem:[%s7683_s17 + $0x228] sm:$0xff] }
  0x7b   : > { %5709 = vmatprep.mubr.f32.mxu1 %v488_v59  ;;  %v4810_v24 = vld [vmem:[%s7683_s17 + $0x7a0] sm:$0xff]  ;;  %v1305_v62 = vld [vmem:[%s7683_s17 + $0x328] sm:$0xff] }
  0x7c   : > { %778 = vmatmul.mubr.f32.gmra.mrb[20].mxu0 %v486_v30  ;;  %v6076_v30 = vpack.c.bf16 %v1233_v29, %v1229_v20  ;;  %v5898_v26 = vpack.c.bf16 %v4810_v24, %v4806_v23  ;;  %v1268_v20 = vld [vmem:[%s7683_s17 + $0x200] sm:$0xff]  ;;  %v1313_v24 = vld [vmem:[%s7683_s17 + $0x368] sm:$0xff] }
  0x7d   : > { %783 = vmatprep.mubr.f32.mxu0 %v490_v27  ;;  %v4775_v27 = vld [vmem:[%s7683_s17 + $0x688] sm:$0xff]  ;;  %v1300_v13 = vld [vmem:[%s7683_s17 + $0x300] sm:$0xff] }
  0x7e   : > { %5710 = vmatmul.mubr.f32.gmra.mrb[34].mxu1 %v491_v60  ;;  %6077 = vmatprep.subr.bf16.mxu1 %v6076_v30  ;;  %v5880_v35 = vpack.c.bf16 %v4779_v31, %v4775_v27  ;;  %v4814_v27 = vld [vmem:[%s7683_s17 + $0x7c0] sm:$0xff] }
  0x7f   : > { %6079 = vmatpush1.bf16.msra.mxu1 %v6078_v34  ;;  %v5900_v34 = vpack.c.bf16 %v4819_v33, %v4815_v32  ;;  %v4818_v31 = vld [vmem:[%s7683_s17 + $0x7e0] sm:$0xff] }
  0x80   : > { %784 = vmatmul.mubr.f32.gmra.mrb[22].mxu0 %v489_v37  ;;  %v4778_v37 = vld [vmem:[%s7683_s17 + $0x6a0] sm:$0xff] }
  0x81   : > { %854 = vmatprep.mubr.f32.mxu0 %v7273_v61  ;;  %v5882_v40 = vpack.c.bf16 %v4778_v37, %v4774_v36  ;;  %v5902_v36 = vpack.c.bf16 %v4818_v31, %v4814_v27  ;;  %v1281_v37 = vld [vmem:[%s7683_s17 + $0x268] sm:$0xff]  ;;  %v4846_v21 = vld [vmem:[%s7683_s17 + $0x8c0] sm:$0xff] }
  0x82   : > { %v4850_v9 = vld [vmem:[%s7683_s17 + $0x8e0] sm:$0xff]  ;;  %v1321_v31 = vld [vmem:[%s7683_s17 + $0x3a8] sm:$0xff] }
  0x83   : > { %v5918_v23 = vpack.c.bf16 %v4850_v9, %v4846_v21  ;;  %v4854_v32 = vld [vmem:[%s7683_s17 + $0x900] sm:$0xff] }
  0x84   : > { %855 = vmatmul.mubr.f32.vlgmr.msra.gmra.mrb[0].mxu0 %v458_v38  ;;  %v6080_v38 = vpack.c.bf16 %v1241_v41, %v1237_v39  ;;  %v1276_v39 = vld [vmem:[%s7683_s17 + $0x240] sm:$0xff] }
  0x85   : > { %860 = vmatprep.mubr.f32.mxu0 %v7273_v61  ;;  %5875 = vmatpush1.bf16.msra.mxu0 %v5874_v18  ;;  %v1264_v18 = vld [vmem:[%s7683_s17 + $0x1e0] sm:$0xff] }
  0x86   : > { %5877 = vmatprep.subr.bf16.mxu0 %v5876_v25  ;;  %6081 = vmatprep.subr.bf16.mxu1 %v6080_v38  ;;  %v6094_v5 = vpack.c.bf16 %v1264_v18, %v1260_v17  ;;  %v1269_v25 = vld [vmem:[%s7683_s17 + $0x208] sm:$0xff]  ;;  %v4858_v33 = vld [vmem:[%s7683_s17 + $0x920] sm:$0xff] }
  0x87   : > { %6083 = vmatpush1.bf16.msra.mxu1 %v6082_v42  ;;  %v6096_v29 = vpack.c.bf16 %v1273_v16, %v1269_v25  ;;  %v5904_v42 = vpack.c.bf16 %v4827_v44, %v4823_v43  ;;  %v4847_v18 = vld [vmem:[%s7683_s17 + $0x8c8] sm:$0xff]  ;;  %v1308_v25 = vld [vmem:[%s7683_s17 + $0x340] sm:$0xff]  ;;  %v5922_v27 = vpack.c.bf16 %v4858_v33, %v4854_v32  ;;  %v638_v32 = vlaneseq }
  0x88   : > { %861 = vmatmul.mubr.f32.gmra.mrb[2].mxu0 %v461_v45  ;;  %v4783_v45 = vld [vmem:[%s7683_s17 + $0x6c8] sm:$0xff]  ;;  %v4862_v43 = vld [vmem:[%s7683_s17 + $0x940] sm:$0xff] }
  0x89   : > { %866 = vmatprep.mubr.f32.mxu0 %v7273_v61  ;;  %5879 = vmatpush1.bf16.msra.mxu0 %v5878_v28  ;;  %v5884_v47 = vpack.c.bf16 %v4787_v46, %v4783_v45  ;;  %v1272_v28 = vld [vmem:[%s7683_s17 + $0x220] sm:$0xff] }
  0x8a   : > { %5881 = vmatprep.subr.bf16.mxu0 %v5880_v35  ;;  %v6098_v30 = vpack.c.bf16 %v1272_v28, %v1268_v20  ;;  %v1277_v35 = vld [vmem:[%s7683_s17 + $0x248] sm:$0xff]  ;;  %v4822_v45 = vld [vmem:[%s7683_s17 + $0x800] sm:$0xff] }
  0x8b   : > { %v6100_v41 = vpack.c.bf16 %v1281_v37, %v1277_v35  ;;  %v4826_v46 = vld [vmem:[%s7683_s17 + $0x820] sm:$0xff]  ;;  %v4855_v28 = vld [vmem:[%s7683_s17 + $0x908] sm:$0xff] }
  0x8c   : > { %867 = vmatmul.mubr.f32.gmra.mrb[4].mxu0 %v464_v50  ;;  %v4786_v50 = vld [vmem:[%s7683_s17 + $0x6e0] sm:$0xff] }
  0x8d   : > { %872 = vmatprep.mubr.f32.mxu0 %v7273_v61  ;;  %5883 = vmatpush1.bf16.msra.mxu0 %v5882_v40  ;;  %v5886_v51 = vpack.c.bf16 %v4786_v50, %v4782_v48  ;;  %v1280_v40 = vld [vmem:[%s7683_s17 + $0x260] sm:$0xff]  ;;  %v5906_v48 = vpack.c.bf16 %v4826_v46, %v4822_v45  ;;  %v1289_v50 = vld [vmem:[%s7683_s17 + $0x2a8] sm:$0xff] }
  0x8e   : > { %5885 = vmatprep.subr.bf16.mxu0 %v5884_v47  ;;  %v6102_v38 = vpack.c.bf16 %v1280_v40, %v1276_v39  ;;  %v1285_v47 = vld [vmem:[%s7683_s17 + $0x288] sm:$0xff]  ;;  %v1316_v35 = vld [vmem:[%s7683_s17 + $0x380] sm:$0xff] }
  0x8f   : > { %v4863_v40 = vld [vmem:[%s7683_s17 + $0x948] sm:$0xff]  ;;  %v4866_v44 = vld [vmem:[%s7683_s17 + $0x960] sm:$0xff] }
  0x90   : > { %873 = vmatmul.mubr.f32.gmra.mrb[6].mxu0 %v467_v49  ;;  %v1245_v49 = vld [vmem:[%s7683_s17 + $0x148] sm:$0xff]  ;;  %v5926_v45 = vpack.c.bf16 %v4866_v44, %v4862_v43 }
  0x91   : > { %878 = vmatprep.mubr.f32.mxu0 %v7273_v61  ;;  %5887 = vmatpush1.bf16.msra.mxu0 %v5886_v51  ;;  %v1288_v51 = vld [vmem:[%s7683_s17 + $0x2a0] sm:$0xff]  ;;  %v1329_v46 = vld [vmem:[%s7683_s17 + $0x3e8] sm:$0xff] }
  0x94   : > { %879 = vmatmul.mubr.f32.gmra.mrb[8].mxu0 %v470_v52  ;;  %v1249_v52 = vld [vmem:[%s7683_s17 + $0x168] sm:$0xff] }
  0x95   : > { %884 = vmatprep.mubr.f32.mxu0 %v7273_v61 }
  0x98   : > { %885 = vmatmul.mubr.f32.gmra.mrb[10].mxu0 %v473_v53  ;;  %v1244_v53 = vld [vmem:[%s7683_s17 + $0x140] sm:$0xff] }
  0x99   : > { %890 = vmatprep.mubr.f32.mxu0 %v7273_v61 }
  0x9c   : > { %891 = vmatmul.mubr.f32.gmra.mrb[12].mxu0 %v476_v54  ;;  %v1248_v54 = vld [vmem:[%s7683_s17 + $0x160] sm:$0xff] }
  0x9d   : > { %896 = vmatprep.mubr.f32.mxu0 %v7273_v61 }
  0xa0   : > { %897 = vmatmul.mubr.f32.gmra.mrb[14].mxu0 %v479_v55  ;;  %v6084_v55 = vpack.c.bf16 %v1249_v52, %v1245_v49  ;;  %v1284_v49 = vld [vmem:[%s7683_s17 + $0x280] sm:$0xff]  ;;  %v6104_v52 = vpack.c.bf16 %v1289_v50, %v1285_v47 }
  0xa1   : > { %902 = vmatprep.mubr.f32.mxu0 %v7273_v61  ;;  %v1324_v47 = vld [vmem:[%s7683_s17 + $0x3c0] sm:$0xff] }
  0xa2   : > { %6085 = vmatprep.subr.bf16.mxu1 %v6084_v55  ;;  %v4835_v55 = vld [vmem:[%s7683_s17 + $0x868] sm:$0xff] }
  0xa4   : > { %903 = vmatmul.mubr.f32.gmra.mrb[16].mxu0 %v482_v56  ;;  %v6086_v56 = vpack.c.bf16 %v1248_v54, %v1244_v53  ;;  %v6106_v53 = vpack.c.bf16 %v1288_v51, %v1284_v49  ;;  %v4831_v54 = vld [vmem:[%s7683_s17 + $0x848] sm:$0xff] }
  0xa5   : > { %908 = vmatprep.mubr.f32.mxu0 %v7273_v61  ;;  %v4871_v51 = vld [vmem:[%s7683_s17 + $0x988] sm:$0xff] }
  0xa6   : > { %6087 = vmatpush1.bf16.msra.mxu1 %v6086_v56  ;;  %v5908_v56 = vpack.c.bf16 %v4835_v55, %v4831_v54  ;;  %v4870_v54 = vld [vmem:[%s7683_s17 + $0x980] sm:$0xff] }
  0xa7   : > { %6089 = vmatprep.subr.bf16.mxu1 %v6088_v7  ;;  %v4843_v7 = vld [vmem:[%s7683_s17 + $0x8a8] sm:$0xff]  ;;  %v4874_v55 = vld [vmem:[%s7683_s17 + $0x9a0] sm:$0xff] }
  0xa8   : > { %909 = vmatmul.mubr.f32.gmra.mrb[18].mxu0 %v485_v57  ;;  %v4791_v57 = vld [vmem:[%s7683_s17 + $0x708] sm:$0xff] }
  0xa9   : > { %914 = vmatprep.mubr.f32.mxu0 %v7273_v61 }
  0xaa   : > { %6091 = vmatpush1.bf16.msra.mxu1 %v6090_v8  ;;  %v5912_v8 = vpack.c.bf16 %v4843_v7, %v4839_v6  ;;  %v4887_v6 = vld [vmem:[%s7683_s17 + $0xa08] sm:$0xff] }
  0xab   : > { %6093 = vmatprep.subr.bf16.mxu1 %v6092_v19  ;;  %v4851_v19 = vld [vmem:[%s7683_s17 + $0x8e8] sm:$0xff] }
  0xac   : > { %915 = vmatmul.mubr.f32.gmra.mrb[20].mxu0 %v488_v59  ;;  %v4795_v59 = vld [vmem:[%s7683_s17 + $0x728] sm:$0xff] }
  0xad   : > { %920 = vmatprep.mubr.f32.mxu0 %v7273_v61  ;;  %v4891_v7 = vld [vmem:[%s7683_s17 + $0xa28] sm:$0xff] }
  0xae   : > { %6095 = vmatpush1.bf16.msra.mxu1 %v6094_v5  ;;  %v5916_v5 = vpack.c.bf16 %v4851_v19, %v4847_v18 }
  0xaf   : > { %6097 = vmatprep.subr.bf16.mxu1 %v6096_v29  ;;  %v4859_v29 = vld [vmem:[%s7683_s17 + $0x928] sm:$0xff] }
  0xb0   : > { %921 = vmatmul.mubr.f32.gmra.mrb[22].mxu0 %v491_v60  ;;  %v5888_v60 = vpack.c.bf16 %v4795_v59, %v4791_v57  ;;  %v4830_v57 = vld [vmem:[%s7683_s17 + $0x840] sm:$0xff] }
  0xb1   : > { %v4834_v59 = vld [vmem:[%s7683_s17 + $0x860] sm:$0xff] }
  0xb2   : > { %5889 = vmatprep.subr.bf16.mxu0 %v5888_v60  ;;  %6099 = vmatpush1.bf16.msra.mxu1 %v6098_v30  ;;  %v1293_v60 = vld [vmem:[%s7683_s17 + $0x2c8] sm:$0xff]  ;;  %v5910_v63 = vpack.c.bf16 %v4834_v59, %v4830_v57  ;;  %v5920_v30 = vpack.c.bf16 %v4859_v29, %v4855_v28  ;;  %v5930_v57 = vpack.c.bf16 %v4874_v55, %v4870_v54 }
  0xb3   : > { %5891 = vmatpush1.bf16.msra.mxu0 %v5890_v2  ;;  %6101 = vmatprep.subr.bf16.mxu1 %v6100_v41  ;;  %v1296_v2 = vld [vmem:[%s7683_s17 + $0x2e0] sm:$0xff]  ;;  %v6108_v3 = vpack.c.bf16 %v1297_v0, %v1293_v60  ;;  %v4867_v41 = vld [vmem:[%s7683_s17 + $0x968] sm:$0xff] }
  0xb4   : > { %5893 = vmatprep.subr.bf16.mxu0 %v5892_v58  ;;  %v6110_v4 = vpack.c.bf16 %v1296_v2, %v1292_v1  ;;  %v1301_v58 = vld [vmem:[%s7683_s17 + $0x308] sm:$0xff]  ;;  %v4878_v2 = vld [vmem:[%s7683_s17 + $0x9c0] sm:$0xff] }
  0xb5   : > { %v6112_v15 = vpack.c.bf16 %v1305_v62, %v1301_v58  ;;  %v1337_v59 = vld [vmem:[%s7683_s17 + $0x428] sm:$0xff] }
  0xb6   : > { %6103 = vmatpush1.bf16.msra.mxu1 %v6102_v38  ;;  %v5924_v38 = vpack.c.bf16 %v4867_v41, %v4863_v40  ;;  %v4883_v0 = vld [vmem:[%s7683_s17 + $0x9e8] sm:$0xff]  ;;  %v636_v41 = vld [vmem:[%s425_s20] sm:$0x7]  ;;  %s451_s20 = scalar_lea.vmem %s9268_s8, %s9271_s10 }
  0xb7   : > { %5895 = vmatpush1.bf16.msra.mxu0 %v5894_v14  ;;  %6105 = vmatprep.subr.bf16.mxu1 %v6104_v52  ;;  %v1304_v14 = vld [vmem:[%s7683_s17 + $0x320] sm:$0xff]  ;;  %v4875_v52 = vld [vmem:[%s7683_s17 + $0x9a8] sm:$0xff] }
  0xb8   : > { %5897 = vmatprep.subr.bf16.mxu0 %v5896_v22  ;;  %v6114_v17 = vpack.c.bf16 %v1304_v14, %v1300_v13  ;;  %v1309_v22 = vld [vmem:[%s7683_s17 + $0x348] sm:$0xff] }
  0xb9   : > { %v6116_v16 = vpack.c.bf16 %v1313_v24, %v1309_v22 }
  0xba   : > { %6107 = vmatpush1.bf16.msra.mxu1 %v6106_v53  ;;  %v5928_v53 = vpack.c.bf16 %v4875_v52, %v4871_v51 }
  0xbb   : > { %5899 = vmatpush1.bf16.msra.mxu0 %v5898_v26  ;;  %6109 = vmatprep.subr.bf16.mxu1 %v6108_v3  ;;  %v1312_v26 = vld [vmem:[%s7683_s17 + $0x360] sm:$0xff] }
  0xbc   : > { %5901 = vmatprep.subr.bf16.mxu0 %v5900_v34  ;;  %v6118_v20 = vpack.c.bf16 %v1312_v26, %v1308_v25  ;;  %v1317_v34 = vld [vmem:[%s7683_s17 + $0x388] sm:$0xff]  ;;  %v4882_v3 = vld [vmem:[%s7683_s17 + $0x9e0] sm:$0xff] }
  0xbd   : > { %v6120_v37 = vpack.c.bf16 %v1321_v31, %v1317_v34  ;;  %v7824_v31 = vshrl.u32 %v638_v32, 7 }
  0xbe   : > { %6111 = vmatpush1.bf16.msra.mxu1 %v6110_v4  ;;  %v5934_v4 = vpack.c.bf16 %v4882_v3, %v4878_v2 }
  0xbf   : > { %5903 = vmatpush1.bf16.msra.mxu0 %v5902_v36  ;;  %6113 = vmatprep.subr.bf16.mxu1 %v6112_v15  ;;  %v1320_v36 = vld [vmem:[%s7683_s17 + $0x3a0] sm:$0xff] }
  0xc0   : > { %5905 = vmatprep.subr.bf16.mxu0 %v5904_v42  ;;  %v6122_v39 = vpack.c.bf16 %v1320_v36, %v1316_v35  ;;  %v1325_v42 = vld [vmem:[%s7683_s17 + $0x3c8] sm:$0xff] }
  0xc1   : > { %v6124_v50 = vpack.c.bf16 %v1329_v46, %v1325_v42 }
  0xc2   : > { %6115 = vmatpush1.bf16.msra.mxu1 %v6114_v17 }
  0xc3   : > { %5907 = vmatpush1.bf16.msra.mxu0 %v5906_v48  ;;  %6117 = vmatprep.subr.bf16.mxu1 %v6116_v16  ;;  %v1328_v48 = vld [vmem:[%s7683_s17 + $0x3e0] sm:$0xff] }
  0xc4   : > { %5909 = vmatprep.subr.bf16.mxu0 %v5908_v56  ;;  %v6126_v49 = vpack.c.bf16 %v1328_v48, %v1324_v47  ;;  %v1333_v56 = vld [vmem:[%s7683_s17 + $0x408] sm:$0xff] }
  0xc5   : > { %v6128_v60 = vpack.c.bf16 %v1337_v59, %v1333_v56 }
  0xc6   : > { %6119 = vmatpush1.bf16.msra.mxu1 %v6118_v20 }
  0xc7   : > { %5911 = vmatpush1.bf16.msra.mxu0 %v5910_v63  ;;  %6121 = vmatprep.subr.bf16.mxu1 %v6120_v37  ;;  %v4879_v63 = vld [vmem:[%s7683_s17 + $0x9c8] sm:$0xff]  ;;  %v648_v37 = vsub.s32 2, %v7824_v31 }
  0xc8   : > { %5913 = vmatprep.subr.bf16.mxu0 %v5912_v8  ;;  %v5932_v1 = vpack.c.bf16 %v4883_v0, %v4879_v63  ;;  %v5936_v8 = vpack.c.bf16 %v4891_v7, %v4887_v6 }
  0xc9   : > { %v649_v43 = vrot.slane %v636_v41, %v648_v37 }
  0xca   : > { %6123 = vmatpush1.bf16.msra.mxu1 %v6122_v39 }
  0xcb   : > { %5915 = vmatpush1.bf16.msra.mxu0 %v5914_v12  ;;  %6125 = vmatprep.subr.bf16.mxu1 %v6124_v50 }
  0xcc   : > { %5917 = vmatprep.subr.bf16.mxu0 %v5916_v5 }
  0xce   : > { %6127 = vmatpush1.bf16.msra.mxu1 %v6126_v49 }
  0xcf   : > { %5919 = vmatpush1.bf16.msra.mxu0 %v5918_v23  ;;  %6129 = vmatprep.subr.bf16.mxu1 %v6128_v60 }
  0xd0   : > { %5921 = vmatprep.subr.bf16.mxu0 %v5920_v30 }
  0xd3   : > { %5923 = vmatpush1.bf16.msra.mxu0 %v5922_v27 }
  0xd4   : > { %5925 = vmatprep.subr.bf16.mxu0 %v5924_v38 }
  0xd7   : > { %5927 = vmatpush1.bf16.msra.mxu0 %v5926_v45 }
  0xd8   : > { %5929 = vmatprep.subr.bf16.mxu0 %v5928_v53 }
  0xdb   : > { %5931 = vmatpush1.bf16.msra.mxu0 %v5930_v57 }
  0xdc   : > { %5933 = vmatprep.subr.bf16.mxu0 %v5932_v1 }
  0xdf   : > { %5935 = vmatpush1.bf16.msra.mxu0 %v5934_v4 }
  0xe0   : > { %5937 = vmatprep.subr.bf16.mxu0 %v5936_v8 }
 0x10c   : > { %v5563_v10 = vpop.f32.mrb[0].mxu1 }
 0x10d   : > { %v5564_v11 = vpop.f32.mrb[1].mxu1 }
 0x10e   : > { %v5565_v58 = vadd.f32 %v5564_v11, %v5563_v10 }
 0x110   : > { %v5566_v12 = vpop.f32.mrb[2].mxu1  ;;  %v994_v48 = vadd.f32 %v5565_v58, %v649_v43 }
 0x111   : > { %v5567_v62 = vpop.f32.mrb[3].mxu1 }
 0x112   : > { %v5568_v13 = vadd.f32 %v5567_v62, %v5566_v12 }
 0x114   : > { %v5569_v14 = vpop.f32.mrb[4].mxu1  ;;  %v999_v46 = vadd.f32 %v5568_v13, %v649_v43 }
 0x115   : > { %v5570_v15 = vpop.f32.mrb[5].mxu1 }
 0x116   : > { %v5571_v17 = vadd.f32 %v5570_v15, %v5569_v14 }
 0x118   : > { %v5572_v18 = vpop.f32.mrb[6].mxu1  ;;  %v1004_v54 = vadd.f32 %v5571_v17, %v649_v43 }
 0x119   : > { %v5573_v19 = vpop.f32.mrb[7].mxu1 }
 0x11a   : > { %v5574_v5 = vadd.f32 %v5573_v19, %v5572_v18 }
 0x11c   : > { %v5575_v21 = vpop.f32.mrb[8].mxu1  ;;  %v1009_v52 = vadd.f32 %v5574_v5, %v649_v43 }
 0x11d   : > { %v5576_v9 = vpop.f32.mrb[9].mxu1 }
 0x11e   : > { %v5577_v22 = vadd.f32 %v5576_v9, %v5575_v21 }
 0x120   : > { %v5578_v23 = vpop.f32.mrb[10].mxu1  ;;  %v1014_v63 = vadd.f32 %v5577_v22, %v649_v43 }
 0x121   : > { %v5579_v24 = vpop.f32.mrb[11].mxu1 }
 0x122   : > { %v5580_v25 = vadd.f32 %v5579_v24, %v5578_v23 }
 0x124   : > { %v5581_v26 = vpop.f32.mrb[12].mxu1  ;;  %v1019_v59 = vadd.f32 %v5580_v25, %v649_v43 }
 0x125   : > { %v5582_v16 = vpop.f32.mrb[13].mxu1 }
 0x126   : > { %v5583_v20 = vadd.f32 %v5582_v16, %v5581_v26 }
 0x128   : > { %v1024_v7 = vadd.f32 %v5583_v20, %v649_v43 }
 0x129   : > { %v5584_v28 = vpop.f32.mrb[14].mxu1 }
 0x12a   : > { %v5585_v29 = vpop.f32.mrb[15].mxu1 }
 0x12b   : > { %v5586_v30 = vadd.f32 %v5585_v29, %v5584_v28 }
 0x12d   : > { %v5587_v33 = vpop.f32.mrb[16].mxu1  ;;  %v1029_v4 = vadd.f32 %v5586_v30, %v649_v43 }
 0x12e   : > { %v5588_v34 = vpop.f32.mrb[17].mxu1 }
 0x12f   : > { %v5589_v27 = vadd.f32 %v5588_v34, %v5587_v33  ;;  %v7839_v34 = vsub.s32 0, %v7824_v31 }
 0x131   : > { %v5590_v35 = vpop.f32.mrb[18].mxu1  ;;  %v1034_v14 = vadd.f32 %v5589_v27, %v649_v43 }
 0x132   : > { %v5591_v36 = vpop.f32.mrb[19].mxu1 }
 0x133   : > { %v5592_v39 = vadd.f32 %v5591_v36, %v5590_v35  ;;  %v7842_v35 = vsub.s32 1, %v7824_v31 }
 0x135   : > { %v5593_v40 = vpop.f32.mrb[20].mxu1  ;;  %v1039_v62 = vadd.f32 %v5592_v39, %v649_v43  ;;  %v7845_v39 = vrot.slane %v636_v41, %v7839_v34 }
 0x136   : > { %v5594_v38 = vpop.f32.mrb[21].mxu1 }
 0x137   : > { %v5595_v44 = vadd.f32 %v5594_v38, %v5593_v40  ;;  %v7848_v38 = vrot.slane %v636_v41, %v7842_v35 }
 0x139   : > { %v5596_v42 = vpop.f32.mrb[22].mxu1  ;;  %v1044_v21 = vadd.f32 %v5595_v44, %v649_v43 }
 0x13a   : > { %v5597_v45 = vpop.f32.mrb[23].mxu1 }
 0x13b   : > { %v5598_v47 = vadd.f32 %v5597_v45, %v5596_v42 }
 0x13d   : > { %v5696_v50 = vpop.f32.mrb[24].mxu1  ;;  %v1049_v19 = vadd.f32 %v5598_v47, %v649_v43 }
 0x13e   : > { %v1124_v49 = vadd.f32 %v5696_v50, %v999_v46  ;;  %v1118_v51 = vpop.f32.mrb[25].mxu1 }
 0x13f   : > { %v1119_v53 = vadd.f32 %v1118_v51, %v994_v48 }
 0x141   : > { %v5699_v55 = vpop.f32.mrb[26].mxu1 }
 0x142   : > { %v1134_v56 = vadd.f32 %v5699_v55, %v1009_v52  ;;  %v1128_v57 = vpop.f32.mrb[27].mxu1 }
 0x143   : > { %v1129_v60 = vadd.f32 %v1128_v57, %v1004_v54 }
 0x144   : > { %v1179_v0 = vmax.f32 %v1119_v53, %v1134_v56 }
 0x145   : > { %v5702_v1 = vpop.f32.mrb[28].mxu1 }
 0x146   : > { %v1144_v2 = vadd.f32 %v5702_v1, %v1019_v59  ;;  %v1138_v3 = vpop.f32.mrb[29].mxu1 }
 0x147   : > { %v1139_v6 = vadd.f32 %v1138_v3, %v1014_v63 }
 0x148   : > { %v1185_v8 = vmax.f32 %v1129_v60, %v1144_v2 }
 0x149   : > { %v1182_v10 = vmax.f32 %v1124_v49, %v1139_v6  ;;  %v5705_v11 = vpop.f32.mrb[30].mxu1 }
 0x14a   : > { %v1154_v58 = vadd.f32 %v5705_v11, %v1029_v4  ;;  %v1148_v12 = vpop.f32.mrb[31].mxu1 }
 0x14b   : > { %v1149_v13 = vadd.f32 %v1148_v12, %v1024_v7 }
 0x14d   : > { %v5708_v15 = vpop.f32.mrb[32].mxu1 }
 0x14e   : > { %v1164_v17 = vadd.f32 %v5708_v15, %v1039_v62  ;;  %v1158_v18 = vpop.f32.mrb[33].mxu1 }
 0x14f   : > { %v1159_v5 = vadd.f32 %v1158_v18, %v1034_v14  ;;  %v1332_v18 = vld [vmem:[%s7683_s17 + $0x400] sm:$0xff] }
 0x150   : > { %v1188_v9 = vmax.f32 %v1149_v13, %v1164_v17 }
 0x151   : > { %v5711_v22 = vpop.f32.mrb[34].mxu1 }
 0x152   : > { %v7832_v23 = vmax.f32 %v1179_v0, %v1188_v9  ;;  %v1174_v24 = vadd.f32 %v5711_v22, %v1049_v19  ;;  %v1168_v25 = vpop.f32.mrb[35].mxu1  ;;  %v1336_v19 = vld [vmem:[%s7683_s17 + $0x420] sm:$0xff]  ;;  %v1341_v9 = vld [vmem:[%s7683_s17 + $0x448] sm:$0xff] }
 0x153   : > { %v1169_v26 = vadd.f32 %v1168_v25, %v1044_v21  ;;  %v1345_v22 = vld [vmem:[%s7683_s17 + $0x468] sm:$0xff] }
 0x154   : > { %v1194_v16 = vmax.f32 %v1159_v5, %v1174_v24 }
 0x155   : > { %v1191_v28 = vmax.f32 %v1154_v58, %v1169_v26 }
 0x156   : > { %v7834_v30 = vmax.f32 %v1185_v8, %v1194_v16 }
 0x157   : > { %v856_v20 = vpop.f32.mrb[0].mxu0  ;;  %v7836_v32 = vmax.f32 %v1182_v10, %v1191_v28 }
 0x158   : > { %v858_v29 = vpop.f32.mrb[1].mxu0  ;;  %v7120_v44 = vadd.f32 %v856_v20, %v7845_v39 }
 0x159   : > { %v7121_v46 = vadd.f32 %v858_v29, %v7848_v38 }
 0x15b   : > { %v862_v33 = vpop.f32.mrb[2].mxu0 }
 0x15c   : > { %v864_v27 = vpop.f32.mrb[3].mxu0  ;;  %v7122_v51 = vadd.f32 %v862_v33, %v7845_v39  ;;  %v6130_v33 = vpack.c.bf16 %v1336_v19, %v1332_v18  ;;  %v1356_v18 = vld [vmem:[%s7683_s17 + $0x4c0] sm:$0xff] }
 0x15d   : > { %v7123_v41 = vadd.f32 %v864_v27, %v7848_v38 }
 0x15f   : > { %v868_v36 = vpop.f32.mrb[4].mxu0 }
 0x160   : > { %v870_v40 = vpop.f32.mrb[5].mxu0  ;;  %v7859_v59 = vadd.f32 %v868_v36, %v7845_v39  ;;  %v6132_v36 = vpack.c.bf16 %v1345_v22, %v1341_v9  ;;  %v1365_v22 = vld [vmem:[%s7683_s17 + $0x508] sm:$0xff] }
 0x161   : > { %v7865_v0 = vadd.f32 %v870_v40, %v7848_v38  ;;  %v1340_v40 = vld [vmem:[%s7683_s17 + $0x440] sm:$0xff] }
 0x163   : > { %v874_v43 = vpop.f32.mrb[6].mxu0 }
 0x164   : > { %v7126_v42 = vadd.f32 %v874_v43, %v7845_v39  ;;  %v876_v45 = vpop.f32.mrb[7].mxu0  ;;  %v1344_v43 = vld [vmem:[%s7683_s17 + $0x460] sm:$0xff] }
 0x165   : > { %v7127_v47 = vadd.f32 %v876_v45, %v7848_v38  ;;  %v1349_v45 = vld [vmem:[%s7683_s17 + $0x488] sm:$0xff] }
 0x166   : > { %v1177_v48 = vmax.f32 %v7120_v44, %v7126_v42 }
 0x167   : > { %v1178_v50 = vmax.f32 %v7121_v46, %v7127_v47  ;;  %v880_v49 = vpop.f32.mrb[8].mxu0  ;;  %v1353_v46 = vld [vmem:[%s7683_s17 + $0x4a8] sm:$0xff] }
 0x168   : > { %v7128_v52 = vadd.f32 %v880_v49, %v7845_v39  ;;  %v882_v53 = vpop.f32.mrb[9].mxu0 }
 0x169   : > { %v7129_v54 = vadd.f32 %v882_v53, %v7848_v38 }
 0x16a   : > { %v1180_v55 = vmax.f32 %v7122_v51, %v7128_v52  ;;  %v4886_v51 = vld [vmem:[%s7683_s17 + $0xa00] sm:$0xff] }
 0x16b   : > { %v1181_v56 = vmax.f32 %v7123_v41, %v7129_v54  ;;  %v886_v57 = vpop.f32.mrb[10].mxu0  ;;  %v6134_v54 = vpack.c.bf16 %v1344_v43, %v1340_v40 }
 0x16c   : > { %v7862_v60 = vadd.f32 %v886_v57, %v7845_v39  ;;  %v888_v63 = vpop.f32.mrb[11].mxu0  ;;  %v1348_v57 = vld [vmem:[%s7683_s17 + $0x480] sm:$0xff] }
 0x16d   : > { %v7868_v1 = vadd.f32 %v888_v63, %v7848_v38  ;;  %v1352_v63 = vld [vmem:[%s7683_s17 + $0x4a0] sm:$0xff] }
 0x16e   : > { %v1183_v2 = vmax.f32 %v7859_v59, %v7862_v60  ;;  %v4894_v60 = vld [vmem:[%s7683_s17 + $0xa40] sm:$0xff] }
 0x16f   : > { %v1184_v3 = vmax.f32 %v7865_v0, %v7868_v1  ;;  %v892_v4 = vpop.f32.mrb[12].mxu0 }
 0x170   : > { %v894_v6 = vpop.f32.mrb[13].mxu0  ;;  %v7132_v12 = vadd.f32 %v892_v4, %v7845_v39 }
 0x171   : > { %v7133_v14 = vadd.f32 %v894_v6, %v7848_v38  ;;  %v6136_v6 = vpack.c.bf16 %v1353_v46, %v1349_v45  ;;  %v4915_v45 = vld [vmem:[%s7683_s17 + $0xae8] sm:$0xff] }
 0x172   : > { %v1373_v46 = vld [vmem:[%s7683_s17 + $0x548] sm:$0xff] }
 0x173   : > { %v898_v7 = vpop.f32.mrb[14].mxu0 }
 0x174   : > { %v900_v8 = vpop.f32.mrb[15].mxu0  ;;  %v7134_v24 = vadd.f32 %v898_v7, %v7845_v39  ;;  %v4895_v7 = vld [vmem:[%s7683_s17 + $0xa48] sm:$0xff] }
 0x175   : > { %v7135_v20 = vadd.f32 %v900_v8, %v7848_v38  ;;  %v4899_v8 = vld [vmem:[%s7683_s17 + $0xa68] sm:$0xff] }
 0x176   : > { %v5940_v59 = vpack.c.bf16 %v4899_v8, %v4895_v7 }
 0x177   : > { %v904_v10 = vpop.f32.mrb[16].mxu0 }
 0x178   : > { %v906_v11 = vpop.f32.mrb[17].mxu0  ;;  %v7136_v47 = vadd.f32 %v904_v10, %v7845_v39 }
 0x179   : > { %v7137_v52 = vadd.f32 %v906_v11, %v7848_v38  ;;  %v1357_v11 = vld [vmem:[%s7683_s17 + $0x4c8] sm:$0xff] }
 0x17b   : > { %v910_v58 = vpop.f32.mrb[18].mxu0 }
 0x17c   : > { %v7138_v62 = vadd.f32 %v910_v58, %v7845_v39  ;;  %v912_v13 = vpop.f32.mrb[19].mxu0  ;;  %v1361_v58 = vld [vmem:[%s7683_s17 + $0x4e8] sm:$0xff] }
 0x17d   : > { %v7139_v15 = vadd.f32 %v912_v13, %v7848_v38  ;;  %v6140_v1 = vpack.c.bf16 %v1361_v58, %v1357_v11  ;;  %v1380_v11 = vld [vmem:[%s7683_s17 + $0x580] sm:$0xff] }
 0x17e   : > { %v1186_v17 = vmax.f32 %v7132_v12, %v7138_v62 }
 0x17f   : > { %v1187_v5 = vmax.f32 %v7133_v14, %v7139_v15  ;;  %v916_v21 = vpop.f32.mrb[20].mxu0  ;;  %v6138_v14 = vpack.c.bf16 %v1352_v63, %v1348_v57  ;;  %v1376_v57 = vld [vmem:[%s7683_s17 + $0x560] sm:$0xff]  ;;  %v4919_v63 = vld [vmem:[%s7683_s17 + $0xb08] sm:$0xff] }
 0x180   : > { %v7883_v25 = vmax.f32 %v1177_v48, %v1186_v17  ;;  %v7140_v26 = vadd.f32 %v916_v21, %v7845_v39  ;;  %v918_v16 = vpop.f32.mrb[21].mxu0  ;;  %v4907_v21 = vld [vmem:[%s7683_s17 + $0xaa8] sm:$0xff] }
 0x181   : > { %v7887_v28 = vmax.f32 %v1178_v50, %v1187_v5  ;;  %v7141_v29 = vadd.f32 %v918_v16, %v7848_v38  ;;  %v4903_v5 = vld [vmem:[%s7683_s17 + $0xa88] sm:$0xff] }
 0x182   : > { %v1189_v27 = vmax.f32 %v7134_v24, %v7140_v26  ;;  %v1599_v62 = vrot.slane %v7883_v25, 2  ;;  %v1369_v24 = vld [vmem:[%s7683_s17 + $0x528] sm:$0xff] }
 0x183   : > { %v1190_v44 = vmax.f32 %v7135_v20, %v7141_v29  ;;  %v922_v42 = vpop.f32.mrb[22].mxu0  ;;  %1992 = vmatprep.mubr.f32.mxu1 %v7887_v28  ;;  %v5944_v29 = vpack.c.bf16 %v4907_v21, %v4903_v5  ;;  %v6144_v43 = vpack.c.bf16 %v1369_v24, %v1365_v22  ;;  %v1388_v5 = vld [vmem:[%s7683_s17 + $0x5c0] sm:$0xff]  ;;  %v4935_v22 = vld [vmem:[%s7683_s17 + $0xb88] sm:$0xff] }
 0x184   : > { %v7896_v48 = vmax.f32 %v1180_v55, %v1189_v27  ;;  %v7142_v50 = vadd.f32 %v922_v42, %v7845_v39  ;;  %v924_v49 = vpop.f32.mrb[23].mxu0  ;;  %1993 = vmatmul.mubr.f32.vlgmr.msra.gmra.mrb[36].mxu1 %v7883_v25  ;;  %v4890_v55 = vld [vmem:[%s7683_s17 + $0xa20] sm:$0xff]  ;;  %v4911_v42 = vld [vmem:[%s7683_s17 + $0xac8] sm:$0xff] }
 0x185   : > { %v7902_v53 = vmax.f32 %v1181_v56, %v1190_v44  ;;  %v7143_v41 = vadd.f32 %v924_v49, %v7848_v38  ;;  %6131 = vmatpush1.bf16.msra.mxu1 %v6130_v33  ;;  %v1602_v38 = vrot.slane %v7887_v28, 2  ;;  %v5938_v13 = vpack.c.bf16 %v4890_v55, %v4886_v51  ;;  %v4902_v33 = vld [vmem:[%s7683_s17 + $0xa80] sm:$0xff]  ;;  %v4939_v24 = vld [vmem:[%s7683_s17 + $0xba8] sm:$0xff] }
 0x186   : > { %v1192_v39 = vmax.f32 %v7136_v47, %v7142_v50  ;;  %6133 = vmatprep.subr.bf16.mxu1 %v6132_v36  ;;  %v1600_v4 = vrot.slane %v7896_v48, 2  ;;  %v4906_v27 = vld [vmem:[%s7683_s17 + $0xaa0] sm:$0xff]  ;;  %v1377_v47 = vld [vmem:[%s7683_s17 + $0x568] sm:$0xff]  ;;  %v5948_v51 = vpack.c.bf16 %v4915_v45, %v4911_v42 }
 0x187   : > { %v1193_v10 = vmax.f32 %v7137_v52, %v7143_v41  ;;  %1998 = vmatprep.mubr.f32.mxu1 %v7902_v53  ;;  %v1603_v56 = vrot.slane %v7902_v53, 2  ;;  %v1364_v36 = vld [vmem:[%s7683_s17 + $0x500] sm:$0xff]  ;;  %v5946_v50 = vpack.c.bf16 %v4906_v27, %v4902_v33  ;;  %v6148_v55 = vpack.c.bf16 %v1377_v47, %v1373_v46  ;;  %v4943_v46 = vld [vmem:[%s7683_s17 + $0xbc8] sm:$0xff] }
 0x188   : > { %v7919_v12 = vmax.f32 %v1183_v2, %v1192_v39  ;;  %1999 = vmatmul.mubr.f32.gmra.mrb[38].mxu1 %v7896_v48  ;;  %v4898_v2 = vld [vmem:[%s7683_s17 + $0xa60] sm:$0xff]  ;;  %v7937_v19 = vsel %vm1598_vm0, %v1599_v62, %v1600_v4  ;;  %v4923_v39 = vld [vmem:[%s7683_s17 + $0xb28] sm:$0xff]  ;;  %v5960_v27 = vpack.c.bf16 %v4939_v24, %v4935_v22 }
 0x189   : > { %v7926_v15 = vmax.f32 %v1184_v3, %v1193_v10  ;;  %6135 = vmatpush1.bf16.msra.mxu1 %v6134_v54  ;;  %v7929_v17 = vsel %vm1598_vm0, %v1602_v38, %v1603_v56  ;;  %2069 = vmatprep.mubr.f32.mxu1 %v7273_v61  ;;  %v1360_v3 = vld [vmem:[%s7683_s17 + $0x4e0] sm:$0xff]  ;;  %v5942_v26 = vpack.c.bf16 %v4898_v2, %v4894_v60  ;;  %v1393_v60 = vld [vmem:[%s7683_s17 + $0x5e8] sm:$0xff] }
 0x18a   : > { %1684 = vmatprep.mubr.f32.mxu0 %v7929_v17  ;;  %6137 = vmatprep.subr.bf16.mxu1 %v6136_v6  ;;  %v1608_v0 = vrot.slane %v7919_v12, 2  ;;  %v6142_v20 = vpack.c.bf16 %v1360_v3, %v1356_v18  ;;  %v1368_v44 = vld [vmem:[%s7683_s17 + $0x520] sm:$0xff]  ;;  %v1385_v6 = vld [vmem:[%s7683_s17 + $0x5a8] sm:$0xff]  ;;  %v5952_v10 = vpack.c.bf16 %v4923_v39, %v4919_v63 }
 0x18b   : > { %1685 = vmatmul.mubr.f32.vlgmr.msra.gmra.mrb[24].mxu0 %v7937_v19  ;;  %v1610_v9 = vrot.slane %v7926_v15, 2  ;;  %v6146_v49 = vpack.c.bf16 %v1368_v44, %v1364_v36  ;;  %v4910_v52 = vld [vmem:[%s7683_s17 + $0xac0] sm:$0xff]  ;;  %v4947_v47 = vld [vmem:[%s7683_s17 + $0xbe8] sm:$0xff] }
 0x18c   : > { %5939 = vmatpush1.bf16.msra.mxu0 %v5938_v13  ;;  %v7955_v40 = vsel %vm1598_vm0, %v1600_v4, %v1608_v0  ;;  %v4914_v41 = vld [vmem:[%s7683_s17 + $0xae0] sm:$0xff]  ;;  %v1381_v4 = vld [vmem:[%s7683_s17 + $0x588] sm:$0xff] }
 0x18d   : > { %6139 = vmatpush1.bf16.msra.mxu1 %v6138_v14  ;;  %v7948_v16 = vsel %vm1598_vm0, %v1603_v56, %v1610_v9  ;;  %5941 = vmatprep.subr.bf16.mxu0 %v5940_v59  ;;  %v1372_v54 = vld [vmem:[%s7683_s17 + $0x540] sm:$0xff]  ;;  %v5950_v7 = vpack.c.bf16 %v4914_v41, %v4910_v52  ;;  %v6152_v58 = vpack.c.bf16 %v1385_v6, %v1381_v4  ;;  %v4927_v13 = vld [vmem:[%s7683_s17 + $0xb48] sm:$0xff]  ;;  %v4761_v4 = vld [vmem:[%s7683_s17 + $0x618] sm:$0xff] }
 0x18e   : > { %1690 = vmatprep.mubr.f32.mxu0 %v7948_v16  ;;  %6141 = vmatprep.subr.bf16.mxu1 %v6140_v1  ;;  %v6150_v8 = vpack.c.bf16 %v1376_v57, %v1372_v54  ;;  %v4918_v38 = vld [vmem:[%s7683_s17 + $0xb00] sm:$0xff]  ;;  %v4931_v14 = vld [vmem:[%s7683_s17 + $0xb68] sm:$0xff]  ;;  %v5964_v41 = vpack.c.bf16 %v4947_v47, %v4943_v46  ;;  %v4765_v6 = vld [vmem:[%s7683_s17 + $0x638] sm:$0xff] }
 0x18f   : > { %1691 = vmatmul.mubr.f32.gmra.mrb[26].mxu0 %v7955_v40  ;;  %v4922_v56 = vld [vmem:[%s7683_s17 + $0xb20] sm:$0xff]  ;;  %v1389_v59 = vld [vmem:[%s7683_s17 + $0x5c8] sm:$0xff]  ;;  %v5956_v0 = vpack.c.bf16 %v4931_v14, %v4927_v13  ;;  %v2433_v14 = vrot.slane %v7887_v28, 4 }
 0x190   : > { %5943 = vmatpush1.bf16.msra.mxu0 %v5942_v26  ;;  %1761 = vmatprep.mubr.f32.mxu0 %v7273_v61  ;;  %v1384_v62 = vld [vmem:[%s7683_s17 + $0x5a0] sm:$0xff]  ;;  %v5954_v2 = vpack.c.bf16 %v4922_v56, %v4918_v38  ;;  %v6156_v21 = vpack.c.bf16 %v1393_v60, %v1389_v59  ;;  %v4951_v26 = vld [vmem:[%s7683_s17 + $0xc08] sm:$0xff]  ;;  %v2434_v38 = vrot.slane %v7902_v53, 4  ;;  %v1605_v59 = vrot.slane %v7832_v23, 2 }
 0x191   : > { %6143 = vmatpush1.bf16.msra.mxu1 %v6142_v20  ;;  %5945 = vmatprep.subr.bf16.mxu0 %v5944_v29  ;;  %v6154_v18 = vpack.c.bf16 %v1384_v62, %v1380_v11  ;;  %v4926_v1 = vld [vmem:[%s7683_s17 + $0xb40] sm:$0xff]  ;;  %v4955_v20 = vld [vmem:[%s7683_s17 + $0xc28] sm:$0xff]  ;;  %v5968_v11 = vpack.c.bf16 %v4765_v6, %v4761_v4  ;;  %v4764_v62 = vld [vmem:[%s7683_s17 + $0x630] sm:$0xff]  ;;  %v1606_v60 = vrot.slane %v7836_v32, 2 }
 0x192   : > { %6145 = vmatprep.subr.bf16.mxu1 %v6144_v43  ;;  %v4930_v3 = vld [vmem:[%s7683_s17 + $0xb60] sm:$0xff]  ;;  %v6256_v42 = vpack.c.bf16 %v4955_v20, %v4951_v26  ;;  %v4768_v26 = vld [vmem:[%s7683_s17 + $0x650] sm:$0xff]  ;;  %v4987_v46 = vld [vmem:[%s7683_s17 + $0xd28] sm:$0xff] }
 0x193   : > { %v1392_v9 = vld [vmem:[%s7683_s17 + $0x5e0] sm:$0xff]  ;;  %v5958_v29 = vpack.c.bf16 %v4930_v3, %v4926_v1  ;;  %v4773_v1 = vld [vmem:[%s7683_s17 + $0x678] sm:$0xff]  ;;  %v4975_v3 = vld [vmem:[%s7683_s17 + $0xcc8] sm:$0xff] }
 0x194   : > { %5947 = vmatpush1.bf16.msra.mxu0 %v5946_v50  ;;  %v6158_v33 = vpack.c.bf16 %v1392_v9, %v1388_v5  ;;  %v4934_v36 = vld [vmem:[%s7683_s17 + $0xb80] sm:$0xff]  ;;  %v4959_v50 = vld [vmem:[%s7683_s17 + $0xc48] sm:$0xff]  ;;  %v4772_v20 = vld [vmem:[%s7683_s17 + $0x670] sm:$0xff] }
 0x195   : > { %6147 = vmatpush1.bf16.msra.mxu1 %v6146_v49  ;;  %5949 = vmatprep.subr.bf16.mxu0 %v5948_v51  ;;  %v4938_v43 = vld [vmem:[%s7683_s17 + $0xba0] sm:$0xff]  ;;  %v4963_v49 = vld [vmem:[%s7683_s17 + $0xc68] sm:$0xff]  ;;  %v5974_v47 = vpack.c.bf16 %v4772_v20, %v4768_v26  ;;  %v4805_v26 = vld [vmem:[%s7683_s17 + $0x778] sm:$0xff] }
 0x196   : > { %6149 = vmatprep.subr.bf16.mxu1 %v6148_v55  ;;  %v4950_v44 = vld [vmem:[%s7683_s17 + $0xc00] sm:$0xff]  ;;  %v5962_v51 = vpack.c.bf16 %v4938_v43, %v4934_v36  ;;  %v6260_v63 = vpack.c.bf16 %v4963_v49, %v4959_v50  ;;  %v4979_v5 = vld [vmem:[%s7683_s17 + $0xce8] sm:$0xff] }
 0x197   : > { %v4954_v45 = vld [vmem:[%s7683_s17 + $0xc20] sm:$0xff]  ;;  %v6268_v36 = vpack.c.bf16 %v4979_v5, %v4975_v3  ;;  %v4991_v4 = vld [vmem:[%s7683_s17 + $0xd48] sm:$0xff]  ;;  %v4796_v3 = vld [vmem:[%s7683_s17 + $0x730] sm:$0xff] }
 0x198   : > { %5951 = vmatpush1.bf16.msra.mxu0 %v5950_v7  ;;  %v6258_v52 = vpack.c.bf16 %v4954_v45, %v4950_v44  ;;  %v4942_v54 = vld [vmem:[%s7683_s17 + $0xbc0] sm:$0xff]  ;;  %v4967_v7 = vld [vmem:[%s7683_s17 + $0xc88] sm:$0xff]  ;;  %v4777_v44 = vld [vmem:[%s7683_s17 + $0x698] sm:$0xff] }
 0x199   : > { %6151 = vmatpush1.bf16.msra.mxu1 %v6150_v8  ;;  %5953 = vmatprep.subr.bf16.mxu0 %v5952_v10  ;;  %v4946_v55 = vld [vmem:[%s7683_s17 + $0xbe0] sm:$0xff]  ;;  %v4971_v8 = vld [vmem:[%s7683_s17 + $0xca8] sm:$0xff] }
 0x19a   : > { %6153 = vmatprep.subr.bf16.mxu1 %v6152_v58  ;;  %v4958_v57 = vld [vmem:[%s7683_s17 + $0xc40] sm:$0xff]  ;;  %v5966_v10 = vpack.c.bf16 %v4946_v55, %v4942_v54  ;;  %v4760_v58 = vld [vmem:[%s7683_s17 + $0x610] sm:$0xff]  ;;  %v4983_v45 = vld [vmem:[%s7683_s17 + $0xd08] sm:$0xff] }
 0x19b   : > { %v4962_v39 = vld [vmem:[%s7683_s17 + $0xc60] sm:$0xff]  ;;  %v5970_v9 = vpack.c.bf16 %v4764_v62, %v4760_v58  ;;  %v6272_v55 = vpack.c.bf16 %v4987_v46, %v4983_v45  ;;  %v4995_v6 = vld [vmem:[%s7683_s17 + $0xd68] sm:$0xff] }
 0x19c   : > { %5955 = vmatpush1.bf16.msra.mxu0 %v5954_v2  ;;  %v6262_v56 = vpack.c.bf16 %v4962_v39, %v4958_v57  ;;  %v4966_v13 = vld [vmem:[%s7683_s17 + $0xc80] sm:$0xff]  ;;  %v6264_v2 = vpack.c.bf16 %v4971_v8, %v4967_v7  ;;  %v4789_v39 = vld [vmem:[%s7683_s17 + $0x6f8] sm:$0xff]  ;;  %v6276_v62 = vpack.c.bf16 %v4995_v6, %v4991_v4  ;;  %v5007_v20 = vld [vmem:[%s7683_s17 + $0xdc8] sm:$0xff] }
 0x19d   : > { %6155 = vmatpush1.bf16.msra.mxu1 %v6154_v18  ;;  %5957 = vmatprep.subr.bf16.mxu0 %v5956_v0  ;;  %v4970_v18 = vld [vmem:[%s7683_s17 + $0xca0] sm:$0xff]  ;;  %v4769_v0 = vld [vmem:[%s7683_s17 + $0x658] sm:$0xff] }
 0x19e   : > { %6157 = vmatprep.subr.bf16.mxu1 %v6156_v21  ;;  %v8022_v21 = vsel %vm2429_vm1, %v2433_v14, %v2434_v38  ;;  %v6266_v22 = vpack.c.bf16 %v4970_v18, %v4966_v13  ;;  %v5972_v24 = vpack.c.bf16 %v4773_v1, %v4769_v0  ;;  %v4978_v43 = vld [vmem:[%s7683_s17 + $0xce0] sm:$0xff]  ;;  %v4793_v14 = vld [vmem:[%s7683_s17 + $0x718] sm:$0xff]  ;;  %v4792_v1 = vld [vmem:[%s7683_s17 + $0x710] sm:$0xff] }
 0x19f   : > { %v4986_v57 = vld [vmem:[%s7683_s17 + $0xd20] sm:$0xff] }
 0x1a0   : > { %5959 = vmatpush1.bf16.msra.mxu0 %v5958_v29  ;;  %v4974_v29 = vld [vmem:[%s7683_s17 + $0xcc0] sm:$0xff] }
 0x1a1   : > { %6159 = vmatpush1.bf16.msra.mxu1 %v6158_v33  ;;  %5961 = vmatprep.subr.bf16.mxu0 %v5960_v27  ;;  %v8029_v33 = vsel %vm1598_vm0, %v1605_v59, %v1606_v60  ;;  %v1612_v27 = vrot.slane %v7834_v30, 2  ;;  %v6270_v50 = vpack.c.bf16 %v4978_v43, %v4974_v29  ;;  %v4990_v58 = vld [vmem:[%s7683_s17 + $0xd40] sm:$0xff]  ;;  %v4797_v59 = vld [vmem:[%s7683_s17 + $0x738] sm:$0xff]  ;;  %v5011_v29 = vld [vmem:[%s7683_s17 + $0xde8] sm:$0xff] }
 0x1a2   : > { %6257 = vmatprep.subr.bf16.mxu1 %v6256_v42  ;;  %v4781_v42 = vld [vmem:[%s7683_s17 + $0x6b8] sm:$0xff]  ;;  %v4994_v13 = vld [vmem:[%s7683_s17 + $0xd60] sm:$0xff]  ;;  %v5984_v0 = vpack.c.bf16 %v4797_v59, %v4793_v14  ;;  %v6284_v46 = vpack.c.bf16 %v5011_v29, %v5007_v20  ;;  %v4816_v14 = vld [vmem:[%s7683_s17 + $0x7d0] sm:$0xff] }
 0x1a3   : > { %v5976_v49 = vpack.c.bf16 %v4781_v42, %v4777_v44  ;;  %v8043_v54 = vsel %vm1598_vm0, %v1606_v60, %v1612_v27  ;;  %v5003_v60 = vld [vmem:[%s7683_s17 + $0xda8] sm:$0xff]  ;;  %v6278_v18 = vpack.c.bf16 %v4994_v13, %v4990_v58  ;;  %v4998_v5 = vld [vmem:[%s7683_s17 + $0xd80] sm:$0xff]  ;;  %v5986_v27 = vpack.c.bf16 %v4796_v3, %v4792_v1  ;;  %v4800_v44 = vld [vmem:[%s7683_s17 + $0x750] sm:$0xff] }
 0x1a4   : > { %5963 = vmatpush1.bf16.msra.mxu0 %v5962_v51  ;;  %2070 = vmatmul.mubr.f32.vlgmr.msra.gmra.mrb[36].mxu1 %v7832_v23  ;;  %v4776_v51 = vld [vmem:[%s7683_s17 + $0x690] sm:$0xff]  ;;  %v5006_v45 = vld [vmem:[%s7683_s17 + $0xdc0] sm:$0xff]  ;;  %v5031_v1 = vld [vmem:[%s7683_s17 + $0xe88] sm:$0xff] }
 0x1a5   : > { %6259 = vmatpush1.bf16.msra.mxu1 %v6258_v52  ;;  %5965 = vmatprep.subr.bf16.mxu0 %v5964_v41  ;;  %v4780_v52 = vld [vmem:[%s7683_s17 + $0x6b0] sm:$0xff]  ;;  %v4982_v41 = vld [vmem:[%s7683_s17 + $0xd00] sm:$0xff]  ;;  %v5035_v3 = vld [vmem:[%s7683_s17 + $0xea8] sm:$0xff] }
 0x1a6   : > { %2075 = vmatprep.mubr.f32.mxu1 %v7273_v61  ;;  %6261 = vmatprep.subr.bf16.mxu1 %v6260_v63  ;;  %v4785_v63 = vld [vmem:[%s7683_s17 + $0x6d8] sm:$0xff]  ;;  %v5978_v7 = vpack.c.bf16 %v4780_v52, %v4776_v51  ;;  %v6274_v8 = vpack.c.bf16 %v4986_v57, %v4982_v41  ;;  %v4804_v42 = vld [vmem:[%s7683_s17 + $0x770] sm:$0xff]  ;;  %v5015_v51 = vld [vmem:[%s7683_s17 + $0xe08] sm:$0xff]  ;;  %v6296_v29 = vpack.c.bf16 %v5035_v3, %v5031_v1 }
 0x1a7   : > { %v5019_v52 = vld [vmem:[%s7683_s17 + $0xe28] sm:$0xff]  ;;  %v5990_v41 = vpack.c.bf16 %v4804_v42, %v4800_v44  ;;  %v5014_v4 = vld [vmem:[%s7683_s17 + $0xe00] sm:$0xff]  ;;  %v4820_v59 = vld [vmem:[%s7683_s17 + $0x7f0] sm:$0xff] }
 0x1a8   : > { %5967 = vmatpush1.bf16.msra.mxu0 %v5966_v10  ;;  %2076 = vmatmul.mubr.f32.gmra.mrb[38].mxu1 %v7836_v32  ;;  %v5980_v10 = vpack.c.bf16 %v4789_v39, %v4785_v63  ;;  %v4808_v63 = vld [vmem:[%s7683_s17 + $0x790] sm:$0xff]  ;;  %v6288_v6 = vpack.c.bf16 %v5019_v52, %v5015_v51  ;;  %v5030_v20 = vld [vmem:[%s7683_s17 + $0xe80] sm:$0xff]  ;;  %v5039_v44 = vld [vmem:[%s7683_s17 + $0xec8] sm:$0xff] }
 0x1a9   : > { %6263 = vmatpush1.bf16.msra.mxu1 %v6262_v56  ;;  %2515 = vmatprep.mubr.f32.mxu1 %v8022_v21  ;;  %v4784_v56 = vld [vmem:[%s7683_s17 + $0x6d0] sm:$0xff]  ;;  %v5043_v42 = vld [vmem:[%s7683_s17 + $0xee8] sm:$0xff]  ;;  %v5038_v51 = vld [vmem:[%s7683_s17 + $0xec0] sm:$0xff] }
 0x1aa   : > { %5969 = vmatprep.subr.bf16.mxu0 %v5968_v11  ;;  %6265 = vmatprep.subr.bf16.mxu1 %v6264_v2  ;;  %v4788_v11 = vld [vmem:[%s7683_s17 + $0x6f0] sm:$0xff]  ;;  %v6300_v52 = vpack.c.bf16 %v5043_v42, %v5039_v44  ;;  %v5054_v1 = vld [vmem:[%s7683_s17 + $0xf40] sm:$0xff] }
 0x1ab   : > { %1762 = vmatmul.mubr.f32.vlgmr.msra.gmra.mrb[24].mxu0 %v8029_v33  ;;  %v5982_v2 = vpack.c.bf16 %v4788_v11, %v4784_v56  ;;  %v4812_v39 = vld [vmem:[%s7683_s17 + $0x7b0] sm:$0xff]  ;;  %v5023_v56 = vld [vmem:[%s7683_s17 + $0xe48] sm:$0xff]  ;;  %v5062_v44 = vld [vmem:[%s7683_s17 + $0xf80] sm:$0xff] }
 0x1ac   : > { %5971 = vmatpush1.bf16.msra.mxu0 %v5970_v9  ;;  %1767 = vmatprep.mubr.f32.mxu0 %v7273_v61  ;;  %v5027_v11 = vld [vmem:[%s7683_s17 + $0xe68] sm:$0xff]  ;;  %v5994_v58 = vpack.c.bf16 %v4812_v39, %v4808_v63 }
 0x1ad   : > { %6267 = vmatpush1.bf16.msra.mxu1 %v6266_v22  ;;  %5973 = vmatprep.subr.bf16.mxu0 %v5972_v24  ;;  %v5002_v22 = vld [vmem:[%s7683_s17 + $0xda0] sm:$0xff]  ;;  %v4801_v24 = vld [vmem:[%s7683_s17 + $0x758] sm:$0xff]  ;;  %v5047_v63 = vld [vmem:[%s7683_s17 + $0xf08] sm:$0xff] }
 0x1ae   : > { %6269 = vmatprep.subr.bf16.mxu1 %v6268_v36  ;;  %v6282_v36 = vpack.c.bf16 %v5002_v22, %v4998_v5  ;;  %v5988_v43 = vpack.c.bf16 %v4805_v26, %v4801_v24  ;;  %v5998_v5 = vpack.c.bf16 %v4820_v59, %v4816_v14  ;;  %v4824_v24 = vld [vmem:[%s7683_s17 + $0x810] sm:$0xff]  ;;  %v5051_v39 = vld [vmem:[%s7683_s17 + $0xf28] sm:$0xff] }
 0x1af   : > { %1768 = vmatmul.mubr.f32.gmra.mrb[26].mxu0 %v8043_v54  ;;  %v4828_v26 = vld [vmem:[%s7683_s17 + $0x830] sm:$0xff]  ;;  %v5055_v14 = vld [vmem:[%s7683_s17 + $0xf48] sm:$0xff] }
 0x1b0   : > { %5975 = vmatpush1.bf16.msra.mxu0 %v5974_v47  ;;  %1838 = vmatprep.mubr.f32.mxu0 %v7929_v17  ;;  %v4999_v17 = vld [vmem:[%s7683_s17 + $0xd88] sm:$0xff]  ;;  %v5010_v47 = vld [vmem:[%s7683_s17 + $0xde0] sm:$0xff] }
 0x1b1   : > { %6271 = vmatpush1.bf16.msra.mxu1 %v6270_v50  ;;  %5977 = vmatprep.subr.bf16.mxu0 %v5976_v49  ;;  %v6280_v9 = vpack.c.bf16 %v5003_v60, %v4999_v17  ;;  %v4809_v50 = vld [vmem:[%s7683_s17 + $0x798] sm:$0xff]  ;;  %v5022_v17 = vld [vmem:[%s7683_s17 + $0xe40] sm:$0xff]  ;;  %v6292_v60 = vpack.c.bf16 %v5027_v11, %v5023_v56  ;;  %v6304_v11 = vpack.c.bf16 %v5051_v39, %v5047_v63  ;;  %v5059_v59 = vld [vmem:[%s7683_s17 + $0xf68] sm:$0xff] }
 0x1b2   : > { %6273 = vmatprep.subr.bf16.mxu1 %v6272_v55  ;;  %v4813_v49 = vld [vmem:[%s7683_s17 + $0x7b8] sm:$0xff]  ;;  %v6286_v55 = vpack.c.bf16 %v5010_v47, %v5006_v45  ;;  %v6002_v45 = vpack.c.bf16 %v4828_v26, %v4824_v24  ;;  %v5046_v56 = vld [vmem:[%s7683_s17 + $0xf00] sm:$0xff]  ;;  %v6308_v3 = vpack.c.bf16 %v5059_v59, %v5055_v14  ;;  %v5063_v24 = vld [vmem:[%s7683_s17 + $0xf88] sm:$0xff] }
 0x1b3   : > { %v5992_v57 = vpack.c.bf16 %v4813_v49, %v4809_v50  ;;  %v4832_v50 = vld [vmem:[%s7683_s17 + $0x850] sm:$0xff]  ;;  %v5067_v26 = vld [vmem:[%s7683_s17 + $0xfa8] sm:$0xff]  ;;  %v5070_v63 = vld [vmem:[%s7683_s17 + $0xfc0] sm:$0xff] }
 0x1b4   : > { %5979 = vmatpush1.bf16.msra.mxu0 %v5978_v7  ;;  %v5018_v7 = vld [vmem:[%s7683_s17 + $0xe20] sm:$0xff]  ;;  %v4836_v49 = vld [vmem:[%s7683_s17 + $0x870] sm:$0xff]  ;;  %v6312_v42 = vpack.c.bf16 %v5067_v26, %v5063_v24 }
 0x1b5   : > { %6275 = vmatpush1.bf16.msra.mxu1 %v6274_v8  ;;  %5981 = vmatprep.subr.bf16.mxu0 %v5980_v10  ;;  %v4817_v8 = vld [vmem:[%s7683_s17 + $0x7d8] sm:$0xff]  ;;  %v5078_v59 = vld [vmem:[%s7683_s17 + $0x1000] sm:$0xff]  ;;  %v4880_v24 = vld [vmem:[%s7683_s17 + $0x9d0] sm:$0xff] }
 0x1b6   : > { %6277 = vmatprep.subr.bf16.mxu1 %v6276_v62  ;;  %v4821_v10 = vld [vmem:[%s7683_s17 + $0x7f8] sm:$0xff]  ;;  %v6290_v62 = vpack.c.bf16 %v5018_v7, %v5014_v4  ;;  %v6006_v4 = vpack.c.bf16 %v4836_v49, %v4832_v50  ;;  %v5071_v50 = vld [vmem:[%s7683_s17 + $0xfc8] sm:$0xff]  ;;  %v4884_v26 = vld [vmem:[%s7683_s17 + $0x9f0] sm:$0xff] }
 0x1b7   : > { %v5996_v13 = vpack.c.bf16 %v4821_v10, %v4817_v8  ;;  %v4840_v8 = vld [vmem:[%s7683_s17 + $0x890] sm:$0xff]  ;;  %v5075_v49 = vld [vmem:[%s7683_s17 + $0xfe8] sm:$0xff] }
 0x1b8   : > { %5983 = vmatpush1.bf16.msra.mxu0 %v5982_v2  ;;  %v5026_v2 = vld [vmem:[%s7683_s17 + $0xe60] sm:$0xff]  ;;  %v4844_v10 = vld [vmem:[%s7683_s17 + $0x8b0] sm:$0xff]  ;;  %v6316_v39 = vpack.c.bf16 %v5075_v49, %v5071_v50  ;;  %v6030_v49 = vpack.c.bf16 %v4884_v26, %v4880_v24  ;;  %v4913_v26 = vld [vmem:[%s7683_s17 + $0xad8] sm:$0xff] }
 0x1b9   : > { %6279 = vmatpush1.bf16.msra.mxu1 %v6278_v18  ;;  %5985 = vmatprep.subr.bf16.mxu0 %v5984_v0  ;;  %v4825_v18 = vld [vmem:[%s7683_s17 + $0x818] sm:$0xff]  ;;  %v5114_v24 = vld [vmem:[%s7683_s17 + $0x1120] sm:$0xff] }
 0x1ba   : > { %6281 = vmatprep.subr.bf16.mxu1 %v6280_v9  ;;  %v4829_v0 = vld [vmem:[%s7683_s17 + $0x838] sm:$0xff]  ;;  %v6294_v9 = vpack.c.bf16 %v5026_v2, %v5022_v17  ;;  %v6010_v17 = vpack.c.bf16 %v4844_v10, %v4840_v8  ;;  %v5079_v8 = vld [vmem:[%s7683_s17 + $0x1008] sm:$0xff] }
 0x1bb   : > { %v6000_v22 = vpack.c.bf16 %v4829_v0, %v4825_v18  ;;  %v4848_v18 = vld [vmem:[%s7683_s17 + $0x8d0] sm:$0xff]  ;;  %v5083_v10 = vld [vmem:[%s7683_s17 + $0x1028] sm:$0xff] }
 0x1bc   : > { %5987 = vmatpush1.bf16.msra.mxu0 %v5986_v27  ;;  %v5034_v27 = vld [vmem:[%s7683_s17 + $0xea0] sm:$0xff]  ;;  %v4852_v0 = vld [vmem:[%s7683_s17 + $0x8f0] sm:$0xff]  ;;  %v6320_v14 = vpack.c.bf16 %v5083_v10, %v5079_v8  ;;  %v5107_v8 = vld [vmem:[%s7683_s17 + $0x10e8] sm:$0xff] }
 0x1bd   : > { %6283 = vmatpush1.bf16.msra.mxu1 %v6282_v36  ;;  %5989 = vmatprep.subr.bf16.mxu0 %v5988_v43  ;;  %v4833_v36 = vld [vmem:[%s7683_s17 + $0x858] sm:$0xff] }
 0x1be   : > { %6285 = vmatprep.subr.bf16.mxu1 %v6284_v46  ;;  %v4837_v43 = vld [vmem:[%s7683_s17 + $0x878] sm:$0xff]  ;;  %v6298_v46 = vpack.c.bf16 %v5034_v27, %v5030_v20  ;;  %v6014_v20 = vpack.c.bf16 %v4852_v0, %v4848_v18  ;;  %v5087_v0 = vld [vmem:[%s7683_s17 + $0x1048] sm:$0xff] }
 0x1bf   : > { %v6004_v47 = vpack.c.bf16 %v4837_v43, %v4833_v36  ;;  %v4856_v36 = vld [vmem:[%s7683_s17 + $0x910] sm:$0xff]  ;;  %v4885_v18 = vld [vmem:[%s7683_s17 + $0x9f8] sm:$0xff] }
 0x1c0   : > { %5991 = vmatpush1.bf16.msra.mxu0 %v5990_v41  ;;  %v5042_v41 = vld [vmem:[%s7683_s17 + $0xee0] sm:$0xff]  ;;  %v4860_v43 = vld [vmem:[%s7683_s17 + $0x930] sm:$0xff] }
 0x1c1   : > { %6287 = vmatpush1.bf16.msra.mxu1 %v6286_v55  ;;  %5993 = vmatprep.subr.bf16.mxu0 %v5992_v57  ;;  %v4841_v55 = vld [vmem:[%s7683_s17 + $0x898] sm:$0xff] }
 0x1c2   : > { %6289 = vmatprep.subr.bf16.mxu1 %v6288_v6  ;;  %v4845_v57 = vld [vmem:[%s7683_s17 + $0x8b8] sm:$0xff]  ;;  %v6302_v6 = vpack.c.bf16 %v5042_v41, %v5038_v51  ;;  %v6018_v51 = vpack.c.bf16 %v4860_v43, %v4856_v36  ;;  %v5090_v36 = vld [vmem:[%s7683_s17 + $0x1060] sm:$0xff] }
 0x1c3   : > { %v6008_v7 = vpack.c.bf16 %v4845_v57, %v4841_v55  ;;  %v4864_v55 = vld [vmem:[%s7683_s17 + $0x950] sm:$0xff]  ;;  %v4889_v43 = vld [vmem:[%s7683_s17 + $0xa18] sm:$0xff] }
 0x1c4   : > { %5995 = vmatpush1.bf16.msra.mxu0 %v5994_v58  ;;  %v5050_v58 = vld [vmem:[%s7683_s17 + $0xf20] sm:$0xff]  ;;  %v4868_v57 = vld [vmem:[%s7683_s17 + $0x970] sm:$0xff] }
 0x1c5   : > { %6291 = vmatpush1.bf16.msra.mxu1 %v6290_v62  ;;  %5997 = vmatprep.subr.bf16.mxu0 %v5996_v13  ;;  %v4849_v62 = vld [vmem:[%s7683_s17 + $0x8d8] sm:$0xff] }
 0x1c6   : > { %6293 = vmatprep.subr.bf16.mxu1 %v6292_v60  ;;  %v4853_v13 = vld [vmem:[%s7683_s17 + $0x8f8] sm:$0xff]  ;;  %v6306_v60 = vpack.c.bf16 %v5050_v58, %v5046_v56  ;;  %v6022_v56 = vpack.c.bf16 %v4868_v57, %v4864_v55  ;;  %v4892_v55 = vld [vmem:[%s7683_s17 + $0xa30] sm:$0xff]  ;;  %v5094_v57 = vld [vmem:[%s7683_s17 + $0x1080] sm:$0xff] }
 0x1c7   : > { %v6012_v2 = vpack.c.bf16 %v4853_v13, %v4849_v62  ;;  %v4872_v62 = vld [vmem:[%s7683_s17 + $0x990] sm:$0xff] }
 0x1c8   : > { %5999 = vmatpush1.bf16.msra.mxu0 %v5998_v5  ;;  %v5058_v5 = vld [vmem:[%s7683_s17 + $0xf60] sm:$0xff]  ;;  %v4876_v13 = vld [vmem:[%s7683_s17 + $0x9b0] sm:$0xff] }
 0x1c9   : > { %6295 = vmatpush1.bf16.msra.mxu1 %v6294_v9  ;;  %6001 = vmatprep.subr.bf16.mxu0 %v6000_v22  ;;  %v4857_v9 = vld [vmem:[%s7683_s17 + $0x918] sm:$0xff] }
 0x1ca   : > { %6297 = vmatprep.subr.bf16.mxu1 %v6296_v29  ;;  %v4861_v22 = vld [vmem:[%s7683_s17 + $0x938] sm:$0xff]  ;;  %v6310_v29 = vpack.c.bf16 %v5058_v5, %v5054_v1  ;;  %v5091_v1 = vld [vmem:[%s7683_s17 + $0x1068] sm:$0xff]  ;;  %v2441_v5 = vrot.slane %v7926_v15, 4 }
 0x1cb   : > { %v6016_v27 = vpack.c.bf16 %v4861_v22, %v4857_v9  ;;  %v2430_v9 = vrot.slane %v7883_v25, 4 }
 0x1cc   : > { %6003 = vmatpush1.bf16.msra.mxu0 %v6002_v45  ;;  %v5066_v45 = vld [vmem:[%s7683_s17 + $0xfa0] sm:$0xff]  ;;  %v8167_v50 = vsel %vm2429_vm1, %v2434_v38, %v2441_v5  ;;  %v4897_v38 = vld [vmem:[%s7683_s17 + $0xa58] sm:$0xff]  ;;  %v4904_v5 = vld [vmem:[%s7683_s17 + $0xa90] sm:$0xff] }
 0x1cd   : > { %6299 = vmatpush1.bf16.msra.mxu1 %v6298_v46  ;;  %6005 = vmatprep.subr.bf16.mxu0 %v6004_v47  ;;  %v4865_v46 = vld [vmem:[%s7683_s17 + $0x958] sm:$0xff] }
 0x1ce   : > { %6301 = vmatprep.subr.bf16.mxu1 %v6300_v52  ;;  %v4869_v47 = vld [vmem:[%s7683_s17 + $0x978] sm:$0xff]  ;;  %v6314_v52 = vpack.c.bf16 %v5066_v45, %v5062_v44  ;;  %v2439_v45 = vrot.slane %v7919_v12, 4 }
 0x1cf   : > { %v6020_v41 = vpack.c.bf16 %v4869_v47, %v4865_v46  ;;  %v4893_v44 = vld [vmem:[%s7683_s17 + $0xa38] sm:$0xff]  ;;  %v5095_v46 = vld [vmem:[%s7683_s17 + $0x1088] sm:$0xff] }
 0x1d0   : > { %6007 = vmatpush1.bf16.msra.mxu0 %v6006_v4  ;;  %v5074_v4 = vld [vmem:[%s7683_s17 + $0xfe0] sm:$0xff]  ;;  %v5099_v47 = vld [vmem:[%s7683_s17 + $0x10a8] sm:$0xff] }
 0x1d1   : > { %6303 = vmatpush1.bf16.msra.mxu1 %v6302_v6  ;;  %6009 = vmatprep.subr.bf16.mxu0 %v6008_v7  ;;  %v4873_v6 = vld [vmem:[%s7683_s17 + $0x998] sm:$0xff] }
 0x1d2   : > { %6305 = vmatprep.subr.bf16.mxu1 %v6304_v11  ;;  %v4877_v7 = vld [vmem:[%s7683_s17 + $0x9b8] sm:$0xff]  ;;  %v6318_v11 = vpack.c.bf16 %v5074_v4, %v5070_v63  ;;  %v6328_v63 = vpack.c.bf16 %v5099_v47, %v5095_v46  ;;  %v5118_v46 = vld [vmem:[%s7683_s17 + $0x1140] sm:$0xff] }
 0x1d3   : > { %v6024_v58 = vpack.c.bf16 %v4877_v7, %v4873_v6  ;;  %v4901_v4 = vld [vmem:[%s7683_s17 + $0xa78] sm:$0xff]  ;;  %v5103_v7 = vld [vmem:[%s7683_s17 + $0x10c8] sm:$0xff]  ;;  %v5122_v47 = vld [vmem:[%s7683_s17 + $0x1160] sm:$0xff] }
 0x1d4   : > { %6011 = vmatpush1.bf16.msra.mxu0 %v6010_v17  ;;  %v5082_v17 = vld [vmem:[%s7683_s17 + $0x1020] sm:$0xff] }
 0x1d5   : > { %6307 = vmatpush1.bf16.msra.mxu1 %v6306_v60  ;;  %6013 = vmatprep.subr.bf16.mxu0 %v6012_v2  ;;  %v4881_v60 = vld [vmem:[%s7683_s17 + $0x9d8] sm:$0xff]  ;;  %v2431_v2 = vrot.slane %v7896_v48, 4  ;;  %v6322_v22 = vpack.c.bf16 %v5082_v17, %v5078_v59  ;;  %v5106_v59 = vld [vmem:[%s7683_s17 + $0x10e0] sm:$0xff] }
 0x1d6   : > { %6309 = vmatprep.subr.bf16.mxu1 %v6308_v3  ;;  %v6026_v3 = vpack.c.bf16 %v4876_v13, %v4872_v62  ;;  %v4900_v62 = vld [vmem:[%s7683_s17 + $0xa70] sm:$0xff]  ;;  %v5102_v13 = vld [vmem:[%s7683_s17 + $0x10c0] sm:$0xff]  ;;  %v4905_v17 = vld [vmem:[%s7683_s17 + $0xa98] sm:$0xff] }
 0x1d7   : > { %v8177_v6 = vsel %vm2429_vm1, %v2431_v2, %v2439_v45  ;;  %v4916_v45 = vld [vmem:[%s7683_s17 + $0xaf0] sm:$0xff] }
 0x1d8   : > { %6015 = vmatpush1.bf16.msra.mxu0 %v6014_v20  ;;  %v5086_v20 = vld [vmem:[%s7683_s17 + $0x1040] sm:$0xff] }
 0x1d9   : > { %6311 = vmatpush1.bf16.msra.mxu1 %v6310_v29  ;;  %6017 = vmatprep.subr.bf16.mxu0 %v6016_v27  ;;  %v6028_v29 = vpack.c.bf16 %v4885_v18, %v4881_v60  ;;  %v6324_v27 = vpack.c.bf16 %v5091_v1, %v5087_v0  ;;  %v4909_v60 = vld [vmem:[%s7683_s17 + $0xab8] sm:$0xff]  ;;  %v5115_v18 = vld [vmem:[%s7683_s17 + $0x1128] sm:$0xff]  ;;  %v6334_v1 = vpack.c.bf16 %v5106_v59, %v5102_v13  ;;  %v4928_v59 = vld [vmem:[%s7683_s17 + $0xb50] sm:$0xff] }
 0x1da   : > { %6313 = vmatprep.subr.bf16.mxu1 %v6312_v42  ;;  %v8158_v42 = vsel %vm2429_vm1, %v2430_v9, %v2431_v2  ;;  %v5111_v2 = vld [vmem:[%s7683_s17 + $0x1108] sm:$0xff]  ;;  %v4908_v9 = vld [vmem:[%s7683_s17 + $0xab0] sm:$0xff] }
 0x1dc   : > { %6019 = vmatpush1.bf16.msra.mxu0 %v6018_v51  ;;  %v6326_v51 = vpack.c.bf16 %v5090_v36, %v5086_v20  ;;  %v4917_v20 = vld [vmem:[%s7683_s17 + $0xaf8] sm:$0xff] }
 0x1dd   : > { %6315 = vmatpush1.bf16.msra.mxu1 %v6314_v52  ;;  %6021 = vmatprep.subr.bf16.mxu0 %v6020_v41  ;;  %v6032_v52 = vpack.c.bf16 %v4893_v44, %v4889_v43  ;;  %v4888_v41 = vld [vmem:[%s7683_s17 + $0xa10] sm:$0xff]  ;;  %v6044_v43 = vpack.c.bf16 %v4917_v20, %v4913_v26  ;;  %v5142_v20 = vld [vmem:[%s7683_s17 + $0x1200] sm:$0xff] }
 0x1de   : > { %6317 = vmatprep.subr.bf16.mxu1 %v6316_v39  ;;  %v5098_v39 = vld [vmem:[%s7683_s17 + $0x10a0] sm:$0xff]  ;;  %v6034_v10 = vpack.c.bf16 %v4892_v55, %v4888_v41  ;;  %v4912_v44 = vld [vmem:[%s7683_s17 + $0xad0] sm:$0xff]  ;;  %v5131_v41 = vld [vmem:[%s7683_s17 + $0x11a8] sm:$0xff] }
 0x1df   : > { %v6046_v55 = vpack.c.bf16 %v4916_v45, %v4912_v44  ;;  %v4940_v26 = vld [vmem:[%s7683_s17 + $0xbb0] sm:$0xff]  ;;  %v2437_v44 = vrot.slane %v7836_v32, 4  ;;  %v5151_v45 = vld [vmem:[%s7683_s17 + $0x1248] sm:$0xff] }
 0x1e0   : > { %6023 = vmatpush1.bf16.msra.mxu0 %v6022_v56  ;;  %v6330_v56 = vpack.c.bf16 %v5098_v39, %v5094_v57  ;;  %v6342_v57 = vpack.c.bf16 %v5122_v47, %v5118_v46  ;;  %v4920_v39 = vld [vmem:[%s7683_s17 + $0xb10] sm:$0xff]  ;;  %v5155_v46 = vld [vmem:[%s7683_s17 + $0x1268] sm:$0xff] }
 0x1e1   : > { %6319 = vmatpush1.bf16.msra.mxu1 %v6318_v11  ;;  %6025 = vmatprep.subr.bf16.mxu0 %v6024_v58  ;;  %v6036_v11 = vpack.c.bf16 %v4901_v4, %v4897_v38  ;;  %v4896_v58 = vld [vmem:[%s7683_s17 + $0xa50] sm:$0xff]  ;;  %v5126_v4 = vld [vmem:[%s7683_s17 + $0x1180] sm:$0xff] }
 0x1e2   : > { %6321 = vmatprep.subr.bf16.mxu1 %v6320_v14  ;;  %v6332_v14 = vpack.c.bf16 %v5107_v8, %v5103_v7  ;;  %v6038_v0 = vpack.c.bf16 %v4900_v62, %v4896_v58  ;;  %v4924_v38 = vld [vmem:[%s7683_s17 + $0xb30] sm:$0xff]  ;;  %v5130_v8 = vld [vmem:[%s7683_s17 + $0x11a0] sm:$0xff]  ;;  %v5139_v58 = vld [vmem:[%s7683_s17 + $0x11e8] sm:$0xff] }
 0x1e3   : > { %v6050_v62 = vpack.c.bf16 %v4924_v38, %v4920_v39  ;;  %v6346_v13 = vpack.c.bf16 %v5130_v8, %v5126_v4  ;;  %v2443_v38 = vrot.slane %v7834_v30, 4  ;;  %v1211_v4 = vld [vmem:[%s7683_s17 + $0x38] sm:$0xff]  ;;  %v5163_v8 = vld [vmem:[%s7683_s17 + $0x12a8] sm:$0xff] }
 0x1e4   : > { %6027 = vmatpush1.bf16.msra.mxu0 %v6026_v3  ;;  %2516 = vmatmul.mubr.f32.vlgmr.msra.gmra.mrb[36].mxu1 %v8158_v42  ;;  %v6040_v3 = vpack.c.bf16 %v4909_v60, %v4905_v17  ;;  %v4932_v17 = vld [vmem:[%s7683_s17 + $0xb70] sm:$0xff]  ;;  %v5134_v60 = vld [vmem:[%s7683_s17 + $0x11c0] sm:$0xff] }
 0x1e5   : > { %2521 = vmatprep.mubr.f32.mxu1 %v8167_v50  ;;  %6323 = vmatpush1.bf16.msra.mxu1 %v6322_v22  ;;  %v5110_v22 = vld [vmem:[%s7683_s17 + $0x1100] sm:$0xff] }
 0x1e6   : > { %6029 = vmatprep.subr.bf16.mxu0 %v6028_v29  ;;  %6325 = vmatprep.subr.bf16.mxu1 %v6324_v27  ;;  %v5123_v29 = vld [vmem:[%s7683_s17 + $0x1168] sm:$0xff]  ;;  %v6042_v27 = vpack.c.bf16 %v4908_v9, %v4904_v5  ;;  %v6338_v36 = vpack.c.bf16 %v5114_v24, %v5110_v22  ;;  %v6054_v9 = vpack.c.bf16 %v4932_v17, %v4928_v59  ;;  %v4936_v24 = vld [vmem:[%s7683_s17 + $0xb90] sm:$0xff] }
 0x1e7   : > { %v5147_v5 = vld [vmem:[%s7683_s17 + $0x1228] sm:$0xff] }
 0x1e8   : > { %6031 = vmatpush1.bf16.msra.mxu0 %v6030_v49  ;;  %2522 = vmatmul.mubr.f32.gmra.mrb[38].mxu1 %v8177_v6  ;;  %v4921_v49 = vld [vmem:[%s7683_s17 + $0xb18] sm:$0xff] }
 0x1e9   : > { %6327 = vmatpush1.bf16.msra.mxu1 %v6326_v51  ;;  %6033 = vmatprep.subr.bf16.mxu0 %v6032_v52  ;;  %v4925_v51 = vld [vmem:[%s7683_s17 + $0xb38] sm:$0xff]  ;;  %v5127_v52 = vld [vmem:[%s7683_s17 + $0x1188] sm:$0xff] }
 0x1ea   : > { %6329 = vmatprep.subr.bf16.mxu1 %v6328_v63  ;;  %2592 = vmatprep.mubr.f32.mxu1 %v7273_v61  ;;  %v6048_v63 = vpack.c.bf16 %v4925_v51, %v4921_v49  ;;  %v6344_v7 = vpack.c.bf16 %v5131_v41, %v5127_v52  ;;  %v4944_v51 = vld [vmem:[%s7683_s17 + $0xbd0] sm:$0xff]  ;;  %v6452_v41 = vpack.c.bf16 %v5155_v46, %v5151_v45 }
 0x1eb   : > { %1839 = vmatmul.mubr.f32.vlgmr.msra.gmra.mrb[28].mxu0 %v7937_v19  ;;  %v6336_v19 = vpack.c.bf16 %v5115_v18, %v5111_v2  ;;  %v5138_v18 = vld [vmem:[%s7683_s17 + $0x11e0] sm:$0xff]  ;;  %v4948_v52 = vld [vmem:[%s7683_s17 + $0xbf0] sm:$0xff] }
 0x1ec   : > { %1844 = vmatprep.mubr.f32.mxu0 %v7948_v16  ;;  %6035 = vmatpush1.bf16.msra.mxu0 %v6034_v10  ;;  %v5119_v16 = vld [vmem:[%s7683_s17 + $0x1148] sm:$0xff]  ;;  %v4929_v10 = vld [vmem:[%s7683_s17 + $0xb58] sm:$0xff]  ;;  %v6350_v22 = vpack.c.bf16 %v5138_v18, %v5134_v60  ;;  %v5162_v60 = vld [vmem:[%s7683_s17 + $0x12a0] sm:$0xff] }
 0x1ed   : > { %6331 = vmatpush1.bf16.msra.mxu1 %v6330_v56  ;;  %6037 = vmatprep.subr.bf16.mxu0 %v6036_v11  ;;  %v4933_v56 = vld [vmem:[%s7683_s17 + $0xb78] sm:$0xff]  ;;  %v5135_v11 = vld [vmem:[%s7683_s17 + $0x11c8] sm:$0xff] }
 0x1ee   : > { %6333 = vmatprep.subr.bf16.mxu1 %v6332_v14  ;;  %v6052_v14 = vpack.c.bf16 %v4933_v56, %v4929_v10  ;;  %v6348_v2 = vpack.c.bf16 %v5139_v58, %v5135_v11  ;;  %v6062_v10 = vpack.c.bf16 %v4948_v52, %v4944_v51  ;;  %v2965_v56 = vrot.slane %v7902_v53, 6  ;;  %v1206_v58 = vld [vmem:[%s7683_s17 + $0x10] sm:$0xff]  ;;  %v1219_v18 = vld [vmem:[%s7683_s17 + $0x78] sm:$0xff]  ;;  %v5174_v51 = vld [vmem:[%s7683_s17 + $0x1300] sm:$0xff] }
 0x1ef   : > { %1845 = vmatmul.mubr.f32.gmra.mrb[30].mxu0 %v7955_v40  ;;  %v6340_v40 = vpack.c.bf16 %v5123_v29, %v5119_v16  ;;  %v5146_v29 = vld [vmem:[%s7683_s17 + $0x1220] sm:$0xff] }
 0x1f0   : > { %6039 = vmatpush1.bf16.msra.mxu0 %v6038_v0  ;;  %1915 = vmatprep.mubr.f32.mxu0 %v7273_v61  ;;  %v4937_v0 = vld [vmem:[%s7683_s17 + $0xb98] sm:$0xff]  ;;  %v6450_v47 = vpack.c.bf16 %v5146_v29, %v5142_v20  ;;  %v5166_v20 = vld [vmem:[%s7683_s17 + $0x12c0] sm:$0xff] }
 0x1f1   : > { %6335 = vmatpush1.bf16.msra.mxu1 %v6334_v1  ;;  %6041 = vmatprep.subr.bf16.mxu0 %v6040_v3  ;;  %v4941_v1 = vld [vmem:[%s7683_s17 + $0xbb8] sm:$0xff]  ;;  %v5143_v3 = vld [vmem:[%s7683_s17 + $0x1208] sm:$0xff]  ;;  %v5170_v29 = vld [vmem:[%s7683_s17 + $0x12e0] sm:$0xff] }
 0x1f2   : > { %6337 = vmatprep.subr.bf16.mxu1 %v6336_v19  ;;  %v6056_v19 = vpack.c.bf16 %v4941_v1, %v4937_v0  ;;  %v6448_v16 = vpack.c.bf16 %v5147_v5, %v5143_v3  ;;  %v8260_v0 = vsel %vm2429_vm1, %v2437_v44, %v2443_v38  ;;  %v5167_v1 = vld [vmem:[%s7683_s17 + $0x12c8] sm:$0xff]  ;;  %v6462_v46 = vpack.c.bf16 %v5170_v29, %v5166_v20  ;;  %v5178_v52 = vld [vmem:[%s7683_s17 + $0x1320] sm:$0xff] }
 0x1f3   : > { %v5171_v3 = vld [vmem:[%s7683_s17 + $0x12e8] sm:$0xff] }
 0x1f4   : > { %6043 = vmatpush1.bf16.msra.mxu0 %v6042_v27  ;;  %v4945_v27 = vld [vmem:[%s7683_s17 + $0xbd8] sm:$0xff] }
 0x1f5   : > { %6339 = vmatpush1.bf16.msra.mxu1 %v6338_v36  ;;  %6045 = vmatprep.subr.bf16.mxu0 %v6044_v43  ;;  %v4949_v36 = vld [vmem:[%s7683_s17 + $0xbf8] sm:$0xff]  ;;  %v2436_v43 = vrot.slane %v7832_v23, 4 }
 0x1f6   : > { %6341 = vmatprep.subr.bf16.mxu1 %v6340_v40  ;;  %v6058_v40 = vpack.c.bf16 %v4940_v26, %v4936_v24  ;;  %v6060_v49 = vpack.c.bf16 %v4949_v36, %v4945_v27  ;;  %v1214_v24 = vld [vmem:[%s7683_s17 + $0x50] sm:$0xff]  ;;  %v1223_v27 = vld [vmem:[%s7683_s17 + $0x98] sm:$0xff] }
 0x1f7   : > { %v8243_v39 = vsel %vm2429_vm1, %v2436_v43, %v2437_v44  ;;  %v1218_v26 = vld [vmem:[%s7683_s17 + $0x70] sm:$0xff]  ;;  %v1227_v36 = vld [vmem:[%s7683_s17 + $0xb8] sm:$0xff]  ;;  %v5175_v43 = vld [vmem:[%s7683_s17 + $0x1308] sm:$0xff] }
 0x1f8   : > { %6047 = vmatpush1.bf16.msra.mxu0 %v6046_v55  ;;  %v5150_v55 = vld [vmem:[%s7683_s17 + $0x1240] sm:$0xff]  ;;  %v5179_v44 = vld [vmem:[%s7683_s17 + $0x1328] sm:$0xff]  ;;  %v6166_v45 = vpack.c.bf16 %v1218_v26, %v1214_v24 }
 0x1f9   : > { %6343 = vmatpush1.bf16.msra.mxu1 %v6342_v57  ;;  %6049 = vmatprep.subr.bf16.mxu0 %v6048_v63  ;;  %v5154_v57 = vld [vmem:[%s7683_s17 + $0x1260] sm:$0xff]  ;;  %v1207_v63 = vld [vmem:[%s7683_s17 + $0x18] sm:$0xff]  ;;  %v5199_v24 = vld [vmem:[%s7683_s17 + $0x13c8] sm:$0xff] }
 0x1fa   : > { %6345 = vmatprep.subr.bf16.mxu1 %v6344_v7  ;;  %v5159_v7 = vld [vmem:[%s7683_s17 + $0x1288] sm:$0xff]  ;;  %v6454_v11 = vpack.c.bf16 %v5154_v57, %v5150_v55  ;;  %v6160_v59 = vpack.c.bf16 %v1211_v4, %v1207_v63  ;;  %v1235_v55 = vld [vmem:[%s7683_s17 + $0xf8] sm:$0xff]  ;;  %v6466_v4 = vpack.c.bf16 %v5178_v52, %v5174_v51 }
 0x1fb   : > { %v6456_v17 = vpack.c.bf16 %v5163_v8, %v5159_v7  ;;  %v5183_v57 = vld [vmem:[%s7683_s17 + $0x1348] sm:$0xff]  ;;  %v1230_v8 = vld [vmem:[%s7683_s17 + $0xd0] sm:$0xff] }
 0x1fc   : > { %6051 = vmatpush1.bf16.msra.mxu0 %v6050_v62  ;;  %v1210_v62 = vld [vmem:[%s7683_s17 + $0x30] sm:$0xff]  ;;  %v5187_v63 = vld [vmem:[%s7683_s17 + $0x1368] sm:$0xff] }
 0x1fd   : > { %6347 = vmatpush1.bf16.msra.mxu1 %v6346_v13  ;;  %6053 = vmatprep.subr.bf16.mxu0 %v6052_v14  ;;  %v5158_v13 = vld [vmem:[%s7683_s17 + $0x1280] sm:$0xff]  ;;  %v2964_v14 = vrot.slane %v7887_v28, 6  ;;  %v5203_v26 = vld [vmem:[%s7683_s17 + $0x13e8] sm:$0xff] }
 0x1fe   : > { %6349 = vmatprep.subr.bf16.mxu1 %v6348_v2  ;;  %v1215_v2 = vld [vmem:[%s7683_s17 + $0x58] sm:$0xff] }
 0x1ff   : > { %v8268_v5 = vsel %vm2960_vm2, %v2964_v14, %v2965_v56  ;;  %v5195_v14 = vld [vmem:[%s7683_s17 + $0x13a8] sm:$0xff] }
 0x200   : > { %6055 = vmatpush1.bf16.msra.mxu0 %v6054_v9  ;;  %v6162_v9 = vpack.c.bf16 %v1210_v62, %v1206_v58  ;;  %v5186_v58 = vld [vmem:[%s7683_s17 + $0x1360] sm:$0xff]  ;;  %v1239_v62 = vld [vmem:[%s7683_s17 + $0x118] sm:$0xff] }
 0x201   : > { %6351 = vmatpush1.bf16.msra.mxu1 %v6350_v22  ;;  %6057 = vmatprep.subr.bf16.mxu0 %v6056_v19  ;;  %v6458_v22 = vpack.c.bf16 %v5162_v60, %v5158_v13  ;;  %v6164_v19 = vpack.c.bf16 %v1219_v18, %v1215_v2  ;;  %v1243_v13 = vld [vmem:[%s7683_s17 + $0x138] sm:$0xff]  ;;  %v1238_v2 = vld [vmem:[%s7683_s17 + $0x110] sm:$0xff] }
 0x202   : > { %6449 = vmatprep.subr.bf16.mxu1 %v6448_v16  ;;  %v6460_v16 = vpack.c.bf16 %v5171_v3, %v5167_v1  ;;  %v6176_v60 = vpack.c.bf16 %v1243_v13, %v1239_v62  ;;  %v1242_v18 = vld [vmem:[%s7683_s17 + $0x130] sm:$0xff]  ;;  %v5190_v1 = vld [vmem:[%s7683_s17 + $0x1380] sm:$0xff] }
 0x203   : > { %v6178_v20 = vpack.c.bf16 %v1242_v18, %v1238_v2  ;;  %v1262_v62 = vld [vmem:[%s7683_s17 + $0x1d0] sm:$0xff]  ;;  %v5223_v2 = vld [vmem:[%s7683_s17 + $0x1488] sm:$0xff] }
 0x204   : > { %6059 = vmatpush1.bf16.msra.mxu0 %v6058_v40  ;;  %2593 = vmatmul.mubr.f32.vlgmr.msra.gmra.mrb[36].mxu1 %v8243_v39  ;;  %v6168_v40 = vpack.c.bf16 %v1227_v36, %v1223_v27  ;;  %v1246_v27 = vld [vmem:[%s7683_s17 + $0x150] sm:$0xff]  ;;  %v5227_v18 = vld [vmem:[%s7683_s17 + $0x14a8] sm:$0xff] }
 0x205   : > { %6451 = vmatpush1.bf16.msra.mxu1 %v6450_v47  ;;  %6061 = vmatprep.subr.bf16.mxu0 %v6060_v49  ;;  %v1222_v47 = vld [vmem:[%s7683_s17 + $0x90] sm:$0xff] }
 0x206   : > { %2598 = vmatprep.mubr.f32.mxu1 %v7273_v61  ;;  %6453 = vmatprep.subr.bf16.mxu1 %v6452_v41  ;;  %v1226_v49 = vld [vmem:[%s7683_s17 + $0xb0] sm:$0xff]  ;;  %v1231_v41 = vld [vmem:[%s7683_s17 + $0xd8] sm:$0xff] }
 0x207   : > { %v6170_v38 = vpack.c.bf16 %v1226_v49, %v1222_v47  ;;  %v6172_v7 = vpack.c.bf16 %v1235_v55, %v1231_v41  ;;  %v1250_v36 = vld [vmem:[%s7683_s17 + $0x170] sm:$0xff]  ;;  %v5207_v47 = vld [vmem:[%s7683_s17 + $0x1408] sm:$0xff] }
 0x208   : > { %6063 = vmatpush1.bf16.msra.mxu0 %v6062_v10  ;;  %2599 = vmatmul.mubr.f32.gmra.mrb[38].mxu1 %v8260_v0  ;;  %v1234_v10 = vld [vmem:[%s7683_s17 + $0xf0] sm:$0xff]  ;;  %v5211_v49 = vld [vmem:[%s7683_s17 + $0x1428] sm:$0xff]  ;;  %v6182_v51 = vpack.c.bf16 %v1250_v36, %v1246_v27 }
 0x209   : > { %6455 = vmatpush1.bf16.msra.mxu1 %v6454_v11  ;;  %3046 = vmatprep.mubr.f32.mxu1 %v8268_v5  ;;  %v5182_v11 = vld [vmem:[%s7683_s17 + $0x1340] sm:$0xff]  ;;  %v1254_v41 = vld [vmem:[%s7683_s17 + $0x190] sm:$0xff]  ;;  %v5231_v27 = vld [vmem:[%s7683_s17 + $0x14c8] sm:$0xff] }
 0x20a   : > { %6161 = vmatprep.subr.bf16.mxu0 %v6160_v59  ;;  %6457 = vmatprep.subr.bf16.mxu1 %v6456_v17  ;;  %v6174_v59 = vpack.c.bf16 %v1234_v10, %v1230_v8  ;;  %v6470_v17 = vpack.c.bf16 %v5186_v58, %v5182_v11  ;;  %v1258_v55 = vld [vmem:[%s7683_s17 + $0x1b0] sm:$0xff]  ;;  %v5215_v8 = vld [vmem:[%s7683_s17 + $0x1448] sm:$0xff] }
 0x20b   : > { %1916 = vmatmul.mubr.f32.vlgmr.msra.gmra.mrb[28].mxu0 %v8029_v33  ;;  %v6464_v33 = vpack.c.bf16 %v5179_v44, %v5175_v43  ;;  %v5198_v43 = vld [vmem:[%s7683_s17 + $0x13c0] sm:$0xff]  ;;  %v6476_v44 = vpack.c.bf16 %v5203_v26, %v5199_v24  ;;  %v5219_v10 = vld [vmem:[%s7683_s17 + $0x1468] sm:$0xff]  ;;  %v6186_v11 = vpack.c.bf16 %v1258_v55, %v1254_v41  ;;  %v1266_v13 = vld [vmem:[%s7683_s17 + $0x1f0] sm:$0xff]  ;;  %v6488_v26 = vpack.c.bf16 %v5227_v18, %v5223_v2 }
 0x20c   : > { %6163 = vmatpush1.bf16.msra.mxu0 %v6162_v9  ;;  %1921 = vmatprep.mubr.f32.mxu0 %v7273_v61  ;;  %v5194_v9 = vld [vmem:[%s7683_s17 + $0x13a0] sm:$0xff]  ;;  %v5235_v36 = vld [vmem:[%s7683_s17 + $0x14e8] sm:$0xff] }
 0x20d   : > { %6459 = vmatpush1.bf16.msra.mxu1 %v6458_v22  ;;  %6165 = vmatprep.subr.bf16.mxu0 %v6164_v19  ;;  %v1247_v22 = vld [vmem:[%s7683_s17 + $0x158] sm:$0xff]  ;;  %v5222_v24 = vld [vmem:[%s7683_s17 + $0x1480] sm:$0xff]  ;;  %v5239_v41 = vld [vmem:[%s7683_s17 + $0x1508] sm:$0xff] }
 0x20e   : > { %6461 = vmatprep.subr.bf16.mxu1 %v6460_v16  ;;  %v1251_v19 = vld [vmem:[%s7683_s17 + $0x178] sm:$0xff]  ;;  %v6474_v16 = vpack.c.bf16 %v5194_v9, %v5190_v1  ;;  %v6190_v1 = vpack.c.bf16 %v1266_v13, %v1262_v62  ;;  %v5243_v55 = vld [vmem:[%s7683_s17 + $0x1528] sm:$0xff]  ;;  %v5246_v2 = vld [vmem:[%s7683_s17 + $0x1540] sm:$0xff] }
 0x20f   : > { %1922 = vmatmul.mubr.f32.gmra.mrb[30].mxu0 %v8043_v54  ;;  %v6468_v54 = vpack.c.bf16 %v5187_v63, %v5183_v57  ;;  %v6180_v29 = vpack.c.bf16 %v1251_v19, %v1247_v22  ;;  %v5206_v57 = vld [vmem:[%s7683_s17 + $0x1400] sm:$0xff]  ;;  %v6480_v63 = vpack.c.bf16 %v5211_v49, %v5207_v47  ;;  %v1270_v22 = vld [vmem:[%s7683_s17 + $0x210] sm:$0xff]  ;;  %v6492_v49 = vpack.c.bf16 %v5235_v36, %v5231_v27  ;;  %v5247_v62 = vld [vmem:[%s7683_s17 + $0x1548] sm:$0xff] }
 0x210   : > { %6167 = vmatpush1.bf16.msra.mxu0 %v6166_v45  ;;  %2146 = vmatprep.mubr.f32.mxu0 %v7887_v28  ;;  %v5191_v28 = vld [vmem:[%s7683_s17 + $0x1388] sm:$0xff]  ;;  %v5202_v45 = vld [vmem:[%s7683_s17 + $0x13e0] sm:$0xff]  ;;  %v1274_v19 = vld [vmem:[%s7683_s17 + $0x230] sm:$0xff] }
 0x211   : > { %6463 = vmatpush1.bf16.msra.mxu1 %v6462_v46  ;;  %6169 = vmatprep.subr.bf16.mxu0 %v6168_v40  ;;  %v6472_v3 = vpack.c.bf16 %v5195_v14, %v5191_v28  ;;  %v1255_v46 = vld [vmem:[%s7683_s17 + $0x198] sm:$0xff]  ;;  %v5214_v28 = vld [vmem:[%s7683_s17 + $0x1440] sm:$0xff]  ;;  %v6484_v14 = vpack.c.bf16 %v5219_v10, %v5215_v8  ;;  %v6496_v10 = vpack.c.bf16 %v5243_v55, %v5239_v41  ;;  %v5251_v13 = vld [vmem:[%s7683_s17 + $0x1568] sm:$0xff] }
 0x212   : > { %6465 = vmatprep.subr.bf16.mxu1 %v6464_v33  ;;  %v1259_v40 = vld [vmem:[%s7683_s17 + $0x1b8] sm:$0xff]  ;;  %v6478_v33 = vpack.c.bf16 %v5202_v45, %v5198_v43  ;;  %v6194_v43 = vpack.c.bf16 %v1274_v19, %v1270_v22  ;;  %v5230_v47 = vld [vmem:[%s7683_s17 + $0x14c0] sm:$0xff]  ;;  %v6500_v18 = vpack.c.bf16 %v5251_v13, %v5247_v62  ;;  %v5255_v22 = vld [vmem:[%s7683_s17 + $0x1588] sm:$0xff] }
 0x213   : > { %v6184_v52 = vpack.c.bf16 %v1259_v40, %v1255_v46  ;;  %v1278_v46 = vld [vmem:[%s7683_s17 + $0x250] sm:$0xff]  ;;  %v5238_v8 = vld [vmem:[%s7683_s17 + $0x1500] sm:$0xff]  ;;  %v5259_v19 = vld [vmem:[%s7683_s17 + $0x15a8] sm:$0xff] }
 0x214   : > { %6171 = vmatpush1.bf16.msra.mxu0 %v6170_v38  ;;  %v5210_v38 = vld [vmem:[%s7683_s17 + $0x1420] sm:$0xff]  ;;  %v1282_v40 = vld [vmem:[%s7683_s17 + $0x270] sm:$0xff]  ;;  %v6504_v36 = vpack.c.bf16 %v5259_v19, %v5255_v22 }
 0x215   : > { %6467 = vmatpush1.bf16.msra.mxu1 %v6466_v4  ;;  %6173 = vmatprep.subr.bf16.mxu0 %v6172_v7  ;;  %v1263_v4 = vld [vmem:[%s7683_s17 + $0x1d8] sm:$0xff]  ;;  %v5254_v27 = vld [vmem:[%s7683_s17 + $0x1580] sm:$0xff]  ;;  %v1326_v22 = vld [vmem:[%s7683_s17 + $0x3d0] sm:$0xff] }
 0x216   : > { %6469 = vmatprep.subr.bf16.mxu1 %v6468_v54  ;;  %v1267_v7 = vld [vmem:[%s7683_s17 + $0x1f8] sm:$0xff]  ;;  %v6482_v54 = vpack.c.bf16 %v5210_v38, %v5206_v57  ;;  %v6198_v57 = vpack.c.bf16 %v1282_v40, %v1278_v46  ;;  %v5263_v46 = vld [vmem:[%s7683_s17 + $0x15c8] sm:$0xff]  ;;  %v5262_v41 = vld [vmem:[%s7683_s17 + $0x15c0] sm:$0xff] }
 0x217   : > { %v6188_v58 = vpack.c.bf16 %v1267_v7, %v1263_v4  ;;  %v1286_v4 = vld [vmem:[%s7683_s17 + $0x290] sm:$0xff]  ;;  %v5267_v40 = vld [vmem:[%s7683_s17 + $0x15e8] sm:$0xff]  ;;  %v5270_v13 = vld [vmem:[%s7683_s17 + $0x1600] sm:$0xff] }
 0x218   : > { %6175 = vmatpush1.bf16.msra.mxu0 %v6174_v59  ;;  %v5218_v59 = vld [vmem:[%s7683_s17 + $0x1460] sm:$0xff]  ;;  %v1290_v7 = vld [vmem:[%s7683_s17 + $0x2b0] sm:$0xff]  ;;  %v6508_v55 = vpack.c.bf16 %v5267_v40, %v5263_v46 }
 0x219   : > { %6471 = vmatpush1.bf16.msra.mxu1 %v6470_v17  ;;  %6177 = vmatprep.subr.bf16.mxu0 %v6176_v60  ;;  %v1271_v17 = vld [vmem:[%s7683_s17 + $0x218] sm:$0xff]  ;;  %v1330_v19 = vld [vmem:[%s7683_s17 + $0x3f0] sm:$0xff] }
 0x21a   : > { %6473 = vmatprep.subr.bf16.mxu1 %v6472_v3  ;;  %v1275_v60 = vld [vmem:[%s7683_s17 + $0x238] sm:$0xff]  ;;  %v6486_v3 = vpack.c.bf16 %v5218_v59, %v5214_v28  ;;  %v6202_v28 = vpack.c.bf16 %v1290_v7, %v1286_v4  ;;  %v5271_v4 = vld [vmem:[%s7683_s17 + $0x1608] sm:$0xff]  ;;  %v6222_v40 = vpack.c.bf16 %v1330_v19, %v1326_v22  ;;  %v5306_v22 = vld [vmem:[%s7683_s17 + $0x1720] sm:$0xff] }
 0x21b   : > { %v6192_v9 = vpack.c.bf16 %v1275_v60, %v1271_v17  ;;  %v1294_v17 = vld [vmem:[%s7683_s17 + $0x2d0] sm:$0xff]  ;;  %v5275_v7 = vld [vmem:[%s7683_s17 + $0x1628] sm:$0xff]  ;;  %v1359_v19 = vld [vmem:[%s7683_s17 + $0x4d8] sm:$0xff] }
 0x21c   : > { %6179 = vmatpush1.bf16.msra.mxu0 %v6178_v20  ;;  %v5226_v20 = vld [vmem:[%s7683_s17 + $0x14a0] sm:$0xff]  ;;  %v1298_v60 = vld [vmem:[%s7683_s17 + $0x2f0] sm:$0xff]  ;;  %v6512_v62 = vpack.c.bf16 %v5275_v7, %v5271_v4  ;;  %v5299_v4 = vld [vmem:[%s7683_s17 + $0x16e8] sm:$0xff] }
 0x21d   : > { %6475 = vmatpush1.bf16.msra.mxu1 %v6474_v16  ;;  %6181 = vmatprep.subr.bf16.mxu0 %v6180_v29  ;;  %v1279_v16 = vld [vmem:[%s7683_s17 + $0x258] sm:$0xff] }
 0x21e   : > { %6477 = vmatprep.subr.bf16.mxu1 %v6476_v44  ;;  %v1283_v29 = vld [vmem:[%s7683_s17 + $0x278] sm:$0xff]  ;;  %v6490_v44 = vpack.c.bf16 %v5226_v20, %v5222_v24  ;;  %v6206_v24 = vpack.c.bf16 %v1298_v60, %v1294_v17  ;;  %v5279_v60 = vld [vmem:[%s7683_s17 + $0x1648] sm:$0xff] }
 0x21f   : > { %v6196_v45 = vpack.c.bf16 %v1283_v29, %v1279_v16  ;;  %v1302_v16 = vld [vmem:[%s7683_s17 + $0x310] sm:$0xff]  ;;  %v1331_v17 = vld [vmem:[%s7683_s17 + $0x3f8] sm:$0xff] }
 0x220   : > { %6183 = vmatpush1.bf16.msra.mxu0 %v6182_v51  ;;  %v5234_v51 = vld [vmem:[%s7683_s17 + $0x14e0] sm:$0xff]  ;;  %v1306_v29 = vld [vmem:[%s7683_s17 + $0x330] sm:$0xff] }
 0x221   : > { %6479 = vmatpush1.bf16.msra.mxu1 %v6478_v33  ;;  %6185 = vmatprep.subr.bf16.mxu0 %v6184_v52  ;;  %v1287_v33 = vld [vmem:[%s7683_s17 + $0x298] sm:$0xff] }
 0x222   : > { %6481 = vmatprep.subr.bf16.mxu1 %v6480_v63  ;;  %v1291_v52 = vld [vmem:[%s7683_s17 + $0x2b8] sm:$0xff]  ;;  %v6494_v63 = vpack.c.bf16 %v5234_v51, %v5230_v47  ;;  %v6210_v47 = vpack.c.bf16 %v1306_v29, %v1302_v16  ;;  %v5282_v16 = vld [vmem:[%s7683_s17 + $0x1660] sm:$0xff] }
 0x223   : > { %v6200_v38 = vpack.c.bf16 %v1291_v52, %v1287_v33  ;;  %v1310_v33 = vld [vmem:[%s7683_s17 + $0x350] sm:$0xff]  ;;  %v1335_v29 = vld [vmem:[%s7683_s17 + $0x418] sm:$0xff] }
 0x224   : > { %6187 = vmatpush1.bf16.msra.mxu0 %v6186_v11  ;;  %v5242_v11 = vld [vmem:[%s7683_s17 + $0x1520] sm:$0xff]  ;;  %v1314_v52 = vld [vmem:[%s7683_s17 + $0x370] sm:$0xff] }
 0x225   : > { %6483 = vmatpush1.bf16.msra.mxu1 %v6482_v54  ;;  %6189 = vmatprep.subr.bf16.mxu0 %v6188_v58  ;;  %v1295_v54 = vld [vmem:[%s7683_s17 + $0x2d8] sm:$0xff] }
 0x226   : > { %6485 = vmatprep.subr.bf16.mxu1 %v6484_v14  ;;  %v1299_v58 = vld [vmem:[%s7683_s17 + $0x2f8] sm:$0xff]  ;;  %v6498_v14 = vpack.c.bf16 %v5242_v11, %v5238_v8  ;;  %v6214_v8 = vpack.c.bf16 %v1314_v52, %v1310_v33  ;;  %v1338_v33 = vld [vmem:[%s7683_s17 + $0x430] sm:$0xff]  ;;  %v5286_v52 = vld [vmem:[%s7683_s17 + $0x1680] sm:$0xff] }
 0x227   : > { %v6204_v59 = vpack.c.bf16 %v1299_v58, %v1295_v54  ;;  %v1318_v54 = vld [vmem:[%s7683_s17 + $0x390] sm:$0xff] }
 0x228   : > { %6191 = vmatpush1.bf16.msra.mxu0 %v6190_v1  ;;  %v5250_v1 = vld [vmem:[%s7683_s17 + $0x1560] sm:$0xff]  ;;  %v1322_v58 = vld [vmem:[%s7683_s17 + $0x3b0] sm:$0xff] }
 0x229   : > { %6487 = vmatpush1.bf16.msra.mxu1 %v6486_v3  ;;  %6193 = vmatprep.subr.bf16.mxu0 %v6192_v9  ;;  %v1303_v3 = vld [vmem:[%s7683_s17 + $0x318] sm:$0xff] }
 0x22a   : > { %6489 = vmatprep.subr.bf16.mxu1 %v6488_v26  ;;  %v1307_v9 = vld [vmem:[%s7683_s17 + $0x338] sm:$0xff]  ;;  %v6502_v26 = vpack.c.bf16 %v5250_v1, %v5246_v2  ;;  %v5283_v2 = vld [vmem:[%s7683_s17 + $0x1668] sm:$0xff]  ;;  %v2972_v1 = vrot.slane %v7926_v15, 6 }
 0x22b   : > { %v6208_v20 = vpack.c.bf16 %v1307_v9, %v1303_v3  ;;  %v2961_v3 = vrot.slane %v7883_v25, 6 }
 0x22c   : > { %6195 = vmatpush1.bf16.msra.mxu0 %v6194_v43  ;;  %v5258_v43 = vld [vmem:[%s7683_s17 + $0x15a0] sm:$0xff]  ;;  %v8406_v46 = vsel %vm2960_vm2, %v2965_v56, %v2972_v1  ;;  %v1343_v56 = vld [vmem:[%s7683_s17 + $0x458] sm:$0xff]  ;;  %v1350_v1 = vld [vmem:[%s7683_s17 + $0x490] sm:$0xff] }
 0x22d   : > { %6491 = vmatpush1.bf16.msra.mxu1 %v6490_v44  ;;  %6197 = vmatprep.subr.bf16.mxu0 %v6196_v45  ;;  %v1311_v44 = vld [vmem:[%s7683_s17 + $0x358] sm:$0xff] }
 0x22e   : > { %6493 = vmatprep.subr.bf16.mxu1 %v6492_v49  ;;  %v1315_v45 = vld [vmem:[%s7683_s17 + $0x378] sm:$0xff]  ;;  %v6506_v49 = vpack.c.bf16 %v5258_v43, %v5254_v27  ;;  %v2970_v43 = vrot.slane %v7919_v12, 6 }
 0x22f   : > { %v6212_v51 = vpack.c.bf16 %v1315_v45, %v1311_v44  ;;  %v1339_v27 = vld [vmem:[%s7683_s17 + $0x438] sm:$0xff]  ;;  %v5287_v44 = vld [vmem:[%s7683_s17 + $0x1688] sm:$0xff] }
 0x230   : > { %6199 = vmatpush1.bf16.msra.mxu0 %v6198_v57  ;;  %v5266_v57 = vld [vmem:[%s7683_s17 + $0x15e0] sm:$0xff]  ;;  %v5291_v45 = vld [vmem:[%s7683_s17 + $0x16a8] sm:$0xff] }
 0x231   : > { %6495 = vmatpush1.bf16.msra.mxu1 %v6494_v63  ;;  %6201 = vmatprep.subr.bf16.mxu0 %v6200_v38  ;;  %v1319_v63 = vld [vmem:[%s7683_s17 + $0x398] sm:$0xff] }
 0x232   : > { %6497 = vmatprep.subr.bf16.mxu1 %v6496_v10  ;;  %v1323_v38 = vld [vmem:[%s7683_s17 + $0x3b8] sm:$0xff]  ;;  %v6510_v10 = vpack.c.bf16 %v5266_v57, %v5262_v41  ;;  %v6520_v41 = vpack.c.bf16 %v5291_v45, %v5287_v44  ;;  %v1362_v44 = vld [vmem:[%s7683_s17 + $0x4f0] sm:$0xff]  ;;  %v5310_v45 = vld [vmem:[%s7683_s17 + $0x1740] sm:$0xff] }
 0x233   : > { %v6216_v11 = vpack.c.bf16 %v1323_v38, %v1319_v63  ;;  %v1347_v57 = vld [vmem:[%s7683_s17 + $0x478] sm:$0xff]  ;;  %v5295_v38 = vld [vmem:[%s7683_s17 + $0x16c8] sm:$0xff] }
 0x234   : > { %6203 = vmatpush1.bf16.msra.mxu0 %v6202_v28  ;;  %v5274_v28 = vld [vmem:[%s7683_s17 + $0x1620] sm:$0xff] }
 0x235   : > { %6499 = vmatpush1.bf16.msra.mxu1 %v6498_v14  ;;  %6205 = vmatprep.subr.bf16.mxu0 %v6204_v59  ;;  %v1327_v14 = vld [vmem:[%s7683_s17 + $0x3d8] sm:$0xff]  ;;  %v2962_v59 = vrot.slane %v7896_v48, 6  ;;  %v6514_v9 = vpack.c.bf16 %v5274_v28, %v5270_v13  ;;  %v5298_v13 = vld [vmem:[%s7683_s17 + $0x16e0] sm:$0xff] }
 0x236   : > { %6501 = vmatprep.subr.bf16.mxu1 %v6500_v18  ;;  %v6218_v18 = vpack.c.bf16 %v1322_v58, %v1318_v54  ;;  %v1346_v54 = vld [vmem:[%s7683_s17 + $0x470] sm:$0xff]  ;;  %v5294_v58 = vld [vmem:[%s7683_s17 + $0x16c0] sm:$0xff]  ;;  %v1351_v28 = vld [vmem:[%s7683_s17 + $0x498] sm:$0xff] }
 0x237   : > { %v8416_v63 = vsel %vm2960_vm2, %v2962_v59, %v2970_v43  ;;  %v1358_v43 = vld [vmem:[%s7683_s17 + $0x4d0] sm:$0xff] }
 0x238   : > { %6207 = vmatpush1.bf16.msra.mxu0 %v6206_v24  ;;  %v5278_v24 = vld [vmem:[%s7683_s17 + $0x1640] sm:$0xff] }
 0x239   : > { %6503 = vmatpush1.bf16.msra.mxu1 %v6502_v26  ;;  %6209 = vmatprep.subr.bf16.mxu0 %v6208_v20  ;;  %v6220_v26 = vpack.c.bf16 %v1331_v17, %v1327_v14  ;;  %v6516_v20 = vpack.c.bf16 %v5283_v2, %v5279_v60  ;;  %v1355_v14 = vld [vmem:[%s7683_s17 + $0x4b8] sm:$0xff]  ;;  %v5307_v17 = vld [vmem:[%s7683_s17 + $0x1728] sm:$0xff]  ;;  %v6526_v2 = vpack.c.bf16 %v5298_v13, %v5294_v58 }
 0x23a   : > { %6505 = vmatprep.subr.bf16.mxu1 %v6504_v36  ;;  %v8397_v36 = vsel %vm2960_vm2, %v2961_v3, %v2962_v59  ;;  %v5303_v59 = vld [vmem:[%s7683_s17 + $0x1708] sm:$0xff]  ;;  %v1354_v3 = vld [vmem:[%s7683_s17 + $0x4b0] sm:$0xff] }
 0x23b   : > { %v5331_v58 = vld [vmem:[%s7683_s17 + $0x17e8] sm:$0xff] }
 0x23c   : > { %6211 = vmatpush1.bf16.msra.mxu0 %v6210_v47  ;;  %v6518_v47 = vpack.c.bf16 %v5282_v16, %v5278_v24  ;;  %v1363_v24 = vld [vmem:[%s7683_s17 + $0x4f8] sm:$0xff]  ;;  %v6234_v16 = vpack.c.bf16 %v1354_v3, %v1350_v1  ;;  %v5335_v3 = vld [vmem:[%s7683_s17 + $0x1808] sm:$0xff] }
 0x23d   : > { %6507 = vmatpush1.bf16.msra.mxu1 %v6506_v49  ;;  %6213 = vmatprep.subr.bf16.mxu0 %v6212_v51  ;;  %v6224_v49 = vpack.c.bf16 %v1339_v27, %v1335_v29  ;;  %v1334_v51 = vld [vmem:[%s7683_s17 + $0x410] sm:$0xff]  ;;  %v6236_v27 = vpack.c.bf16 %v1363_v24, %v1359_v19  ;;  %v1387_v1 = vld [vmem:[%s7683_s17 + $0x5b8] sm:$0xff] }
 0x23e   : > { %6509 = vmatprep.subr.bf16.mxu1 %v6508_v55  ;;  %v5290_v55 = vld [vmem:[%s7683_s17 + $0x16a0] sm:$0xff]  ;;  %v6226_v7 = vpack.c.bf16 %v1338_v33, %v1334_v51  ;;  %v1371_v51 = vld [vmem:[%s7683_s17 + $0x538] sm:$0xff]  ;;  %v5319_v33 = vld [vmem:[%s7683_s17 + $0x1788] sm:$0xff] }
 0x23f   : > { %v1382_v24 = vld [vmem:[%s7683_s17 + $0x590] sm:$0xff] }
 0x240   : > { %6215 = vmatpush1.bf16.msra.mxu0 %v6214_v8  ;;  %v6522_v8 = vpack.c.bf16 %v5290_v55, %v5286_v52  ;;  %v5323_v52 = vld [vmem:[%s7683_s17 + $0x17a8] sm:$0xff] }
 0x241   : > { %6511 = vmatpush1.bf16.msra.mxu1 %v6510_v10  ;;  %6217 = vmatprep.subr.bf16.mxu0 %v6216_v11  ;;  %v6228_v10 = vpack.c.bf16 %v1347_v57, %v1343_v56  ;;  %v1342_v11 = vld [vmem:[%s7683_s17 + $0x450] sm:$0xff] }
 0x242   : > { %6513 = vmatprep.subr.bf16.mxu1 %v6512_v62  ;;  %v6524_v62 = vpack.c.bf16 %v5299_v4, %v5295_v38  ;;  %v6230_v60 = vpack.c.bf16 %v1346_v54, %v1342_v11  ;;  %v1366_v57 = vld [vmem:[%s7683_s17 + $0x510] sm:$0xff]  ;;  %v5318_v4 = vld [vmem:[%s7683_s17 + $0x1780] sm:$0xff]  ;;  %v1379_v11 = vld [vmem:[%s7683_s17 + $0x578] sm:$0xff] }
 0x243   : > { %v1370_v38 = vld [vmem:[%s7683_s17 + $0x530] sm:$0xff]  ;;  %v5327_v54 = vld [vmem:[%s7683_s17 + $0x17c8] sm:$0xff] }
 0x244   : > { %6219 = vmatpush1.bf16.msra.mxu0 %v6218_v18  ;;  %3047 = vmatmul.mubr.f32.vlgmr.msra.gmra.mrb[36].mxu1 %v8397_v36  ;;  %v6232_v18 = vpack.c.bf16 %v1355_v14, %v1351_v28  ;;  %v1374_v14 = vld [vmem:[%s7683_s17 + $0x550] sm:$0xff] }
 0x245   : > { %3052 = vmatprep.mubr.f32.mxu1 %v8406_v46  ;;  %6515 = vmatpush1.bf16.msra.mxu1 %v6514_v9  ;;  %v5302_v9 = vld [vmem:[%s7683_s17 + $0x1700] sm:$0xff] }
 0x246   : > { %6221 = vmatprep.subr.bf16.mxu0 %v6220_v26  ;;  %6517 = vmatprep.subr.bf16.mxu1 %v6516_v20  ;;  %v5311_v26 = vld [vmem:[%s7683_s17 + $0x1748] sm:$0xff]  ;;  %v6530_v29 = vpack.c.bf16 %v5306_v22, %v5302_v9 }
 0x247   : > { %v5315_v20 = vld [vmem:[%s7683_s17 + $0x1768] sm:$0xff] }
 0x248   : > { %6223 = vmatpush1.bf16.msra.mxu0 %v6222_v40  ;;  %3053 = vmatmul.mubr.f32.gmra.mrb[38].mxu1 %v8416_v63  ;;  %v6532_v40 = vpack.c.bf16 %v5315_v20, %v5311_v26  ;;  %v5339_v9 = vld [vmem:[%s7683_s17 + $0x1828] sm:$0xff]  ;;  %v1386_v26 = vld [vmem:[%s7683_s17 + $0x5b0] sm:$0xff]  ;;  %v5334_v20 = vld [vmem:[%s7683_s17 + $0x1800] sm:$0xff] }
 0x249   : > { %6519 = vmatpush1.bf16.msra.mxu1 %v6518_v47  ;;  %6225 = vmatprep.subr.bf16.mxu0 %v6224_v49  ;;  %v5314_v47 = vld [vmem:[%s7683_s17 + $0x1760] sm:$0xff]  ;;  %v1367_v49 = vld [vmem:[%s7683_s17 + $0x518] sm:$0xff] }
 0x24a   : > { %6521 = vmatprep.subr.bf16.mxu1 %v6520_v41  ;;  %3123 = vmatprep.mubr.f32.mxu1 %v7273_v61  ;;  %v6238_v41 = vpack.c.bf16 %v1362_v44, %v1358_v43  ;;  %v6534_v55 = vpack.c.bf16 %v5314_v47, %v5310_v45  ;;  %v6240_v56 = vpack.c.bf16 %v1371_v51, %v1367_v49  ;;  %v1395_v43 = vld [vmem:[%s7683_s17 + $0x5f8] sm:$0xff]  ;;  %v2967_v44 = vrot.slane %v7832_v23, 6  ;;  %v5347_v47 = vld [vmem:[%s7683_s17 + $0x1868] sm:$0xff] }
 0x24b   : > { %2147 = vmatmul.mubr.f32.vlgmr.msra.gmra.mrb[28].mxu0 %v7883_v25  ;;  %v6528_v25 = vpack.c.bf16 %v5307_v17, %v5303_v59  ;;  %v1378_v59 = vld [vmem:[%s7683_s17 + $0x570] sm:$0xff]  ;;  %v5326_v17 = vld [vmem:[%s7683_s17 + $0x17c0] sm:$0xff]  ;;  %v2968_v45 = vrot.slane %v7836_v32, 6  ;;  %v6250_v49 = vpack.c.bf16 %v1386_v26, %v1382_v24 }
 0x24c   : > { %2152 = vmatprep.mubr.f32.mxu0 %v7902_v53  ;;  %6227 = vmatpush1.bf16.msra.mxu0 %v6226_v7  ;;  %v6536_v7 = vpack.c.bf16 %v5323_v52, %v5319_v33  ;;  %v1390_v52 = vld [vmem:[%s7683_s17 + $0x5d0] sm:$0xff]  ;;  %v5358_v26 = vld [vmem:[%s7683_s17 + $0x18c0] sm:$0xff] }
 0x24d   : > { %6523 = vmatpush1.bf16.msra.mxu1 %v6522_v8  ;;  %6229 = vmatprep.subr.bf16.mxu0 %v6228_v10  ;;  %v5322_v8 = vld [vmem:[%s7683_s17 + $0x17a0] sm:$0xff]  ;;  %v1375_v10 = vld [vmem:[%s7683_s17 + $0x558] sm:$0xff]  ;;  %v4964_v24 = vld [vmem:[%s7683_s17 + $0xc70] sm:$0xff] }
 0x24e   : > { %6525 = vmatprep.subr.bf16.mxu1 %v6524_v62  ;;  %v6242_v62 = vpack.c.bf16 %v1370_v38, %v1366_v57  ;;  %v6538_v13 = vpack.c.bf16 %v5322_v8, %v5318_v4  ;;  %v6244_v28 = vpack.c.bf16 %v1379_v11, %v1375_v10  ;;  %v5346_v57 = vld [vmem:[%s7683_s17 + $0x1860] sm:$0xff]  ;;  %v4953_v38 = vld [vmem:[%s7683_s17 + $0xc18] sm:$0xff]  ;;  %v8482_v4 = vsel %vm2960_vm2, %v2967_v44, %v2968_v45  ;;  %v5351_v10 = vld [vmem:[%s7683_s17 + $0x1888] sm:$0xff] }
 0x24f   : > { %2153 = vmatmul.mubr.f32.gmra.mrb[30].mxu0 %v7896_v48  ;;  %v4957_v8 = vld [vmem:[%s7683_s17 + $0xc38] sm:$0xff]  ;;  %v5355_v11 = vld [vmem:[%s7683_s17 + $0x18a8] sm:$0xff] }
 0x250   : > { %6231 = vmatpush1.bf16.msra.mxu0 %v6230_v60  ;;  %2223 = vmatprep.mubr.f32.mxu0 %v7273_v61  ;;  %v6540_v60 = vpack.c.bf16 %v5331_v58, %v5327_v54  ;;  %v5371_v44 = vld [vmem:[%s7683_s17 + $0x1928] sm:$0xff] }
 0x251   : > { %6527 = vmatpush1.bf16.msra.mxu1 %v6526_v2  ;;  %6233 = vmatprep.subr.bf16.mxu0 %v6232_v18  ;;  %v5330_v2 = vld [vmem:[%s7683_s17 + $0x17e0] sm:$0xff]  ;;  %v1383_v18 = vld [vmem:[%s7683_s17 + $0x598] sm:$0xff] }
 0x252   : > { %6529 = vmatprep.subr.bf16.mxu1 %v6528_v25  ;;  %v6246_v25 = vpack.c.bf16 %v1378_v59, %v1374_v14  ;;  %v6542_v22 = vpack.c.bf16 %v5330_v2, %v5326_v17  ;;  %v6248_v19 = vpack.c.bf16 %v1387_v1, %v1383_v18  ;;  %v6352_v14 = vpack.c.bf16 %v4957_v8, %v4953_v38  ;;  %v5354_v17 = vld [vmem:[%s7683_s17 + $0x18a0] sm:$0xff]  ;;  %v4965_v2 = vld [vmem:[%s7683_s17 + $0xc78] sm:$0xff]  ;;  %v5359_v1 = vld [vmem:[%s7683_s17 + $0x18c8] sm:$0xff] }
 0x253   : > { %v6648_v59 = vpack.c.bf16 %v5355_v11, %v5351_v10  ;;  %v4976_v10 = vld [vmem:[%s7683_s17 + $0xcd0] sm:$0xff] }
 0x254   : > { %6235 = vmatpush1.bf16.msra.mxu0 %v6234_v16  ;;  %v6640_v16 = vpack.c.bf16 %v5339_v9, %v5335_v3  ;;  %v5363_v3 = vld [vmem:[%s7683_s17 + $0x18e8] sm:$0xff]  ;;  %v4980_v11 = vld [vmem:[%s7683_s17 + $0xcf0] sm:$0xff] }
 0x255   : > { %6531 = vmatpush1.bf16.msra.mxu1 %v6530_v29  ;;  %6237 = vmatprep.subr.bf16.mxu0 %v6236_v27  ;;  %v5338_v29 = vld [vmem:[%s7683_s17 + $0x1820] sm:$0xff]  ;;  %v1391_v27 = vld [vmem:[%s7683_s17 + $0x5d8] sm:$0xff] }
 0x256   : > { %6533 = vmatprep.subr.bf16.mxu1 %v6532_v40  ;;  %v5343_v40 = vld [vmem:[%s7683_s17 + $0x1848] sm:$0xff]  ;;  %v6642_v51 = vpack.c.bf16 %v5338_v29, %v5334_v20  ;;  %v6252_v33 = vpack.c.bf16 %v1395_v43, %v1391_v27  ;;  %v6652_v20 = vpack.c.bf16 %v5363_v3, %v5359_v1  ;;  %v4969_v29 = vld [vmem:[%s7683_s17 + $0xc98] sm:$0xff]  ;;  %v4988_v1 = vld [vmem:[%s7683_s17 + $0xd30] sm:$0xff] }
 0x257   : > { %v4973_v27 = vld [vmem:[%s7683_s17 + $0xcb8] sm:$0xff]  ;;  %v5367_v43 = vld [vmem:[%s7683_s17 + $0x1908] sm:$0xff]  ;;  %v5382_v3 = vld [vmem:[%s7683_s17 + $0x1980] sm:$0xff] }
 0x258   : > { %6239 = vmatpush1.bf16.msra.mxu0 %v6238_v41  ;;  %v1394_v41 = vld [vmem:[%s7683_s17 + $0x5f0] sm:$0xff] }
 0x259   : > { %6535 = vmatpush1.bf16.msra.mxu1 %v6534_v55  ;;  %6241 = vmatprep.subr.bf16.mxu0 %v6240_v56  ;;  %v6644_v55 = vpack.c.bf16 %v5347_v47, %v5343_v40  ;;  %v5342_v56 = vld [vmem:[%s7683_s17 + $0x1840] sm:$0xff]  ;;  %v6254_v54 = vpack.c.bf16 %v1394_v41, %v1390_v52  ;;  %v6360_v47 = vpack.c.bf16 %v4973_v27, %v4969_v29  ;;  %v4977_v41 = vld [vmem:[%s7683_s17 + $0xcd8] sm:$0xff]  ;;  %v4992_v27 = vld [vmem:[%s7683_s17 + $0xd50] sm:$0xff] }
 0x25a   : > { %6537 = vmatprep.subr.bf16.mxu1 %v6536_v7  ;;  %v2974_v7 = vrot.slane %v7834_v30, 6  ;;  %v6646_v58 = vpack.c.bf16 %v5346_v57, %v5342_v56  ;;  %v5370_v52 = vld [vmem:[%s7683_s17 + $0x1920] sm:$0xff]  ;;  %v5375_v56 = vld [vmem:[%s7683_s17 + $0x1948] sm:$0xff] }
 0x25b   : > { %v5379_v57 = vld [vmem:[%s7683_s17 + $0x1968] sm:$0xff] }
 0x25c   : > { %6243 = vmatpush1.bf16.msra.mxu0 %v6242_v62  ;;  %v4952_v62 = vld [vmem:[%s7683_s17 + $0xc10] sm:$0xff]  ;;  %v8497_v18 = vsel %vm2960_vm2, %v2968_v45, %v2974_v7 }
 0x25d   : > { %6539 = vmatpush1.bf16.msra.mxu1 %v6538_v13  ;;  %6245 = vmatprep.subr.bf16.mxu0 %v6244_v28  ;;  %v4956_v13 = vld [vmem:[%s7683_s17 + $0xc30] sm:$0xff]  ;;  %v5350_v28 = vld [vmem:[%s7683_s17 + $0x1880] sm:$0xff] }
 0x25e   : > { %6541 = vmatprep.subr.bf16.mxu1 %v6540_v60  ;;  %v4961_v60 = vld [vmem:[%s7683_s17 + $0xc58] sm:$0xff]  ;;  %v6354_v9 = vpack.c.bf16 %v4956_v13, %v4952_v62  ;;  %v5378_v62 = vld [vmem:[%s7683_s17 + $0x1960] sm:$0xff] }
 0x25f   : > { %v4985_v13 = vld [vmem:[%s7683_s17 + $0xd18] sm:$0xff] }
 0x260   : > { %6247 = vmatpush1.bf16.msra.mxu0 %v6246_v25  ;;  %v6650_v25 = vpack.c.bf16 %v5354_v17, %v5350_v28  ;;  %v4989_v28 = vld [vmem:[%s7683_s17 + $0xd38] sm:$0xff] }
 0x261   : > { %6543 = vmatpush1.bf16.msra.mxu1 %v6542_v22  ;;  %6249 = vmatprep.subr.bf16.mxu0 %v6248_v19  ;;  %v6356_v22 = vpack.c.bf16 %v4965_v2, %v4961_v60  ;;  %v4960_v19 = vld [vmem:[%s7683_s17 + $0xc50] sm:$0xff]  ;;  %v6368_v60 = vpack.c.bf16 %v4989_v28, %v4985_v13 }
 0x262   : > { %6641 = vmatprep.subr.bf16.mxu1 %v6640_v16  ;;  %v5362_v16 = vld [vmem:[%s7683_s17 + $0x18e0] sm:$0xff]  ;;  %v6358_v45 = vpack.c.bf16 %v4964_v24, %v4960_v19  ;;  %v4984_v2 = vld [vmem:[%s7683_s17 + $0xd10] sm:$0xff]  ;;  %v4997_v19 = vld [vmem:[%s7683_s17 + $0xd78] sm:$0xff] }
 0x263   : > { %v6654_v40 = vpack.c.bf16 %v5362_v16, %v5358_v26  ;;  %v5391_v24 = vld [vmem:[%s7683_s17 + $0x19c8] sm:$0xff] }
 0x264   : > { %6251 = vmatpush1.bf16.msra.mxu0 %v6250_v49  ;;  %3124 = vmatmul.mubr.f32.vlgmr.msra.gmra.mrb[36].mxu1 %v8482_v4  ;;  %v4968_v49 = vld [vmem:[%s7683_s17 + $0xc90] sm:$0xff]  ;;  %v5395_v26 = vld [vmem:[%s7683_s17 + $0x19e8] sm:$0xff] }
 0x265   : > { %6643 = vmatpush1.bf16.msra.mxu1 %v6642_v51  ;;  %6253 = vmatprep.subr.bf16.mxu0 %v6252_v33  ;;  %v4972_v51 = vld [vmem:[%s7683_s17 + $0xcb0] sm:$0xff]  ;;  %v5366_v33 = vld [vmem:[%s7683_s17 + $0x1900] sm:$0xff] }
 0x266   : > { %3129 = vmatprep.mubr.f32.mxu1 %v7273_v61  ;;  %6645 = vmatprep.subr.bf16.mxu1 %v6644_v55  ;;  %v4981_v55 = vld [vmem:[%s7683_s17 + $0xcf8] sm:$0xff]  ;;  %v6362_v38 = vpack.c.bf16 %v4972_v51, %v4968_v49  ;;  %v6658_v7 = vpack.c.bf16 %v5370_v52, %v5366_v33  ;;  %v5399_v51 = vld [vmem:[%s7683_s17 + $0x1a08] sm:$0xff] }
 0x267   : > { %v6364_v8 = vpack.c.bf16 %v4981_v55, %v4977_v41  ;;  %v5005_v49 = vld [vmem:[%s7683_s17 + $0xdb8] sm:$0xff]  ;;  %v5403_v33 = vld [vmem:[%s7683_s17 + $0x1a28] sm:$0xff]  ;;  %v5000_v55 = vld [vmem:[%s7683_s17 + $0xd90] sm:$0xff] }
 0x268   : > { %6255 = vmatpush1.bf16.msra.mxu0 %v6254_v54  ;;  %3130 = vmatmul.mubr.f32.gmra.mrb[38].mxu1 %v8497_v18  ;;  %v5374_v54 = vld [vmem:[%s7683_s17 + $0x1940] sm:$0xff] }
 0x269   : > { %6647 = vmatpush1.bf16.msra.mxu1 %v6646_v58  ;;  %3555 = vmatprep.mubr.f32.mxu1 %v7902_v53  ;;  %v6660_v58 = vpack.c.bf16 %v5379_v57, %v5375_v56  ;;  %v6662_v17 = vpack.c.bf16 %v5378_v62, %v5374_v54  ;;  %v5004_v56 = vld [vmem:[%s7683_s17 + $0xdb0] sm:$0xff]  ;;  %v5398_v57 = vld [vmem:[%s7683_s17 + $0x1a00] sm:$0xff]  ;;  %v5411_v62 = vld [vmem:[%s7683_s17 + $0x1a68] sm:$0xff] }
 0x26a   : > { %6353 = vmatprep.subr.bf16.mxu0 %v6352_v14  ;;  %6649 = vmatprep.subr.bf16.mxu1 %v6648_v59  ;;  %v5387_v14 = vld [vmem:[%s7683_s17 + $0x19a8] sm:$0xff]  ;;  %v6366_v59 = vpack.c.bf16 %v4980_v11, %v4976_v10  ;;  %v5009_v10 = vld [vmem:[%s7683_s17 + $0xdd8] sm:$0xff]  ;;  %v6378_v13 = vpack.c.bf16 %v5004_v56, %v5000_v55  ;;  %v5422_v55 = vld [vmem:[%s7683_s17 + $0x1ac0] sm:$0xff] }
 0x26b   : > { %2224 = vmatmul.mubr.f32.vlgmr.msra.gmra.mrb[28].mxu0 %v7832_v23  ;;  %v6656_v23 = vpack.c.bf16 %v5371_v44, %v5367_v43  ;;  %v4996_v43 = vld [vmem:[%s7683_s17 + $0xd70] sm:$0xff]  ;;  %v5390_v44 = vld [vmem:[%s7683_s17 + $0x19c0] sm:$0xff]  ;;  %v5013_v11 = vld [vmem:[%s7683_s17 + $0xdf8] sm:$0xff] }
 0x26c   : > { %6355 = vmatpush1.bf16.msra.mxu0 %v6354_v9  ;;  %2229 = vmatprep.mubr.f32.mxu0 %v7273_v61 }
 0x26d   : > { %6651 = vmatpush1.bf16.msra.mxu1 %v6650_v25  ;;  %6357 = vmatprep.subr.bf16.mxu0 %v6356_v22  ;;  %v5386_v25 = vld [vmem:[%s7683_s17 + $0x19a0] sm:$0xff]  ;;  %v4993_v22 = vld [vmem:[%s7683_s17 + $0xd58] sm:$0xff] }
 0x26e   : > { %6653 = vmatprep.subr.bf16.mxu1 %v6652_v20  ;;  %v6370_v20 = vpack.c.bf16 %v4988_v1, %v4984_v2  ;;  %v6666_v16 = vpack.c.bf16 %v5386_v25, %v5382_v3  ;;  %v6372_v29 = vpack.c.bf16 %v4997_v19, %v4993_v22  ;;  %v5410_v1 = vld [vmem:[%s7683_s17 + $0x1a60] sm:$0xff]  ;;  %v5017_v3 = vld [vmem:[%s7683_s17 + $0xe18] sm:$0xff]  ;;  %v5415_v22 = vld [vmem:[%s7683_s17 + $0x1a88] sm:$0xff] }
 0x26f   : > { %2230 = vmatmul.mubr.f32.gmra.mrb[30].mxu0 %v7836_v32  ;;  %v5419_v19 = vld [vmem:[%s7683_s17 + $0x1aa8] sm:$0xff] }
 0x270   : > { %6359 = vmatpush1.bf16.msra.mxu0 %v6358_v45  ;;  %2669 = vmatprep.mubr.f32.mxu0 %v8022_v21  ;;  %v5383_v21 = vld [vmem:[%s7683_s17 + $0x1988] sm:$0xff]  ;;  %v6668_v45 = vpack.c.bf16 %v5395_v26, %v5391_v24 }
 0x271   : > { %6655 = vmatpush1.bf16.msra.mxu1 %v6654_v40  ;;  %6361 = vmatprep.subr.bf16.mxu0 %v6360_v47  ;;  %v6664_v9 = vpack.c.bf16 %v5387_v14, %v5383_v21  ;;  %v5394_v40 = vld [vmem:[%s7683_s17 + $0x19e0] sm:$0xff]  ;;  %v5001_v47 = vld [vmem:[%s7683_s17 + $0xd98] sm:$0xff]  ;;  %v6380_v21 = vpack.c.bf16 %v5013_v11, %v5009_v10  ;;  %v5008_v14 = vld [vmem:[%s7683_s17 + $0xdd0] sm:$0xff] }
 0x272   : > { %6657 = vmatprep.subr.bf16.mxu1 %v6656_v23  ;;  %v6374_v23 = vpack.c.bf16 %v4996_v43, %v4992_v27  ;;  %v6670_v52 = vpack.c.bf16 %v5394_v40, %v5390_v44  ;;  %v6376_v41 = vpack.c.bf16 %v5005_v49, %v5001_v47  ;;  %v5414_v27 = vld [vmem:[%s7683_s17 + $0x1a80] sm:$0xff]  ;;  %v6680_v43 = vpack.c.bf16 %v5419_v19, %v5415_v22  ;;  %v5029_v40 = vld [vmem:[%s7683_s17 + $0xe78] sm:$0xff]  ;;  %v5423_v47 = vld [vmem:[%s7683_s17 + $0x1ac8] sm:$0xff] }
 0x273   : > { %v5418_v44 = vld [vmem:[%s7683_s17 + $0x1aa0] sm:$0xff]  ;;  %v5427_v49 = vld [vmem:[%s7683_s17 + $0x1ae8] sm:$0xff] }
 0x274   : > { %6363 = vmatpush1.bf16.msra.mxu0 %v6362_v38  ;;  %v6684_v56 = vpack.c.bf16 %v5427_v49, %v5423_v47  ;;  %v5431_v10 = vld [vmem:[%s7683_s17 + $0x1b08] sm:$0xff] }
 0x275   : > { %6659 = vmatpush1.bf16.msra.mxu1 %v6658_v7  ;;  %6365 = vmatprep.subr.bf16.mxu0 %v6364_v8  ;;  %v6672_v7 = vpack.c.bf16 %v5403_v33, %v5399_v51  ;;  %v5402_v8 = vld [vmem:[%s7683_s17 + $0x1a20] sm:$0xff]  ;;  %v6682_v33 = vpack.c.bf16 %v5418_v44, %v5414_v27  ;;  %v5435_v11 = vld [vmem:[%s7683_s17 + $0x1b28] sm:$0xff]  ;;  %v5053_v44 = vld [vmem:[%s7683_s17 + $0xf38] sm:$0xff] }
 0x276   : > { %6661 = vmatprep.subr.bf16.mxu1 %v6660_v58  ;;  %v5407_v58 = vld [vmem:[%s7683_s17 + $0x1a48] sm:$0xff]  ;;  %v6674_v28 = vpack.c.bf16 %v5402_v8, %v5398_v57  ;;  %v5426_v57 = vld [vmem:[%s7683_s17 + $0x1ae0] sm:$0xff]  ;;  %v5037_v8 = vld [vmem:[%s7683_s17 + $0xeb8] sm:$0xff] }
 0x277   : > { %v6676_v2 = vpack.c.bf16 %v5411_v62, %v5407_v58  ;;  %v6686_v62 = vpack.c.bf16 %v5426_v57, %v5422_v55  ;;  %v5442_v27 = vld [vmem:[%s7683_s17 + $0x1b60] sm:$0xff]  ;;  %v5061_v57 = vld [vmem:[%s7683_s17 + $0xf78] sm:$0xff] }
 0x278   : > { %6367 = vmatpush1.bf16.msra.mxu0 %v6366_v59  ;;  %v5012_v59 = vld [vmem:[%s7683_s17 + $0xdf0] sm:$0xff]  ;;  %v5450_v55 = vld [vmem:[%s7683_s17 + $0x1ba0] sm:$0xff] }
 0x279   : > { %6663 = vmatpush1.bf16.msra.mxu1 %v6662_v17  ;;  %6369 = vmatprep.subr.bf16.mxu0 %v6368_v60  ;;  %v5406_v17 = vld [vmem:[%s7683_s17 + $0x1a40] sm:$0xff]  ;;  %v6382_v24 = vpack.c.bf16 %v5012_v59, %v5008_v14  ;;  %v6688_v59 = vpack.c.bf16 %v5435_v11, %v5431_v10 }
 0x27a   : > { %6665 = vmatprep.subr.bf16.mxu1 %v6664_v9  ;;  %v5021_v9 = vld [vmem:[%s7683_s17 + $0xe38] sm:$0xff]  ;;  %v6678_v26 = vpack.c.bf16 %v5410_v1, %v5406_v17  ;;  %v5430_v14 = vld [vmem:[%s7683_s17 + $0x1b00] sm:$0xff] }
 0x27b   : > { %v5434_v17 = vld [vmem:[%s7683_s17 + $0x1b20] sm:$0xff]  ;;  %v5045_v1 = vld [vmem:[%s7683_s17 + $0xef8] sm:$0xff] }
 0x27c   : > { %6371 = vmatpush1.bf16.msra.mxu0 %v6370_v20  ;;  %v6384_v20 = vpack.c.bf16 %v5021_v9, %v5017_v3  ;;  %v5439_v3 = vld [vmem:[%s7683_s17 + $0x1b48] sm:$0xff]  ;;  %v6690_v19 = vpack.c.bf16 %v5434_v17, %v5430_v14  ;;  %v5458_v14 = vld [vmem:[%s7683_s17 + $0x1be0] sm:$0xff]  ;;  %v5069_v17 = vld [vmem:[%s7683_s17 + $0xfb8] sm:$0xff] }
 0x27d   : > { %6667 = vmatpush1.bf16.msra.mxu1 %v6666_v16  ;;  %6373 = vmatprep.subr.bf16.mxu0 %v6372_v29  ;;  %v5016_v16 = vld [vmem:[%s7683_s17 + $0xe10] sm:$0xff]  ;;  %v5443_v9 = vld [vmem:[%s7683_s17 + $0x1b68] sm:$0xff] }
 0x27e   : > { %v8550_v38 = vpop.f32.mrb[24].mxu0  ;;  %6669 = vmatprep.subr.bf16.mxu1 %v6668_v45  ;;  %v5020_v29 = vld [vmem:[%s7683_s17 + $0xe30] sm:$0xff]  ;;  %v5025_v45 = vld [vmem:[%s7683_s17 + $0xe58] sm:$0xff] }
 0x27f   : > { %v8555_v54 = vpop.f32.mrb[25].mxu0  ;;  %v6386_v51 = vpack.c.bf16 %v5020_v29, %v5016_v16  ;;  %v5438_v16 = vld [vmem:[%s7683_s17 + $0x1b40] sm:$0xff]  ;;  %v6692_v29 = vpack.c.bf16 %v5443_v9, %v5439_v3 }
 0x280   : > { %6375 = vmatpush1.bf16.msra.mxu0 %v6374_v23  ;;  %v6388_v23 = vpack.c.bf16 %v5029_v40, %v5025_v45  ;;  %v5447_v45 = vld [vmem:[%s7683_s17 + $0x1b88] sm:$0xff]  ;;  %v6694_v49 = vpack.c.bf16 %v5442_v27, %v5438_v16  ;;  %v5466_v16 = vld [vmem:[%s7683_s17 + $0x1c20] sm:$0xff]  ;;  %v5077_v27 = vld [vmem:[%s7683_s17 + $0xff8] sm:$0xff] }
 0x281   : > { %6671 = vmatpush1.bf16.msra.mxu1 %v6670_v52  ;;  %6377 = vmatprep.subr.bf16.mxu0 %v6376_v41  ;;  %v5024_v52 = vld [vmem:[%s7683_s17 + $0xe50] sm:$0xff]  ;;  %v5451_v40 = vld [vmem:[%s7683_s17 + $0x1ba8] sm:$0xff] }
 0x282   : > { %v8562_v60 = vpop.f32.mrb[26].mxu0  ;;  %6673 = vmatprep.subr.bf16.mxu1 %v6672_v7  ;;  %v5028_v41 = vld [vmem:[%s7683_s17 + $0xe70] sm:$0xff]  ;;  %v5033_v7 = vld [vmem:[%s7683_s17 + $0xe98] sm:$0xff] }
 0x283   : > { %v8567_v25 = vpop.f32.mrb[27].mxu0  ;;  %v6390_v58 = vpack.c.bf16 %v5028_v41, %v5024_v52  ;;  %v5446_v52 = vld [vmem:[%s7683_s17 + $0x1b80] sm:$0xff]  ;;  %v6696_v41 = vpack.c.bf16 %v5451_v40, %v5447_v45 }
 0x284   : > { %6379 = vmatpush1.bf16.msra.mxu0 %v6378_v13  ;;  %v6392_v13 = vpack.c.bf16 %v5037_v8, %v5033_v7  ;;  %v5455_v7 = vld [vmem:[%s7683_s17 + $0x1bc8] sm:$0xff]  ;;  %v6698_v11 = vpack.c.bf16 %v5450_v55, %v5446_v52  ;;  %v5474_v52 = vld [vmem:[%s7683_s17 + $0x1c60] sm:$0xff]  ;;  %v5085_v55 = vld [vmem:[%s7683_s17 + $0x1038] sm:$0xff] }
 0x285   : > { %6675 = vmatpush1.bf16.msra.mxu1 %v6674_v28  ;;  %6381 = vmatprep.subr.bf16.mxu0 %v6380_v21  ;;  %v5032_v28 = vld [vmem:[%s7683_s17 + $0xe90] sm:$0xff]  ;;  %v5459_v8 = vld [vmem:[%s7683_s17 + $0x1be8] sm:$0xff] }
 0x286   : > { %6677 = vmatprep.subr.bf16.mxu1 %v6676_v2  ;;  %v5036_v21 = vld [vmem:[%s7683_s17 + $0xeb0] sm:$0xff]  ;;  %v5041_v2 = vld [vmem:[%s7683_s17 + $0xed8] sm:$0xff] }
 0x287   : > { %v6394_v22 = vpack.c.bf16 %v5036_v21, %v5032_v28  ;;  %v5454_v28 = vld [vmem:[%s7683_s17 + $0x1bc0] sm:$0xff]  ;;  %v6700_v21 = vpack.c.bf16 %v5459_v8, %v5455_v7 }
 0x288   : > { %6383 = vmatpush1.bf16.msra.mxu0 %v6382_v24  ;;  %v6396_v24 = vpack.c.bf16 %v5045_v1, %v5041_v2  ;;  %v5463_v2 = vld [vmem:[%s7683_s17 + $0x1c08] sm:$0xff]  ;;  %v6702_v9 = vpack.c.bf16 %v5458_v14, %v5454_v28  ;;  %v5482_v28 = vld [vmem:[%s7683_s17 + $0x1ca0] sm:$0xff]  ;;  %v5093_v14 = vld [vmem:[%s7683_s17 + $0x1078] sm:$0xff] }
 0x289   : > { %6679 = vmatpush1.bf16.msra.mxu1 %v6678_v26  ;;  %6385 = vmatprep.subr.bf16.mxu0 %v6384_v20  ;;  %v5040_v26 = vld [vmem:[%s7683_s17 + $0xed0] sm:$0xff]  ;;  %v5467_v1 = vld [vmem:[%s7683_s17 + $0x1c28] sm:$0xff] }
 0x28a   : > { %6681 = vmatprep.subr.bf16.mxu1 %v6680_v43  ;;  %v5044_v20 = vld [vmem:[%s7683_s17 + $0xef0] sm:$0xff]  ;;  %v5049_v43 = vld [vmem:[%s7683_s17 + $0xf18] sm:$0xff] }
 0x28b   : > { %v6398_v47 = vpack.c.bf16 %v5044_v20, %v5040_v26  ;;  %v6704_v26 = vpack.c.bf16 %v5467_v1, %v5463_v2  ;;  %v5462_v20 = vld [vmem:[%s7683_s17 + $0x1c00] sm:$0xff] }
 0x28c   : > { %6387 = vmatpush1.bf16.msra.mxu0 %v6386_v51  ;;  %v6400_v51 = vpack.c.bf16 %v5053_v44, %v5049_v43  ;;  %v5471_v43 = vld [vmem:[%s7683_s17 + $0x1c48] sm:$0xff]  ;;  %v6706_v40 = vpack.c.bf16 %v5466_v16, %v5462_v20  ;;  %v5097_v20 = vld [vmem:[%s7683_s17 + $0x1098] sm:$0xff] }
 0x28d   : > { %6683 = vmatpush1.bf16.msra.mxu1 %v6682_v33  ;;  %6389 = vmatprep.subr.bf16.mxu0 %v6388_v23  ;;  %v5048_v33 = vld [vmem:[%s7683_s17 + $0xf10] sm:$0xff]  ;;  %v5475_v44 = vld [vmem:[%s7683_s17 + $0x1c68] sm:$0xff]  ;;  %v5101_v16 = vld [vmem:[%s7683_s17 + $0x10b8] sm:$0xff] }
 0x28e   : > { %6685 = vmatprep.subr.bf16.mxu1 %v6684_v56  ;;  %v5052_v23 = vld [vmem:[%s7683_s17 + $0xf30] sm:$0xff]  ;;  %v5057_v56 = vld [vmem:[%s7683_s17 + $0xf58] sm:$0xff] }
 0x28f   : > { %v6402_v10 = vpack.c.bf16 %v5052_v23, %v5048_v33  ;;  %v6708_v23 = vpack.c.bf16 %v5475_v44, %v5471_v43 }
 0x290   : > { %6391 = vmatpush1.bf16.msra.mxu0 %v6390_v58  ;;  %v6404_v58 = vpack.c.bf16 %v5061_v57, %v5057_v56  ;;  %v5479_v56 = vld [vmem:[%s7683_s17 + $0x1c88] sm:$0xff] }
 0x291   : > { %6687 = vmatpush1.bf16.msra.mxu1 %v6686_v62  ;;  %6393 = vmatprep.subr.bf16.mxu0 %v6392_v13  ;;  %v5056_v62 = vld [vmem:[%s7683_s17 + $0xf50] sm:$0xff]  ;;  %v5483_v57 = vld [vmem:[%s7683_s17 + $0x1ca8] sm:$0xff] }
 0x292   : > { %6689 = vmatprep.subr.bf16.mxu1 %v6688_v59  ;;  %v5060_v13 = vld [vmem:[%s7683_s17 + $0xf70] sm:$0xff]  ;;  %v5065_v59 = vld [vmem:[%s7683_s17 + $0xf98] sm:$0xff] }
 0x293   : > { %v6406_v3 = vpack.c.bf16 %v5060_v13, %v5056_v62  ;;  %v5478_v62 = vld [vmem:[%s7683_s17 + $0x1c80] sm:$0xff]  ;;  %v6712_v13 = vpack.c.bf16 %v5483_v57, %v5479_v56  ;;  %v5104_v57 = vld [vmem:[%s7683_s17 + $0x10d0] sm:$0xff] }
 0x294   : > { %6395 = vmatpush1.bf16.msra.mxu0 %v6394_v22  ;;  %v6408_v22 = vpack.c.bf16 %v5069_v17, %v5065_v59  ;;  %v5487_v59 = vld [vmem:[%s7683_s17 + $0x1cc8] sm:$0xff]  ;;  %v6714_v1 = vpack.c.bf16 %v5482_v28, %v5478_v62 }
 0x295   : > { %6691 = vmatpush1.bf16.msra.mxu1 %v6690_v19  ;;  %6397 = vmatprep.subr.bf16.mxu0 %v6396_v24  ;;  %v5064_v19 = vld [vmem:[%s7683_s17 + $0xf90] sm:$0xff]  ;;  %v5491_v17 = vld [vmem:[%s7683_s17 + $0x1ce8] sm:$0xff] }
 0x296   : > { %6693 = vmatprep.subr.bf16.mxu1 %v6692_v29  ;;  %v5068_v24 = vld [vmem:[%s7683_s17 + $0xfb0] sm:$0xff]  ;;  %v5073_v29 = vld [vmem:[%s7683_s17 + $0xfd8] sm:$0xff]  ;;  %v5511_v62 = vld [vmem:[%s7683_s17 + $0x1d88] sm:$0xff] }
 0x297   : > { %v6410_v45 = vpack.c.bf16 %v5068_v24, %v5064_v19  ;;  %v6412_v33 = vpack.c.bf16 %v5077_v27, %v5073_v29  ;;  %v5486_v19 = vld [vmem:[%s7683_s17 + $0x1cc0] sm:$0xff]  ;;  %v6716_v24 = vpack.c.bf16 %v5491_v17, %v5487_v59  ;;  %v5495_v29 = vld [vmem:[%s7683_s17 + $0x1d08] sm:$0xff]  ;;  %v5112_v59 = vld [vmem:[%s7683_s17 + $0x1110] sm:$0xff] }
 0x298   : > { %6399 = vmatpush1.bf16.msra.mxu0 %v6398_v47  ;;  %v5072_v47 = vld [vmem:[%s7683_s17 + $0xfd0] sm:$0xff]  ;;  %v5499_v27 = vld [vmem:[%s7683_s17 + $0x1d28] sm:$0xff] }
 0x299   : > { %6695 = vmatpush1.bf16.msra.mxu1 %v6694_v49  ;;  %6401 = vmatprep.subr.bf16.mxu0 %v6400_v51  ;;  %v5076_v49 = vld [vmem:[%s7683_s17 + $0xff0] sm:$0xff]  ;;  %v5470_v51 = vld [vmem:[%s7683_s17 + $0x1c40] sm:$0xff] }
 0x29a   : > { %6697 = vmatprep.subr.bf16.mxu1 %v6696_v41  ;;  %v5081_v41 = vld [vmem:[%s7683_s17 + $0x1018] sm:$0xff]  ;;  %v6414_v7 = vpack.c.bf16 %v5076_v49, %v5072_v47  ;;  %v6710_v8 = vpack.c.bf16 %v5474_v52, %v5470_v51  ;;  %v5100_v47 = vld [vmem:[%s7683_s17 + $0x10b0] sm:$0xff]  ;;  %v5494_v49 = vld [vmem:[%s7683_s17 + $0x1d00] sm:$0xff] }
 0x29b   : > { %v5498_v51 = vld [vmem:[%s7683_s17 + $0x1d20] sm:$0xff]  ;;  %v5507_v52 = vld [vmem:[%s7683_s17 + $0x1d68] sm:$0xff]  ;;  %v5116_v17 = vld [vmem:[%s7683_s17 + $0x1130] sm:$0xff] }
 0x29c   : > { %6403 = vmatpush1.bf16.msra.mxu0 %v6402_v10  ;;  %v6416_v10 = vpack.c.bf16 %v5085_v55, %v5081_v41  ;;  %v6722_v55 = vpack.c.bf16 %v5498_v51, %v5494_v49 }
 0x29d   : > { %6699 = vmatpush1.bf16.msra.mxu1 %v6698_v11  ;;  %6405 = vmatprep.subr.bf16.mxu0 %v6404_v58  ;;  %v5080_v11 = vld [vmem:[%s7683_s17 + $0x1010] sm:$0xff] }
 0x29e   : > { %6701 = vmatprep.subr.bf16.mxu1 %v6700_v21  ;;  %v5084_v58 = vld [vmem:[%s7683_s17 + $0x1030] sm:$0xff]  ;;  %v5089_v21 = vld [vmem:[%s7683_s17 + $0x1058] sm:$0xff] }
 0x29f   : > { %v6418_v2 = vpack.c.bf16 %v5084_v58, %v5080_v11  ;;  %v5113_v11 = vld [vmem:[%s7683_s17 + $0x1118] sm:$0xff] }
 0x2a0   : > { %6407 = vmatpush1.bf16.msra.mxu0 %v6406_v3  ;;  %v6420_v3 = vpack.c.bf16 %v5093_v14, %v5089_v21  ;;  %v5117_v58 = vld [vmem:[%s7683_s17 + $0x1138] sm:$0xff] }
 0x2a1   : > { %6703 = vmatpush1.bf16.msra.mxu1 %v6702_v9  ;;  %6409 = vmatprep.subr.bf16.mxu0 %v6408_v22  ;;  %v5088_v9 = vld [vmem:[%s7683_s17 + $0x1050] sm:$0xff]  ;;  %v6432_v14 = vpack.c.bf16 %v5117_v58, %v5113_v11 }
 0x2a2   : > { %6705 = vmatprep.subr.bf16.mxu1 %v6704_v26  ;;  %v5092_v22 = vld [vmem:[%s7683_s17 + $0x1070] sm:$0xff]  ;;  %v5490_v26 = vld [vmem:[%s7683_s17 + $0x1ce0] sm:$0xff] }
 0x2a3   : > { %v6422_v43 = vpack.c.bf16 %v5092_v22, %v5088_v9  ;;  %v6718_v44 = vpack.c.bf16 %v5490_v26, %v5486_v19  ;;  %v5121_v9 = vld [vmem:[%s7683_s17 + $0x1158] sm:$0xff]  ;;  %v5519_v19 = vld [vmem:[%s7683_s17 + $0x1dc8] sm:$0xff]  ;;  %v6434_v26 = vpack.c.bf16 %v5116_v17, %v5112_v59  ;;  %v5144_v11 = vld [vmem:[%s7683_s17 + $0x1210] sm:$0xff] }
 0x2a4   : > { %6411 = vmatpush1.bf16.msra.mxu0 %v6410_v45  ;;  %3556 = vmatmul.mubr.f32.vlgmr.msra.gmra.mrb[36].mxu1 %v7896_v48  ;;  %v6424_v45 = vpack.c.bf16 %v5101_v16, %v5097_v20  ;;  %v5125_v22 = vld [vmem:[%s7683_s17 + $0x1178] sm:$0xff]  ;;  %v5148_v58 = vld [vmem:[%s7683_s17 + $0x1230] sm:$0xff] }
 0x2a5   : > { %3561 = vmatprep.mubr.f32.mxu1 %v7926_v15  ;;  %6707 = vmatpush1.bf16.msra.mxu1 %v6706_v40  ;;  %v5096_v40 = vld [vmem:[%s7683_s17 + $0x1090] sm:$0xff]  ;;  %v6436_v16 = vpack.c.bf16 %v5125_v22, %v5121_v9  ;;  %v5161_v17 = vld [vmem:[%s7683_s17 + $0x1298] sm:$0xff] }
 0x2a6   : > { %6413 = vmatprep.subr.bf16.mxu0 %v6412_v33  ;;  %6709 = vmatprep.subr.bf16.mxu1 %v6708_v23  ;;  %v5105_v33 = vld [vmem:[%s7683_s17 + $0x10d8] sm:$0xff]  ;;  %v6426_v41 = vpack.c.bf16 %v5100_v47, %v5096_v40  ;;  %v5156_v59 = vld [vmem:[%s7683_s17 + $0x1270] sm:$0xff] }
 0x2a7   : > { %v5109_v23 = vld [vmem:[%s7683_s17 + $0x10f8] sm:$0xff]  ;;  %v5160_v9 = vld [vmem:[%s7683_s17 + $0x1290] sm:$0xff] }
 0x2a8   : > { %6415 = vmatpush1.bf16.msra.mxu0 %v6414_v7  ;;  %3562 = vmatmul.mubr.f32.gmra.mrb[38].mxu1 %v7919_v12  ;;  %v6428_v56 = vpack.c.bf16 %v5109_v23, %v5105_v33  ;;  %v5108_v7 = vld [vmem:[%s7683_s17 + $0x10f0] sm:$0xff]  ;;  %v5129_v40 = vld [vmem:[%s7683_s17 + $0x1198] sm:$0xff] }
 0x2a9   : > { %6711 = vmatpush1.bf16.msra.mxu1 %v6710_v8  ;;  %6417 = vmatprep.subr.bf16.mxu0 %v6416_v10  ;;  %v5502_v8 = vld [vmem:[%s7683_s17 + $0x1d40] sm:$0xff]  ;;  %v6430_v28 = vpack.c.bf16 %v5108_v7, %v5104_v57  ;;  %v5133_v47 = vld [vmem:[%s7683_s17 + $0x11b8] sm:$0xff]  ;;  %v5128_v33 = vld [vmem:[%s7683_s17 + $0x1190] sm:$0xff] }
 0x2aa   : > { %6713 = vmatprep.subr.bf16.mxu1 %v6712_v13  ;;  %3632 = vmatprep.mubr.f32.mxu1 %v7273_v61  ;;  %v5506_v10 = vld [vmem:[%s7683_s17 + $0x1d60] sm:$0xff]  ;;  %v5515_v13 = vld [vmem:[%s7683_s17 + $0x1da8] sm:$0xff]  ;;  %v6440_v51 = vpack.c.bf16 %v5133_v47, %v5129_v40  ;;  %v5132_v23 = vld [vmem:[%s7683_s17 + $0x11b0] sm:$0xff] }
 0x2ab   : > { %2670 = vmatmul.mubr.f32.vlgmr.msra.gmra.mrb[28].mxu0 %v8158_v42  ;;  %v6720_v42 = vpack.c.bf16 %v5499_v27, %v5495_v29  ;;  %v6726_v21 = vpack.c.bf16 %v5506_v10, %v5502_v8  ;;  %v5120_v29 = vld [vmem:[%s7683_s17 + $0x1150] sm:$0xff]  ;;  %v5145_v7 = vld [vmem:[%s7683_s17 + $0x1218] sm:$0xff] }
 0x2ac   : > { %2675 = vmatprep.mubr.f32.mxu0 %v8167_v50  ;;  %6419 = vmatpush1.bf16.msra.mxu0 %v6418_v2  ;;  %v5503_v50 = vld [vmem:[%s7683_s17 + $0x1d48] sm:$0xff]  ;;  %v5510_v2 = vld [vmem:[%s7683_s17 + $0x1d80] sm:$0xff]  ;;  %v5124_v27 = vld [vmem:[%s7683_s17 + $0x1170] sm:$0xff] }
 0x2ad   : > { %6715 = vmatpush1.bf16.msra.mxu1 %v6714_v1  ;;  %6421 = vmatprep.subr.bf16.mxu0 %v6420_v3  ;;  %v6728_v1 = vpack.c.bf16 %v5515_v13, %v5511_v62  ;;  %v5514_v3 = vld [vmem:[%s7683_s17 + $0x1da0] sm:$0xff]  ;;  %v6438_v49 = vpack.c.bf16 %v5124_v27, %v5120_v29  ;;  %v5140_v57 = vld [vmem:[%s7683_s17 + $0x11f0] sm:$0xff]  ;;  %v5149_v8 = vld [vmem:[%s7683_s17 + $0x1238] sm:$0xff] }
 0x2ae   : > { %6717 = vmatprep.subr.bf16.mxu1 %v6716_v24  ;;  %v5523_v24 = vld [vmem:[%s7683_s17 + $0x1de8] sm:$0xff]  ;;  %v6730_v20 = vpack.c.bf16 %v5514_v3, %v5510_v2  ;;  %v6544_v10 = vpack.c.bf16 %v5149_v8, %v5145_v7  ;;  %v5153_v62 = vld [vmem:[%s7683_s17 + $0x1258] sm:$0xff]  ;;  %v5164_v22 = vld [vmem:[%s7683_s17 + $0x12b0] sm:$0xff] }
 0x2af   : > { %2676 = vmatmul.mubr.f32.gmra.mrb[30].mxu0 %v8177_v6  ;;  %v6724_v6 = vpack.c.bf16 %v5507_v52, %v5503_v50  ;;  %v5137_v50 = vld [vmem:[%s7683_s17 + $0x11d8] sm:$0xff] }
 0x2b0   : > { %6423 = vmatpush1.bf16.msra.mxu0 %v6422_v43  ;;  %2746 = vmatprep.mubr.f32.mxu0 %v7273_v61  ;;  %v5518_v43 = vld [vmem:[%s7683_s17 + $0x1dc0] sm:$0xff]  ;;  %v5141_v52 = vld [vmem:[%s7683_s17 + $0x11f8] sm:$0xff] }
 0x2b1   : > { %6719 = vmatpush1.bf16.msra.mxu1 %v6718_v44  ;;  %6425 = vmatprep.subr.bf16.mxu0 %v6424_v45  ;;  %v6732_v44 = vpack.c.bf16 %v5523_v24, %v5519_v19  ;;  %v5522_v45 = vld [vmem:[%s7683_s17 + $0x1de0] sm:$0xff]  ;;  %v5157_v13 = vld [vmem:[%s7683_s17 + $0x1278] sm:$0xff] }
 0x2b2   : > { %6721 = vmatprep.subr.bf16.mxu1 %v6720_v42  ;;  %v6734_v42 = vpack.c.bf16 %v5522_v45, %v5518_v43  ;;  %v5165_v2 = vld [vmem:[%s7683_s17 + $0x12b8] sm:$0xff]  ;;  %v5180_v45 = vld [vmem:[%s7683_s17 + $0x1330] sm:$0xff] }
 0x2b3   : > { %v6552_v3 = vpack.c.bf16 %v5165_v2, %v5161_v17  ;;  %v5169_v19 = vld [vmem:[%s7683_s17 + $0x12d8] sm:$0xff] }
 0x2b4   : > { %6427 = vmatpush1.bf16.msra.mxu0 %v6426_v41  ;;  %v6442_v41 = vpack.c.bf16 %v5132_v23, %v5128_v33  ;;  %v5173_v24 = vld [vmem:[%s7683_s17 + $0x12f8] sm:$0xff] }
 0x2b5   : > { %6723 = vmatpush1.bf16.msra.mxu1 %v6722_v55  ;;  %6429 = vmatprep.subr.bf16.mxu0 %v6428_v56  ;;  %v6444_v55 = vpack.c.bf16 %v5141_v52, %v5137_v50  ;;  %v5136_v56 = vld [vmem:[%s7683_s17 + $0x11d0] sm:$0xff]  ;;  %v5177_v29 = vld [vmem:[%s7683_s17 + $0x1318] sm:$0xff] }
 0x2b6   : > { %6725 = vmatprep.subr.bf16.mxu1 %v6724_v6  ;;  %v6446_v6 = vpack.c.bf16 %v5140_v57, %v5136_v56  ;;  %v5181_v27 = vld [vmem:[%s7683_s17 + $0x1338] sm:$0xff] }
 0x2b7   : > { %v5189_v40 = vld [vmem:[%s7683_s17 + $0x1378] sm:$0xff] }
 0x2b8   : > { %6431 = vmatpush1.bf16.msra.mxu0 %v6430_v28  ;;  %v6546_v28 = vpack.c.bf16 %v5148_v58, %v5144_v11  ;;  %v5193_v33 = vld [vmem:[%s7683_s17 + $0x1398] sm:$0xff] }
 0x2b9   : > { %6727 = vmatpush1.bf16.msra.mxu1 %v6726_v21  ;;  %6433 = vmatprep.subr.bf16.mxu0 %v6432_v14  ;;  %v6548_v21 = vpack.c.bf16 %v5157_v13, %v5153_v62  ;;  %v5152_v14 = vld [vmem:[%s7683_s17 + $0x1250] sm:$0xff]  ;;  %v5197_v23 = vld [vmem:[%s7683_s17 + $0x13b8] sm:$0xff] }
 0x2ba   : > { %6729 = vmatprep.subr.bf16.mxu1 %v6728_v1  ;;  %v6550_v1 = vpack.c.bf16 %v5156_v59, %v5152_v14  ;;  %v6568_v52 = vpack.c.bf16 %v5197_v23, %v5193_v33  ;;  %v5201_v56 = vld [vmem:[%s7683_s17 + $0x13d8] sm:$0xff] }
 0x2bb   : > { %v5205_v57 = vld [vmem:[%s7683_s17 + $0x13f8] sm:$0xff] }
 0x2bc   : > { %6435 = vmatpush1.bf16.msra.mxu0 %v6434_v26  ;;  %v6556_v26 = vpack.c.bf16 %v5173_v24, %v5169_v19  ;;  %v6572_v8 = vpack.c.bf16 %v5205_v57, %v5201_v56  ;;  %v5209_v11 = vld [vmem:[%s7683_s17 + $0x1418] sm:$0xff] }
 0x2bd   : > { %6731 = vmatpush1.bf16.msra.mxu1 %v6730_v20  ;;  %6437 = vmatprep.subr.bf16.mxu0 %v6436_v16  ;;  %v5168_v20 = vld [vmem:[%s7683_s17 + $0x12d0] sm:$0xff]  ;;  %v5213_v58 = vld [vmem:[%s7683_s17 + $0x1438] sm:$0xff] }
 0x2be   : > { %6733 = vmatprep.subr.bf16.mxu1 %v6732_v44  ;;  %v5172_v16 = vld [vmem:[%s7683_s17 + $0x12f0] sm:$0xff]  ;;  %v6576_v13 = vpack.c.bf16 %v5213_v58, %v5209_v11  ;;  %v5217_v14 = vld [vmem:[%s7683_s17 + $0x1458] sm:$0xff] }
 0x2bf   : > { %v6558_v43 = vpack.c.bf16 %v5172_v16, %v5168_v20  ;;  %v5176_v44 = vld [vmem:[%s7683_s17 + $0x1310] sm:$0xff]  ;;  %v5221_v59 = vld [vmem:[%s7683_s17 + $0x1478] sm:$0xff] }
 0x2c0   : > { %6439 = vmatpush1.bf16.msra.mxu0 %v6438_v49  ;;  %v6562_v47 = vpack.c.bf16 %v5180_v45, %v5176_v44  ;;  %v6580_v2 = vpack.c.bf16 %v5221_v59, %v5217_v14  ;;  %v5233_v20 = vld [vmem:[%s7683_s17 + $0x14d8] sm:$0xff] }
 0x2c1   : > { %6735 = vmatpush1.bf16.msra.mxu1 %v6734_v42  ;;  %6441 = vmatprep.subr.bf16.mxu0 %v6440_v51  ;;  %v5184_v42 = vld [vmem:[%s7683_s17 + $0x1350] sm:$0xff]  ;;  %v5237_v16 = vld [vmem:[%s7683_s17 + $0x14f8] sm:$0xff] }
 0x2c2   : > { %v5188_v51 = vld [vmem:[%s7683_s17 + $0x1370] sm:$0xff]  ;;  %v5241_v44 = vld [vmem:[%s7683_s17 + $0x1518] sm:$0xff] }
 0x2c3   : > { %v6566_v50 = vpack.c.bf16 %v5188_v51, %v5184_v42  ;;  %v5245_v45 = vld [vmem:[%s7683_s17 + $0x1538] sm:$0xff] }
 0x2c4   : > { %6443 = vmatpush1.bf16.msra.mxu0 %v6442_v41  ;;  %3633 = vmatmul.mubr.f32.vlgmr.msra.gmra.mrb[36].mxu1 %v7836_v32  ;;  %v5192_v41 = vld [vmem:[%s7683_s17 + $0x1390] sm:$0xff]  ;;  %v5249_v42 = vld [vmem:[%s7683_s17 + $0x1558] sm:$0xff] }
 0x2c5   : > { %6445 = vmatprep.subr.bf16.mxu0 %v6444_v55  ;;  %3638 = vmatprep.mubr.f32.mxu1 %v7273_v61  ;;  %v5196_v55 = vld [vmem:[%s7683_s17 + $0x13b0] sm:$0xff]  ;;  %v5253_v51 = vld [vmem:[%s7683_s17 + $0x1578] sm:$0xff] }
 0x2c6   : > { %v6570_v7 = vpack.c.bf16 %v5196_v55, %v5192_v41  ;;  %v6596_v23 = vpack.c.bf16 %v5253_v51, %v5249_v42  ;;  %v5257_v41 = vld [vmem:[%s7683_s17 + $0x1598] sm:$0xff]  ;;  %v5308_v42 = vld [vmem:[%s7683_s17 + $0x1730] sm:$0xff] }
 0x2c7   : > { %v5261_v55 = vld [vmem:[%s7683_s17 + $0x15b8] sm:$0xff] }
 0x2c8   : > { %6447 = vmatpush1.bf16.msra.mxu0 %v6446_v6  ;;  %3639 = vmatmul.mubr.f32.gmra.mrb[38].mxu1 %v7834_v30  ;;  %v5200_v6 = vld [vmem:[%s7683_s17 + $0x13d0] sm:$0xff]  ;;  %v6600_v57 = vpack.c.bf16 %v5261_v55, %v5257_v41  ;;  %v5313_v51 = vld [vmem:[%s7683_s17 + $0x1758] sm:$0xff] }
 0x2c9   : > { %6545 = vmatprep.subr.bf16.mxu0 %v6544_v10  ;;  %v5204_v10 = vld [vmem:[%s7683_s17 + $0x13f0] sm:$0xff]  ;;  %v5321_v55 = vld [vmem:[%s7683_s17 + $0x1798] sm:$0xff] }
 0x2ca   : > { %v6574_v62 = vpack.c.bf16 %v5204_v10, %v5200_v6  ;;  %v5265_v6 = vld [vmem:[%s7683_s17 + $0x15d8] sm:$0xff]  ;;  %v5316_v41 = vld [vmem:[%s7683_s17 + $0x1770] sm:$0xff] }
 0x2cb   : > { %2747 = vmatmul.mubr.f32.vlgmr.msra.gmra.mrb[28].mxu0 %v8243_v39  ;;  %v6554_v39 = vpack.c.bf16 %v5164_v22, %v5160_v9  ;;  %v5225_v9 = vld [vmem:[%s7683_s17 + $0x1498] sm:$0xff] }
 0x2cc   : > { %6547 = vmatpush1.bf16.msra.mxu0 %v6546_v28  ;;  %2752 = vmatprep.mubr.f32.mxu0 %v7273_v61  ;;  %v5208_v28 = vld [vmem:[%s7683_s17 + $0x1410] sm:$0xff]  ;;  %v5229_v22 = vld [vmem:[%s7683_s17 + $0x14b8] sm:$0xff] }
 0x2cd   : > { %6549 = vmatprep.subr.bf16.mxu0 %v6548_v21  ;;  %v5212_v21 = vld [vmem:[%s7683_s17 + $0x1430] sm:$0xff]  ;;  %v6584_v24 = vpack.c.bf16 %v5229_v22, %v5225_v9  ;;  %v5269_v10 = vld [vmem:[%s7683_s17 + $0x15f8] sm:$0xff] }
 0x2ce   : > { %v6578_v17 = vpack.c.bf16 %v5212_v21, %v5208_v28  ;;  %v6604_v58 = vpack.c.bf16 %v5269_v10, %v5265_v6  ;;  %v5273_v28 = vld [vmem:[%s7683_s17 + $0x1618] sm:$0xff]  ;;  %v5324_v6 = vld [vmem:[%s7683_s17 + $0x17b0] sm:$0xff] }
 0x2cf   : > { %2753 = vmatmul.mubr.f32.gmra.mrb[30].mxu0 %v8260_v0  ;;  %v6560_v0 = vpack.c.bf16 %v5181_v27, %v5177_v29  ;;  %v6588_v27 = vpack.c.bf16 %v5237_v16, %v5233_v20  ;;  %v5277_v21 = vld [vmem:[%s7683_s17 + $0x1638] sm:$0xff] }
 0x2d0   : > { %6551 = vmatpush1.bf16.msra.mxu0 %v6550_v1  ;;  %3200 = vmatprep.mubr.f32.mxu0 %v8268_v5  ;;  %v5185_v5 = vld [vmem:[%s7683_s17 + $0x1358] sm:$0xff]  ;;  %v5216_v1 = vld [vmem:[%s7683_s17 + $0x1450] sm:$0xff]  ;;  %v6608_v59 = vpack.c.bf16 %v5277_v21, %v5273_v28  ;;  %v3937_v21 = vld [vmem:[%s8800_s24] sm:$0xff] }
 0x2d1   : > { %6553 = vmatprep.subr.bf16.mxu0 %v6552_v3  ;;  %v6564_v49 = vpack.c.bf16 %v5189_v40, %v5185_v5  ;;  %v5220_v3 = vld [vmem:[%s7683_s17 + $0x1470] sm:$0xff]  ;;  %v6592_v40 = vpack.c.bf16 %v5245_v45, %v5241_v44  ;;  %v5329_v10 = vld [vmem:[%s7683_s17 + $0x17d8] sm:$0xff] }
 0x2d2   : > { %v6582_v19 = vpack.c.bf16 %v5220_v3, %v5216_v1  ;;  %v5281_v1 = vld [vmem:[%s7683_s17 + $0x1658] sm:$0xff]  ;;  %v5296_v44 = vld [vmem:[%s7683_s17 + $0x16d0] sm:$0xff] }
 0x2d3   : > { %v5285_v3 = vld [vmem:[%s7683_s17 + $0x1678] sm:$0xff]  ;;  %v5300_v45 = vld [vmem:[%s7683_s17 + $0x16f0] sm:$0xff] }
 0x2d4   : > { %6555 = vmatpush1.bf16.msra.mxu0 %v6554_v39  ;;  %v5224_v39 = vld [vmem:[%s7683_s17 + $0x1490] sm:$0xff]  ;;  %v6612_v22 = vpack.c.bf16 %v5285_v3, %v5281_v1  ;;  %v3940_v28 = vld [vmem:[%s8800_s24 + $0x18] sm:$0xff] }
 0x2d5   : > { %6557 = vmatprep.subr.bf16.mxu0 %v6556_v26  ;;  %v5228_v26 = vld [vmem:[%s7683_s17 + $0x14b0] sm:$0xff]  ;;  %v3944_v1 = vld [vmem:[%s8800_s24 + $0x38] sm:$0xff] }
 0x2d6   : > { %v6586_v29 = vpack.c.bf16 %v5228_v26, %v5224_v39  ;;  %v5289_v39 = vld [vmem:[%s7683_s17 + $0x1698] sm:$0xff] }
 0x2d7   : > { %v5293_v26 = vld [vmem:[%s7683_s17 + $0x16b8] sm:$0xff] }
 0x2d8   : > { %6559 = vmatpush1.bf16.msra.mxu0 %v6558_v43  ;;  %v5232_v43 = vld [vmem:[%s7683_s17 + $0x14d0] sm:$0xff]  ;;  %v6616_v16 = vpack.c.bf16 %v5293_v26, %v5289_v39  ;;  %v3946_v39 = vld [vmem:[%s8800_s24 + $0x48] sm:$0xff]  ;;  %v5337_v26 = vld [vmem:[%s7683_s17 + $0x1818] sm:$0xff] }
 0x2d9   : > { %6561 = vmatprep.subr.bf16.mxu0 %v6560_v0  ;;  %v5236_v0 = vld [vmem:[%s7683_s17 + $0x14f0] sm:$0xff] }
 0x2da   : > { %v6590_v5 = vpack.c.bf16 %v5236_v0, %v5232_v43  ;;  %v5297_v43 = vld [vmem:[%s7683_s17 + $0x16d8] sm:$0xff] }
 0x2db   : > { %v5301_v0 = vld [vmem:[%s7683_s17 + $0x16f8] sm:$0xff] }
 0x2dc   : > { %6563 = vmatpush1.bf16.msra.mxu0 %v6562_v47  ;;  %v5240_v47 = vld [vmem:[%s7683_s17 + $0x1510] sm:$0xff] }
 0x2dd   : > { %6565 = vmatprep.subr.bf16.mxu0 %v6564_v49  ;;  %v5244_v49 = vld [vmem:[%s7683_s17 + $0x1530] sm:$0xff] }
 0x2de   : > { %v6594_v33 = vpack.c.bf16 %v5244_v49, %v5240_v47  ;;  %v6622_v47 = vpack.c.bf16 %v5300_v45, %v5296_v44  ;;  %v5304_v49 = vld [vmem:[%s7683_s17 + $0x1710] sm:$0xff] }
 0x2df   : > { %v5336_v44 = vld [vmem:[%s7683_s17 + $0x1810] sm:$0xff] }
 0x2e0   : > { %6567 = vmatpush1.bf16.msra.mxu0 %v6566_v50  ;;  %v5248_v50 = vld [vmem:[%s7683_s17 + $0x1550] sm:$0xff] }
 0x2e1   : > { %6569 = vmatprep.subr.bf16.mxu0 %v6568_v52  ;;  %v5252_v52 = vld [vmem:[%s7683_s17 + $0x1570] sm:$0xff] }
 0x2e2   : > { %v6598_v56 = vpack.c.bf16 %v5252_v52, %v5248_v50  ;;  %v5312_v52 = vld [vmem:[%s7683_s17 + $0x1750] sm:$0xff] }
 0x2e3   : > { %v5340_v45 = vld [vmem:[%s7683_s17 + $0x1830] sm:$0xff] }
 0x2e4   : > { %6571 = vmatpush1.bf16.msra.mxu0 %v6570_v7  ;;  %v5256_v7 = vld [vmem:[%s7683_s17 + $0x1590] sm:$0xff] }
 0x2e5   : > { %6573 = vmatprep.subr.bf16.mxu0 %v6572_v8  ;;  %v5260_v8 = vld [vmem:[%s7683_s17 + $0x15b0] sm:$0xff] }
 0x2e6   : > { %v6602_v11 = vpack.c.bf16 %v5260_v8, %v5256_v7  ;;  %v5320_v8 = vld [vmem:[%s7683_s17 + $0x1790] sm:$0xff] }
 0x2e8   : > { %6575 = vmatpush1.bf16.msra.mxu0 %v6574_v62  ;;  %v5264_v62 = vld [vmem:[%s7683_s17 + $0x15d0] sm:$0xff] }
 0x2e9   : > { %6577 = vmatprep.subr.bf16.mxu0 %v6576_v13  ;;  %v5268_v13 = vld [vmem:[%s7683_s17 + $0x15f0] sm:$0xff] }
 0x2ea   : > { %v6606_v14 = vpack.c.bf16 %v5268_v13, %v5264_v62  ;;  %v5332_v62 = vld [vmem:[%s7683_s17 + $0x17f0] sm:$0xff]  ;;  %v3938_v13 = vld [vmem:[%s8800_s24 + $0x8] sm:$0xff] }
 0x2ec   : > { %6579 = vmatpush1.bf16.msra.mxu0 %v6578_v17  ;;  %v5272_v17 = vld [vmem:[%s7683_s17 + $0x1610] sm:$0xff] }
 0x2ed   : > { %6581 = vmatprep.subr.bf16.mxu0 %v6580_v2  ;;  %v5276_v2 = vld [vmem:[%s7683_s17 + $0x1630] sm:$0xff] }
 0x2ee   : > { %v6610_v9 = vpack.c.bf16 %v5276_v2, %v5272_v17  ;;  %v3939_v17 = vld [vmem:[%s8800_s24 + $0x10] sm:$0xff]  ;;  %v3942_v2 = vld [vmem:[%s8800_s24 + $0x28] sm:$0xff] }
 0x2f0   : > { %6583 = vmatpush1.bf16.msra.mxu0 %v6582_v19  ;;  %v5280_v19 = vld [vmem:[%s7683_s17 + $0x1650] sm:$0xff] }
 0x2f1   : > { %6585 = vmatprep.subr.bf16.mxu0 %v6584_v24  ;;  %v5284_v24 = vld [vmem:[%s7683_s17 + $0x1670] sm:$0xff] }
 0x2f2   : > { %v6614_v20 = vpack.c.bf16 %v5284_v24, %v5280_v19  ;;  %v3941_v19 = vld [vmem:[%s8800_s24 + $0x20] sm:$0xff]  ;;  %v3943_v24 = vld [vmem:[%s8800_s24 + $0x30] sm:$0xff] }
 0x2f4   : > { %6587 = vmatpush1.bf16.msra.mxu0 %v6586_v29  ;;  %v5288_v29 = vld [vmem:[%s7683_s17 + $0x1690] sm:$0xff] }
 0x2f5   : > { %6589 = vmatprep.subr.bf16.mxu0 %v6588_v27  ;;  %v5292_v27 = vld [vmem:[%s7683_s17 + $0x16b0] sm:$0xff] }
 0x2f8   : > { %6591 = vmatpush1.bf16.msra.mxu0 %v6590_v5  ;;  %v5305_v5 = vld [vmem:[%s7683_s17 + $0x1718] sm:$0xff] }
 0x2f9   : > { %6593 = vmatprep.subr.bf16.mxu0 %v6592_v40  ;;  %v5309_v40 = vld [vmem:[%s7683_s17 + $0x1738] sm:$0xff] }
 0x2fc   : > { %6595 = vmatpush1.bf16.msra.mxu0 %v6594_v33  ;;  %v5317_v33 = vld [vmem:[%s7683_s17 + $0x1778] sm:$0xff] }
 0x2fd   : > { %6597 = vmatprep.subr.bf16.mxu0 %v6596_v23  ;;  %v6626_v23 = vpack.c.bf16 %v5308_v42, %v5304_v49  ;;  %v6628_v50 = vpack.c.bf16 %v5317_v33, %v5313_v51  ;;  %v6738_v42 = vpack.c.bf16 %v5340_v45, %v5336_v44  ;;  %v3949_v51 = vld [vmem:[%s8800_s24 + $0x60] sm:$0xff]  ;;  %v3951_v33 = vld [vmem:[%s8800_s24 + $0x70] sm:$0xff]  ;;  %v3966_v44 = vld [vmem:[%s8800_s24 + $0xe8] sm:$0xff] }
 0x2fe   : > { %v3968_v45 = vld [vmem:[%s8800_s24 + $0xf8] sm:$0xff] }
 0x300   : > { %6599 = vmatpush1.bf16.msra.mxu0 %v6598_v56  ;;  %v5325_v56 = vld [vmem:[%s7683_s17 + $0x17b8] sm:$0xff] }
 0x301   : > { %6601 = vmatprep.subr.bf16.mxu0 %v6600_v57  ;;  %v6630_v57 = vpack.c.bf16 %v5316_v41, %v5312_v52  ;;  %v6632_v7 = vpack.c.bf16 %v5325_v56, %v5321_v55  ;;  %v5348_v52 = vld [vmem:[%s7683_s17 + $0x1870] sm:$0xff]  ;;  %v5353_v41 = vld [vmem:[%s7683_s17 + $0x1898] sm:$0xff] }
 0x302   : > { %v5357_v56 = vld [vmem:[%s7683_s17 + $0x18b8] sm:$0xff] }
 0x304   : > { %6603 = vmatpush1.bf16.msra.mxu0 %v6602_v11  ;;  %v5333_v11 = vld [vmem:[%s7683_s17 + $0x17f8] sm:$0xff] }
 0x305   : > { %6605 = vmatprep.subr.bf16.mxu0 %v6604_v58  ;;  %v5328_v58 = vld [vmem:[%s7683_s17 + $0x17d0] sm:$0xff]  ;;  %v6636_v3 = vpack.c.bf16 %v5333_v11, %v5329_v10  ;;  %v3953_v11 = vld [vmem:[%s8800_s24 + $0x80] sm:$0xff] }
 0x306   : > { %v5352_v10 = vld [vmem:[%s7683_s17 + $0x1890] sm:$0xff] }
 0x308   : > { %6607 = vmatpush1.bf16.msra.mxu0 %v6606_v14  ;;  %v6634_v14 = vpack.c.bf16 %v5324_v6, %v5320_v8  ;;  %v6846_v8 = vpack.c.bf16 %v3951_v33, %v3949_v51  ;;  %v3965_v51 = vld [vmem:[%s8800_s24 + $0xe0] sm:$0xff]  ;;  %v3967_v33 = vld [vmem:[%s8800_s24 + $0xf0] sm:$0xff] }
 0x309   : > { %6609 = vmatprep.subr.bf16.mxu0 %v6608_v59  ;;  %v6832_v59 = vpack.c.bf16 %v3940_v28, %v3938_v13  ;;  %v5356_v13 = vld [vmem:[%s7683_s17 + $0x18b0] sm:$0xff] }
 0x30b   : > { %3201 = vmatmul.mubr.f32.vlgmr.msra.gmra.mrb[28].mxu0 %v8397_v36  ;;  %v6618_v36 = vpack.c.bf16 %v5292_v27, %v5288_v29  ;;  %6833 = vmatprep.subr.bf16.mxu1 %v6832_v59  ;;  %v6838_v29 = vpack.c.bf16 %v3943_v24, %v3941_v19  ;;  %v6638_v27 = vpack.c.bf16 %v5332_v62, %v5328_v58  ;;  %v3955_v58 = vld [vmem:[%s8800_s24 + $0x90] sm:$0xff]  ;;  %v5365_v59 = vld [vmem:[%s7683_s17 + $0x18f8] sm:$0xff] }
 0x30c   : > { %3206 = vmatprep.mubr.f32.mxu0 %v8406_v46  ;;  %6611 = vmatpush1.bf16.msra.mxu0 %v6610_v9  ;;  %v6620_v46 = vpack.c.bf16 %v5301_v0, %v5297_v43  ;;  %v6834_v9 = vpack.c.bf16 %v3939_v17, %v3937_v21  ;;  %v3945_v0 = vld [vmem:[%s8800_s24 + $0x40] sm:$0xff]  ;;  %v6744_v62 = vpack.c.bf16 %v5357_v56, %v5353_v41  ;;  %v3960_v21 = vld [vmem:[%s8800_s24 + $0xb8] sm:$0xff]  ;;  %v5364_v24 = vld [vmem:[%s7683_s17 + $0x18f0] sm:$0xff] }
 0x30d   : > { %6613 = vmatprep.subr.bf16.mxu0 %v6612_v22  ;;  %v6836_v22 = vpack.c.bf16 %v3944_v1, %v3942_v2  ;;  %v6850_v17 = vpack.c.bf16 %v3955_v58, %v3953_v11  ;;  %v6746_v2 = vpack.c.bf16 %v5356_v13, %v5352_v10  ;;  %v5360_v1 = vld [vmem:[%s7683_s17 + $0x18d0] sm:$0xff]  ;;  %v3972_v41 = vld [vmem:[%s8800_s24 + $0x118] sm:$0xff]  ;;  %v3969_v10 = vld [vmem:[%s8800_s24 + $0x100] sm:$0xff] }
 0x30e   : > { %6835 = vmatpush1.bf16.msra.mxu1 %v6834_v9  ;;  %v3957_v9 = vld [vmem:[%s8800_s24 + $0xa0] sm:$0xff]  ;;  %v5389_v56 = vld [vmem:[%s7683_s17 + $0x19b8] sm:$0xff]  ;;  %v3971_v11 = vld [vmem:[%s8800_s24 + $0x110] sm:$0xff] }
 0x30f   : > { %3207 = vmatmul.mubr.f32.gmra.mrb[30].mxu0 %v8416_v63  ;;  %v6624_v63 = vpack.c.bf16 %v5309_v40, %v5305_v5  ;;  %6837 = vmatprep.subr.bf16.mxu1 %v6836_v22  ;;  %v5345_v5 = vld [vmem:[%s7683_s17 + $0x1858] sm:$0xff]  ;;  %v3959_v22 = vld [vmem:[%s8800_s24 + $0xb0] sm:$0xff]  ;;  %v3974_v13 = vld [vmem:[%s8800_s24 + $0x128] sm:$0xff] }
 0x310   : > { %6615 = vmatpush1.bf16.msra.mxu0 %v6614_v20  ;;  %3277 = vmatprep.mubr.f32.mxu0 %v7273_v61  ;;  %v5341_v20 = vld [vmem:[%s7683_s17 + $0x1838] sm:$0xff] }
 0x311   : > { %6617 = vmatprep.subr.bf16.mxu0 %v6616_v16  ;;  %v3948_v16 = vld [vmem:[%s8800_s24 + $0x58] sm:$0xff] }
 0x312   : > { %v6840_v43 = vpack.c.bf16 %v3948_v16, %v3946_v39  ;;  %v5349_v40 = vld [vmem:[%s7683_s17 + $0x1878] sm:$0xff]  ;;  %6839 = vmatpush1.bf16.msra.mxu1 %v6838_v29  ;;  %v6750_v16 = vpack.c.bf16 %v5364_v24, %v5360_v1  ;;  %v5368_v29 = vld [vmem:[%s7683_s17 + $0x1910] sm:$0xff]  ;;  %v3973_v1 = vld [vmem:[%s8800_s24 + $0x120] sm:$0xff] }
 0x313   : > { %v3964_v39 = vld [vmem:[%s8800_s24 + $0xd8] sm:$0xff] }
 0x314   : > { %6619 = vmatpush1.bf16.msra.mxu0 %v6618_v36  ;;  %v3947_v36 = vld [vmem:[%s8800_s24 + $0x50] sm:$0xff]  ;;  %6841 = vmatprep.subr.bf16.mxu1 %v6840_v43  ;;  %v3961_v43 = vld [vmem:[%s8800_s24 + $0xc0] sm:$0xff]  ;;  %v3980_v24 = vld [vmem:[%s8800_s24 + $0x158] sm:$0xff] }
 0x315   : > { %6621 = vmatprep.subr.bf16.mxu0 %v6620_v46  ;;  %v6736_v46 = vpack.c.bf16 %v5341_v20, %v5337_v26  ;;  %v6842_v49 = vpack.c.bf16 %v3947_v36, %v3945_v0  ;;  %v5369_v26 = vld [vmem:[%s7683_s17 + $0x1918] sm:$0xff]  ;;  %v6854_v20 = vpack.c.bf16 %v3959_v22, %v3957_v9  ;;  %v3963_v0 = vld [vmem:[%s8800_s24 + $0xd0] sm:$0xff] }
 0x316   : > { %v5396_v22 = vld [vmem:[%s7683_s17 + $0x19f0] sm:$0xff] }
 0x317   : > { %6843 = vmatpush1.bf16.msra.mxu1 %v6842_v49  ;;  %v5376_v49 = vld [vmem:[%s7683_s17 + $0x1950] sm:$0xff] }
 0x318   : > { %6623 = vmatpush1.bf16.msra.mxu0 %v6622_v47  ;;  %v3950_v47 = vld [vmem:[%s8800_s24 + $0x68] sm:$0xff] }
 0x319   : > { %6625 = vmatprep.subr.bf16.mxu0 %v6624_v63  ;;  %v3952_v63 = vld [vmem:[%s8800_s24 + $0x78] sm:$0xff] }
 0x31a   : > { %v6844_v55 = vpack.c.bf16 %v3952_v63, %v3950_v47  ;;  %v6858_v47 = vpack.c.bf16 %v3963_v0, %v3961_v43  ;;  %v5404_v0 = vld [vmem:[%s7683_s17 + $0x1a30] sm:$0xff] }
 0x31c   : > { %6627 = vmatpush1.bf16.msra.mxu0 %v6626_v23  ;;  %v6740_v23 = vpack.c.bf16 %v5349_v40, %v5345_v5  ;;  %6845 = vmatprep.subr.bf16.mxu1 %v6844_v55  ;;  %v5377_v5 = vld [vmem:[%s7683_s17 + $0x1958] sm:$0xff] }
 0x31d   : > { %6629 = vmatprep.subr.bf16.mxu0 %v6628_v50  ;;  %v5344_v50 = vld [vmem:[%s7683_s17 + $0x1850] sm:$0xff]  ;;  %6847 = vmatpush1.bf16.msra.mxu1 %v6846_v8  ;;  %v5381_v40 = vld [vmem:[%s7683_s17 + $0x1978] sm:$0xff] }
 0x31e   : > { %v6742_v6 = vpack.c.bf16 %v5348_v52, %v5344_v50  ;;  %v5380_v50 = vld [vmem:[%s7683_s17 + $0x1970] sm:$0xff]  ;;  %v3970_v52 = vld [vmem:[%s8800_s24 + $0x108] sm:$0xff]  ;;  %v5385_v55 = vld [vmem:[%s7683_s17 + $0x1998] sm:$0xff] }
 0x31f   : > { %v5384_v8 = vld [vmem:[%s7683_s17 + $0x1990] sm:$0xff]  ;;  %v6760_v58 = vpack.c.bf16 %v5389_v56, %v5385_v55 }
 0x320   : > { %6631 = vmatpush1.bf16.msra.mxu0 %v6630_v57  ;;  %v3954_v57 = vld [vmem:[%s8800_s24 + $0x88] sm:$0xff]  ;;  %v5416_v56 = vld [vmem:[%s7683_s17 + $0x1a90] sm:$0xff] }
 0x321   : > { %6633 = vmatprep.subr.bf16.mxu0 %v6632_v7  ;;  %v3956_v7 = vld [vmem:[%s8800_s24 + $0x98] sm:$0xff] }
 0x322   : > { %v6848_v28 = vpack.c.bf16 %v3956_v7, %v3954_v57  ;;  %v6862_v57 = vpack.c.bf16 %v3967_v33, %v3965_v51  ;;  %v6758_v7 = vpack.c.bf16 %v5380_v50, %v5376_v49  ;;  %v3983_v49 = vld [vmem:[%s8800_s24 + $0x170] sm:$0xff]  ;;  %v5421_v50 = vld [vmem:[%s7683_s17 + $0x1ab8] sm:$0xff] }
 0x323   : > { %v5408_v51 = vld [vmem:[%s7683_s17 + $0x1a50] sm:$0xff] }
 0x324   : > { %6635 = vmatpush1.bf16.msra.mxu0 %v6634_v14  ;;  %v5361_v14 = vld [vmem:[%s7683_s17 + $0x18d8] sm:$0xff]  ;;  %6849 = vmatprep.subr.bf16.mxu1 %v6848_v28  ;;  %v5412_v33 = vld [vmem:[%s7683_s17 + $0x1a70] sm:$0xff] }
 0x325   : > { %6637 = vmatprep.subr.bf16.mxu0 %v6636_v3  ;;  %v6748_v19 = vpack.c.bf16 %v5365_v59, %v5361_v14  ;;  %6851 = vmatpush1.bf16.msra.mxu1 %v6850_v17  ;;  %v3976_v28 = vld [vmem:[%s8800_s24 + $0x138] sm:$0xff]  ;;  %v6866_v14 = vpack.c.bf16 %v3971_v11, %v3969_v10  ;;  %v5392_v17 = vld [vmem:[%s7683_s17 + $0x19d0] sm:$0xff] }
 0x326   : > { %v5424_v11 = vld [vmem:[%s7683_s17 + $0x1ad0] sm:$0xff] }
 0x328   : > { %6639 = vmatpush1.bf16.msra.mxu0 %v6638_v27 }
 0x329   : > { %6737 = vmatprep.subr.bf16.mxu0 %v6736_v46  ;;  %v5372_v46 = vld [vmem:[%s7683_s17 + $0x1930] sm:$0xff] }
 0x32a   : > { %v6754_v63 = vpack.c.bf16 %v5372_v46, %v5368_v29  ;;  %v3977_v29 = vld [vmem:[%s8800_s24 + $0x140] sm:$0xff]  ;;  %v3984_v46 = vld [vmem:[%s8800_s24 + $0x178] sm:$0xff] }
 0x32b   : > { %3278 = vmatmul.mubr.f32.vlgmr.msra.gmra.mrb[28].mxu0 %v8482_v4  ;;  %v3958_v4 = vld [vmem:[%s8800_s24 + $0xa8] sm:$0xff] }
 0x32c   : > { %6739 = vmatpush1.bf16.msra.mxu0 %v6738_v42  ;;  %3283 = vmatprep.mubr.f32.mxu0 %v7273_v61  ;;  %v6852_v3 = vpack.c.bf16 %v3960_v21, %v3958_v4  ;;  %v6860_v42 = vpack.c.bf16 %v3968_v45, %v3966_v44  ;;  %v5393_v4 = vld [vmem:[%s7683_s17 + $0x19d8] sm:$0xff] }
 0x32d   : > { %6741 = vmatprep.subr.bf16.mxu0 %v6740_v23  ;;  %v6756_v23 = vpack.c.bf16 %v5381_v40, %v5377_v5  ;;  %v5397_v21 = vld [vmem:[%s7683_s17 + $0x19f8] sm:$0xff] }
 0x32e   : > { %6853 = vmatprep.subr.bf16.mxu1 %v6852_v3  ;;  %v3975_v3 = vld [vmem:[%s8800_s24 + $0x130] sm:$0xff]  ;;  %v6764_v9 = vpack.c.bf16 %v5397_v21, %v5393_v4  ;;  %v5409_v44 = vld [vmem:[%s7683_s17 + $0x1a58] sm:$0xff] }
 0x32f   : > { %3284 = vmatmul.mubr.f32.gmra.mrb[30].mxu0 %v8497_v18  ;;  %v3962_v18 = vld [vmem:[%s8800_s24 + $0xc8] sm:$0xff]  ;;  %6855 = vmatpush1.bf16.msra.mxu1 %v6854_v20  ;;  %v5400_v20 = vld [vmem:[%s7683_s17 + $0x1a10] sm:$0xff]  ;;  %v5413_v45 = vld [vmem:[%s7683_s17 + $0x1a78] sm:$0xff] }
 0x330   : > { %6743 = vmatpush1.bf16.msra.mxu0 %v6742_v6  ;;  %3709 = vmatprep.mubr.f32.mxu0 %v7902_v53  ;;  %v5373_v53 = vld [vmem:[%s7683_s17 + $0x1938] sm:$0xff]  ;;  %v6856_v27 = vpack.c.bf16 %v3964_v39, %v3962_v18  ;;  %v6864_v6 = vpack.c.bf16 %v3972_v41, %v3970_v52  ;;  %v6770_v40 = vpack.c.bf16 %v5404_v0, %v5400_v20  ;;  %v5432_v21 = vld [vmem:[%s7683_s17 + $0x1b10] sm:$0xff] }
 0x331   : > { %6745 = vmatprep.subr.bf16.mxu0 %v6744_v62  ;;  %v6752_v36 = vpack.c.bf16 %v5373_v53, %v5369_v26  ;;  %v5388_v62 = vld [vmem:[%s7683_s17 + $0x19b0] sm:$0xff]  ;;  %v5401_v18 = vld [vmem:[%s7683_s17 + $0x1a18] sm:$0xff]  ;;  %v6870_v26 = vpack.c.bf16 %v3975_v3, %v3973_v1  ;;  %v6766_v53 = vpack.c.bf16 %v5396_v22, %v5392_v17  ;;  %v6774_v41 = vpack.c.bf16 %v5412_v33, %v5408_v51 }
 0x332   : > { %6857 = vmatprep.subr.bf16.mxu1 %v6856_v27  ;;  %v6762_v59 = vpack.c.bf16 %v5388_v62, %v5384_v8  ;;  %v5405_v39 = vld [vmem:[%s7683_s17 + $0x1a38] sm:$0xff]  ;;  %v3979_v27 = vld [vmem:[%s8800_s24 + $0x150] sm:$0xff] }
 0x333   : > { %6859 = vmatpush1.bf16.msra.mxu1 %v6858_v47  ;;  %v6768_v43 = vpack.c.bf16 %v5405_v39, %v5401_v18  ;;  %v6874_v5 = vpack.c.bf16 %v3979_v27, %v3977_v29  ;;  %v5429_v8 = vld [vmem:[%s7683_s17 + $0x1af8] sm:$0xff]  ;;  %v5440_v3 = vld [vmem:[%s7683_s17 + $0x1b50] sm:$0xff] }
 0x334   : > { %6747 = vmatpush1.bf16.msra.mxu0 %v6746_v2  ;;  %6861 = vmatprep.subr.bf16.mxu1 %v6860_v42  ;;  %v6868_v2 = vpack.c.bf16 %v3976_v28, %v3974_v13  ;;  %v6772_v42 = vpack.c.bf16 %v5413_v45, %v5409_v44  ;;  %v5433_v62 = vld [vmem:[%s7683_s17 + $0x1b18] sm:$0xff]  ;;  %v5448_v39 = vld [vmem:[%s7683_s17 + $0x1b90] sm:$0xff] }
 0x335   : > { %6749 = vmatprep.subr.bf16.mxu0 %v6748_v19  ;;  %v3978_v19 = vld [vmem:[%s8800_s24 + $0x148] sm:$0xff]  ;;  %v5437_v13 = vld [vmem:[%s7683_s17 + $0x1b38] sm:$0xff]  ;;  %v5456_v27 = vld [vmem:[%s7683_s17 + $0x1bd0] sm:$0xff] }
 0x336   : > { %v6784_v4 = vpack.c.bf16 %v5437_v13, %v5433_v62  ;;  %v5445_v17 = vld [vmem:[%s7683_s17 + $0x1b78] sm:$0xff]  ;;  %v5464_v45 = vld [vmem:[%s7683_s17 + $0x1c10] sm:$0xff] }
 0x337   : > { %6863 = vmatpush1.bf16.msra.mxu1 %v6862_v57  ;;  %v5420_v57 = vld [vmem:[%s7683_s17 + $0x1ab0] sm:$0xff]  ;;  %v5449_v22 = vld [vmem:[%s7683_s17 + $0x1b98] sm:$0xff] }
 0x338   : > { %6751 = vmatpush1.bf16.msra.mxu0 %v6750_v16  ;;  %6865 = vmatprep.subr.bf16.mxu1 %v6864_v6  ;;  %v6872_v16 = vpack.c.bf16 %v3980_v24, %v3978_v19  ;;  %v6778_v6 = vpack.c.bf16 %v5420_v57, %v5416_v56  ;;  %v5453_v19 = vld [vmem:[%s7683_s17 + $0x1bb8] sm:$0xff]  ;;  %v5476_v51 = vld [vmem:[%s7683_s17 + $0x1c70] sm:$0xff] }
 0x339   : > { %6753 = vmatprep.subr.bf16.mxu0 %v6752_v36  ;;  %v3982_v36 = vld [vmem:[%s8800_s24 + $0x168] sm:$0xff]  ;;  %v6792_v18 = vpack.c.bf16 %v5453_v19, %v5449_v22  ;;  %v5461_v20 = vld [vmem:[%s7683_s17 + $0x1bf8] sm:$0xff]  ;;  %v5500_v62 = vld [vmem:[%s7683_s17 + $0x1d30] sm:$0xff] }
 0x33a   : > { %v6876_v47 = vpack.c.bf16 %v3984_v46, %v3982_v36  ;;  %v5465_v0 = vld [vmem:[%s7683_s17 + $0x1c18] sm:$0xff]  ;;  %v5516_v22 = vld [vmem:[%s7683_s17 + $0x1db0] sm:$0xff] }
 0x33b   : > { %6867 = vmatpush1.bf16.msra.mxu1 %v6866_v14  ;;  %v5436_v14 = vld [vmem:[%s7683_s17 + $0x1b30] sm:$0xff]  ;;  %v5469_v36 = vld [vmem:[%s7683_s17 + $0x1c38] sm:$0xff] }
 0x33c   : > { %6755 = vmatpush1.bf16.msra.mxu0 %v6754_v63  ;;  %6869 = vmatprep.subr.bf16.mxu1 %v6868_v2  ;;  %v3981_v63 = vld [vmem:[%s8800_s24 + $0x160] sm:$0xff]  ;;  %v6786_v2 = vpack.c.bf16 %v5436_v14, %v5432_v21  ;;  %v6800_v44 = vpack.c.bf16 %v5469_v36, %v5465_v0  ;;  %v5481_v33 = vld [vmem:[%s7683_s17 + $0x1c98] sm:$0xff]  ;;  %v5504_v14 = vld [vmem:[%s7683_s17 + $0x1d50] sm:$0xff] }
 0x33d   : > { %6757 = vmatprep.subr.bf16.mxu0 %v6756_v23  ;;  %v5417_v23 = vld [vmem:[%s7683_s17 + $0x1a98] sm:$0xff]  ;;  %v6878_v52 = vpack.c.bf16 %v3983_v49, %v3981_v63 }
 0x33e   : > { %v6776_v55 = vpack.c.bf16 %v5421_v50, %v5417_v23  ;;  %v5485_v23 = vld [vmem:[%s7683_s17 + $0x1cb8] sm:$0xff] }
 0x33f   : > { %6871 = vmatpush1.bf16.msra.mxu1 %v6870_v26  ;;  %v5452_v26 = vld [vmem:[%s7683_s17 + $0x1bb0] sm:$0xff]  ;;  %v5489_v56 = vld [vmem:[%s7683_s17 + $0x1cd8] sm:$0xff] }
 0x340   : > { %6759 = vmatpush1.bf16.msra.mxu0 %v6758_v7  ;;  %6873 = vmatprep.subr.bf16.mxu1 %v6872_v16  ;;  %v5425_v7 = vld [vmem:[%s7683_s17 + $0x1ad8] sm:$0xff]  ;;  %v6794_v16 = vpack.c.bf16 %v5452_v26, %v5448_v39  ;;  %v5520_v26 = vld [vmem:[%s7683_s17 + $0x1dd0] sm:$0xff] }
 0x341   : > { %6761 = vmatprep.subr.bf16.mxu0 %v6760_v58  ;;  %v6780_v10 = vpack.c.bf16 %v5429_v8, %v5425_v7  ;;  %v5428_v58 = vld [vmem:[%s7683_s17 + $0x1af0] sm:$0xff]  ;;  %v5493_v57 = vld [vmem:[%s7683_s17 + $0x1cf8] sm:$0xff] }
 0x342   : > { %v6782_v28 = vpack.c.bf16 %v5428_v58, %v5424_v11  ;;  %v5488_v7 = vld [vmem:[%s7683_s17 + $0x1cd0] sm:$0xff]  ;;  %v5505_v13 = vld [vmem:[%s7683_s17 + $0x1d58] sm:$0xff] }
 0x343   : > { %6875 = vmatpush1.bf16.msra.mxu1 %v6874_v5  ;;  %v5468_v5 = vld [vmem:[%s7683_s17 + $0x1c30] sm:$0xff]  ;;  %v5521_v19 = vld [vmem:[%s7683_s17 + $0x1dd8] sm:$0xff] }
 0x344   : > { %6763 = vmatpush1.bf16.msra.mxu0 %v6762_v59  ;;  %6877 = vmatprep.subr.bf16.mxu1 %v6876_v47  ;;  %v5441_v59 = vld [vmem:[%s7683_s17 + $0x1b58] sm:$0xff]  ;;  %v6802_v63 = vpack.c.bf16 %v5468_v5, %v5464_v45  ;;  %v5492_v8 = vld [vmem:[%s7683_s17 + $0x1cf0] sm:$0xff]  ;;  %v3986_v5 = vld [vmem:[%s8800_s24 + $0x188] sm:$0xff] }
 0x345   : > { %6765 = vmatprep.subr.bf16.mxu0 %v6764_v9  ;;  %v6788_v1 = vpack.c.bf16 %v5445_v17, %v5441_v59  ;;  %v5444_v9 = vld [vmem:[%s7683_s17 + $0x1b70] sm:$0xff]  ;;  %v5477_v47 = vld [vmem:[%s7683_s17 + $0x1c78] sm:$0xff]  ;;  %v6814_v11 = vpack.c.bf16 %v5492_v8, %v5488_v7  ;;  %v3997_v7 = vld [vmem:[%s8800_s24 + $0x1e0] sm:$0xff] }
 0x346   : > { %v6790_v24 = vpack.c.bf16 %v5444_v9, %v5440_v3  ;;  %v5496_v58 = vld [vmem:[%s7683_s17 + $0x1d10] sm:$0xff]  ;;  %v5513_v17 = vld [vmem:[%s7683_s17 + $0x1d98] sm:$0xff] }
 0x347   : > { %6879 = vmatpush1.bf16.msra.mxu1 %v6878_v52  ;;  %v6808_v52 = vpack.c.bf16 %v5485_v23, %v5481_v33  ;;  %v5508_v59 = vld [vmem:[%s7683_s17 + $0x1d70] sm:$0xff] }
 0x348   : > { %6767 = vmatpush1.bf16.msra.mxu0 %v6766_v53  ;;  %v5457_v53 = vld [vmem:[%s7683_s17 + $0x1bd8] sm:$0xff]  ;;  %v5512_v9 = vld [vmem:[%s7683_s17 + $0x1d90] sm:$0xff] }
 0x349   : > { %6769 = vmatprep.subr.bf16.mxu0 %v6768_v43  ;;  %v6796_v29 = vpack.c.bf16 %v5461_v20, %v5457_v53  ;;  %v5460_v43 = vld [vmem:[%s7683_s17 + $0x1bf0] sm:$0xff] }
 0x34a   : > { %v6798_v46 = vpack.c.bf16 %v5460_v43, %v5456_v27  ;;  %v5524_v53 = vld [vmem:[%s7683_s17 + $0x1df0] sm:$0xff]  ;;  %v3807_v43 = vld [vmem:[%s434_s28] sm:$0xf] }
 0x34b   : > { %v6830_v20 = vpack.c.bf16 %v5524_v53, %v5520_v26  ;;  %v3991_v33 = vld [vmem:[%s8800_s24 + $0x1b0] sm:$0xff] }
 0x34c   : > { %6771 = vmatpush1.bf16.msra.mxu0 %v6770_v40  ;;  %v5473_v40 = vld [vmem:[%s7683_s17 + $0x1c58] sm:$0xff] }
 0x34d   : > { %6773 = vmatprep.subr.bf16.mxu0 %v6772_v42  ;;  %v6804_v49 = vpack.c.bf16 %v5477_v47, %v5473_v40  ;;  %v5472_v42 = vld [vmem:[%s7683_s17 + $0x1c50] sm:$0xff]  ;;  %v3988_v40 = vld [vmem:[%s8800_s24 + $0x198] sm:$0xff]  ;;  %v3985_v47 = vld [vmem:[%s8800_s24 + $0x180] sm:$0xff] }
 0x34e   : > { %v6806_v50 = vpack.c.bf16 %v5476_v51, %v5472_v42  ;;  %v3992_v42 = vld [vmem:[%s8800_s24 + $0x1b8] sm:$0xff]  ;;  %v3989_v51 = vld [vmem:[%s8800_s24 + $0x1a0] sm:$0xff] }
 0x34f   : > { %v6886_v23 = vpack.c.bf16 %v3991_v33, %v3989_v51 }
 0x350   : > { %6775 = vmatpush1.bf16.msra.mxu0 %v6774_v41  ;;  %v5480_v41 = vld [vmem:[%s7683_s17 + $0x1c90] sm:$0xff] }
 0x351   : > { %6777 = vmatprep.subr.bf16.mxu0 %v6776_v55  ;;  %v5484_v55 = vld [vmem:[%s7683_s17 + $0x1cb0] sm:$0xff] }
 0x354   : > { %6779 = vmatpush1.bf16.msra.mxu0 %v6778_v6  ;;  %v5497_v6 = vld [vmem:[%s7683_s17 + $0x1d18] sm:$0xff] }
 0x355   : > { %6781 = vmatprep.subr.bf16.mxu0 %v6780_v10  ;;  %v5501_v10 = vld [vmem:[%s7683_s17 + $0x1d38] sm:$0xff] }
 0x358   : > { %6783 = vmatpush1.bf16.msra.mxu0 %v6782_v28  ;;  %v5509_v28 = vld [vmem:[%s7683_s17 + $0x1d78] sm:$0xff] }
 0x359   : > { %6785 = vmatprep.subr.bf16.mxu0 %v6784_v4  ;;  %v6818_v4 = vpack.c.bf16 %v5500_v62, %v5496_v58  ;;  %v6820_v21 = vpack.c.bf16 %v5509_v28, %v5505_v13  ;;  %v3823_v62 = vsub.s32 3, %v7824_v31  ;;  %v7274_v13 = vmov 1983009808  }
 0x35a   : > { %v3848_v28 = vunpack.c.l.s4 %v7274_v13  ;;  %v4018_v13 = vld [vmem:[%s8800_s24 + $0x288] sm:$0xff] }
 0x35c   : > { %6787 = vmatpush1.bf16.msra.mxu0 %v6786_v2  ;;  %v5517_v2 = vld [vmem:[%s7683_s17 + $0x1db8] sm:$0xff] }
 0x35d   : > { %6789 = vmatprep.subr.bf16.mxu0 %v6788_v1  ;;  %v6822_v1 = vpack.c.bf16 %v5508_v59, %v5504_v14  ;;  %v6824_v3 = vpack.c.bf16 %v5517_v2, %v5513_v17  ;;  %v3849_v59 = vunpack.c.0.s8 %v3848_v28  ;;  %v4020_v28 = vld [vmem:[%s8800_s24 + $0x298] sm:$0xff] }
 0x360   : > { %6791 = vmatpush1.bf16.msra.mxu0 %v6790_v24  ;;  %v5525_v24 = vld [vmem:[%s7683_s17 + $0x1df8] sm:$0xff] }
 0x361   : > { %6793 = vmatprep.subr.bf16.mxu0 %v6792_v18  ;;  %v6826_v18 = vpack.c.bf16 %v5516_v22, %v5512_v9  ;;  %v6828_v39 = vpack.c.bf16 %v5525_v24, %v5521_v19  ;;  %v3852_v24 = vsub.s32 %v3849_v59, %v7824_v31  ;;  %v4019_v59 = vld [vmem:[%s8800_s24 + $0x290] sm:$0xff] }
 0x364   : > { %6795 = vmatpush1.bf16.msra.mxu0 %v6794_v16 }
 0x365   : > { %6797 = vmatprep.subr.bf16.mxu0 %v6796_v29 }
 0x368   : > { %6799 = vmatpush1.bf16.msra.mxu0 %v6798_v46  ;;  %v3816_v46 = vrot.slane %v3807_v43, %v7842_v35 }
 0x369   : > { %6801 = vmatprep.subr.bf16.mxu0 %v6800_v44 }
 0x36b   : > { %3710 = vmatmul.mubr.f32.vlgmr.msra.gmra.mrb[28].mxu0 %v7896_v48  ;;  %v6810_v48 = vpack.c.bf16 %v5484_v55, %v5480_v41  ;;  %v3993_v55 = vld [vmem:[%s8800_s24 + $0x1c0] sm:$0xff] }
 0x36c   : > { %3715 = vmatprep.mubr.f32.mxu0 %v7926_v15  ;;  %6803 = vmatpush1.bf16.msra.mxu0 %v6802_v63  ;;  %v6812_v15 = vpack.c.bf16 %v5493_v57, %v5489_v56  ;;  %v3987_v63 = vld [vmem:[%s8800_s24 + $0x190] sm:$0xff] }
 0x36d   : > { %6805 = vmatprep.subr.bf16.mxu0 %v6804_v49  ;;  %v6882_v49 = vpack.c.bf16 %v3987_v63, %v3985_v47  ;;  %v3995_v56 = vld [vmem:[%s8800_s24 + $0x1d0] sm:$0xff] }
 0x36e   : > { %v6890_v57 = vpack.c.bf16 %v3995_v56, %v3993_v55  ;;  %v4012_v55 = vld [vmem:[%s8800_s24 + $0x258] sm:$0xff] }
 0x36f   : > { %3716 = vmatmul.mubr.f32.gmra.mrb[30].mxu0 %v7919_v12  ;;  %v6816_v12 = vpack.c.bf16 %v5501_v10, %v5497_v6  ;;  %v3999_v6 = vld [vmem:[%s8800_s24 + $0x1f0] sm:$0xff] }
 0x370   : > { %6807 = vmatpush1.bf16.msra.mxu0 %v6806_v50  ;;  %3786 = vmatprep.mubr.f32.mxu0 %v7273_v61  ;;  %v3994_v50 = vld [vmem:[%s8800_s24 + $0x1c8] sm:$0xff]  ;;  %v6894_v10 = vpack.c.bf16 %v3999_v6, %v3997_v7  ;;  %v4009_v7 = vld [vmem:[%s8800_s24 + $0x240] sm:$0xff] }
 0x371   : > { %6809 = vmatprep.subr.bf16.mxu0 %v6808_v52  ;;  %v3996_v52 = vld [vmem:[%s8800_s24 + $0x1d8] sm:$0xff]  ;;  %v4014_v6 = vld [vmem:[%s8800_s24 + $0x268] sm:$0xff] }
 0x372   : > { %v6888_v41 = vpack.c.bf16 %v3996_v52, %v3994_v50  ;;  %v4007_v50 = vld [vmem:[%s8800_s24 + $0x230] sm:$0xff] }
 0x374   : > { %6811 = vmatpush1.bf16.msra.mxu0 %v6810_v48  ;;  %v3998_v48 = vld [vmem:[%s8800_s24 + $0x1e8] sm:$0xff] }
 0x375   : > { %6813 = vmatprep.subr.bf16.mxu0 %v6812_v15  ;;  %v4000_v15 = vld [vmem:[%s8800_s24 + $0x1f8] sm:$0xff] }
 0x376   : > { %v6892_v8 = vpack.c.bf16 %v4000_v15, %v3998_v48 }
 0x378   : > { %6815 = vmatpush1.bf16.msra.mxu0 %v6814_v11  ;;  %v4002_v11 = vld [vmem:[%s8800_s24 + $0x208] sm:$0xff] }
 0x379   : > { %6817 = vmatprep.subr.bf16.mxu0 %v6816_v12  ;;  %v4004_v12 = vld [vmem:[%s8800_s24 + $0x218] sm:$0xff] }
 0x37a   : > { %v6896_v58 = vpack.c.bf16 %v4004_v12, %v4002_v11 }
 0x37c   : > { %6819 = vmatpush1.bf16.msra.mxu0 %v6818_v4  ;;  %v3820_v4 = vrot.slane %v3807_v43, %v648_v37 }
 0x37d   : > { %6821 = vmatprep.subr.bf16.mxu0 %v6820_v21  ;;  %v3824_v21 = vrot.slane %v3807_v43, %v3823_v62  ;;  %v4015_v62 = vld [vmem:[%s8800_s24 + $0x270] sm:$0xff] }
 0x380   : > { %6823 = vmatpush1.bf16.msra.mxu0 %v6822_v1 }
 0x381   : > { %6825 = vmatprep.subr.bf16.mxu0 %v6824_v3 }
 0x384   : > { %6827 = vmatpush1.bf16.msra.mxu0 %v6826_v18 }
 0x385   : > { %6829 = vmatprep.subr.bf16.mxu0 %v6828_v39 }
 0x388   : > { %6831 = vmatpush1.bf16.msra.mxu0 %v6830_v20 }
 0x38b   : > { %3787 = vmatmul.mubr.f32.vlgmr.msra.gmra.mrb[28].mxu0 %v7836_v32 }
 0x38c   : > { %3792 = vmatprep.mubr.f32.mxu0 %v7273_v61  ;;  %v3812_v61 = vrot.slane %v3807_v43, %v7839_v34 }
 0x38f   : > { %3793 = vmatmul.mubr.f32.gmra.mrb[30].mxu0 %v7834_v30 }
 0x397   : > { %v3634_v16 = vpop.f32.mrb[36].mxu1 }
 0x398   : > { %v7144_v29 = vadd.f32 %v3634_v16, %v8550_v38  ;;  %v3636_v27 = vpop.f32.mrb[37].mxu1 }
 0x399   : > { %v7145_v32 = vadd.f32 %v3636_v27, %v8555_v54  ;;  %v6880_v54 = vpack.c.bf16 %v3988_v40, %v3986_v5  ;;  %v4001_v5 = vld [vmem:[%s8800_s24 + $0x200] sm:$0xff]  ;;  %v4003_v40 = vld [vmem:[%s8800_s24 + $0x210] sm:$0xff] }
 0x39a   : > { %v3829_v17 = vadd.f32 %v7144_v29, %v3812_v61 }
 0x39b   : > { %v3640_v0 = vpop.f32.mrb[38].mxu1  ;;  %6881 = vmatprep.subr.bf16.mxu1 %v6880_v54  ;;  %v3830_v3 = vadd.f32 %v7145_v32, %v3816_v46 }
 0x39c   : > { %v7146_v30 = vadd.f32 %v3640_v0, %v8562_v60  ;;  %v3642_v36 = vpop.f32.mrb[39].mxu1  ;;  %6883 = vmatpush1.bf16.msra.mxu1 %v6882_v49  ;;  %v3990_v60 = vld [vmem:[%s8800_s24 + $0x1a8] sm:$0xff]  ;;  %v4008_v49 = vld [vmem:[%s8800_s24 + $0x238] sm:$0xff] }
 0x39d   : > { %v7147_v44 = vadd.f32 %v3642_v36, %v8567_v25  ;;  %v6884_v25 = vpack.c.bf16 %v3992_v42, %v3990_v60  ;;  %v6898_v42 = vpack.c.bf16 %v4003_v40, %v4001_v5 }
 0x39e   : > { %v3833_v38 = vadd.f32 %v7146_v30, %v3812_v61 }
 0x39f   : > { %v3834_v45 = vadd.f32 %v7147_v44, %v3816_v46  ;;  %6885 = vmatprep.subr.bf16.mxu1 %v6884_v25 }
 0x3a0   : > { %6887 = vmatpush1.bf16.msra.mxu1 %v6886_v23  ;;  %v4005_v23 = vld [vmem:[%s8800_s24 + $0x220] sm:$0xff] }
 0x3a1   : > { %6889 = vmatprep.subr.bf16.mxu1 %v6888_v41  ;;  %v4010_v41 = vld [vmem:[%s8800_s24 + $0x248] sm:$0xff]  ;;  %v6902_v48 = vpack.c.bf16 %v4007_v50, %v4005_v23 }
 0x3a2   : > { %v6904_v15 = vpack.c.bf16 %v4012_v55, %v4010_v41  ;;  %v4047_v41 = vld [vmem:[%s8800_s24 + $0x370] sm:$0xff]  ;;  %v4050_v55 = vld [vmem:[%s8800_s24 + $0x388] sm:$0xff] }
 0x3a4   : > { %6891 = vmatpush1.bf16.msra.mxu1 %v6890_v57 }
 0x3a5   : > { %6893 = vmatprep.subr.bf16.mxu1 %v6892_v8  ;;  %v4011_v8 = vld [vmem:[%s8800_s24 + $0x250] sm:$0xff] }
 0x3a6   : > { %v6906_v11 = vpack.c.bf16 %v4011_v8, %v4009_v7  ;;  %v4049_v8 = vld [vmem:[%s8800_s24 + $0x380] sm:$0xff] }
 0x3a8   : > { %6895 = vmatpush1.bf16.msra.mxu1 %v6894_v10  ;;  %v4016_v10 = vld [vmem:[%s8800_s24 + $0x278] sm:$0xff] }
 0x3a9   : > { %6897 = vmatprep.subr.bf16.mxu1 %v6896_v58  ;;  %v6908_v12 = vpack.c.bf16 %v4016_v10, %v4014_v6  ;;  %v4013_v58 = vld [vmem:[%s8800_s24 + $0x260] sm:$0xff]  ;;  %v4051_v6 = vld [vmem:[%s8800_s24 + $0x390] sm:$0xff]  ;;  %v4054_v10 = vld [vmem:[%s8800_s24 + $0x3a8] sm:$0xff] }
 0x45e   : > { %v3788_v14 = vpop.f32.mrb[28].mxu0 }
 0x45f   : > { %v3831_v2 = vadd.f32 %v3820_v4, %v3788_v14  ;;  %v3790_v1 = vpop.f32.mrb[29].mxu0  ;;  %v4017_v14 = vld [vmem:[%s8800_s24 + $0x280] sm:$0xff] }
 0x460   : > { %v3832_v9 = vadd.f32 %v3824_v21, %v3790_v1  ;;  %v6914_v1 = vpack.c.bf16 %v4019_v59, %v4017_v14  ;;  %v4057_v59 = vld [vmem:[%s8800_s24 + $0x3c0] sm:$0xff] }
 0x461   : > { %v3837_v22 = vmax.f32 %v3829_v17, %v3831_v2  ;;  %v4022_v17 = vld [vmem:[%s8800_s24 + $0x2a8] sm:$0xff]  ;;  %v4024_v2 = vld [vmem:[%s8800_s24 + $0x2b8] sm:$0xff] }
 0x462   : > { %v3838_v19 = vmax.f32 %v3830_v3, %v3832_v9  ;;  %v3794_v18 = vpop.f32.mrb[30].mxu0  ;;  %v6916_v3 = vpack.c.bf16 %v4024_v2, %v4022_v17  ;;  %v4021_v9 = vld [vmem:[%s8800_s24 + $0x2a0] sm:$0xff]  ;;  %v4059_v17 = vld [vmem:[%s8800_s24 + $0x3d0] sm:$0xff]  ;;  %v4062_v2 = vld [vmem:[%s8800_s24 + $0x3e8] sm:$0xff] }
 0x463   : > { %v3835_v39 = vadd.f32 %v3820_v4, %v3794_v18  ;;  %v3796_v26 = vpop.f32.mrb[31].mxu0  ;;  %v6910_v4 = vpack.c.bf16 %v4015_v62, %v4013_v58  ;;  %v4053_v62 = vld [vmem:[%s8800_s24 + $0x3a0] sm:$0xff] }
 0x464   : > { %v3845_v53 = vcombine.low %v3837_v22, %v3838_v19  ;;  %v3846_v20 = vcombine.high %v3837_v22, %v3838_v19  ;;  %v3836_v37 = vadd.f32 %v3824_v21, %v3796_v26  ;;  %v6912_v21 = vpack.c.bf16 %v4020_v28, %v4018_v13  ;;  %v4023_v22 = vld [vmem:[%s8800_s24 + $0x2b0] sm:$0xff]  ;;  %v4026_v19 = vld [vmem:[%s8800_s24 + $0x2c8] sm:$0xff]  ;;  %v4025_v26 = vld [vmem:[%s8800_s24 + $0x2c0] sm:$0xff] }
 0x465   : > { %v3839_v16 = vmax.f32 %v3833_v38, %v3835_v39  ;;  %v6918_v18 = vpack.c.bf16 %v4023_v22, %v4021_v9  ;;  %v4055_v13 = vld [vmem:[%s8800_s24 + $0x3b0] sm:$0xff]  ;;  %v4058_v28 = vld [vmem:[%s8800_s24 + $0x3c8] sm:$0xff]  ;;  %v4061_v22 = vld [vmem:[%s8800_s24 + $0x3e0] sm:$0xff] }
 0x466   : > { %v3853_v27 = vrot.slane %v3845_v53, %v3852_v24  ;;  %v3860_v43 = vrot.slane %v3846_v20, %v3852_v24  ;;  %v3840_v29 = vmax.f32 %v3834_v45, %v3836_v37  ;;  %v4006_v45 = vld [vmem:[%s8800_s24 + $0x228] sm:$0xff]  ;;  %v4027_v53 = vld [vmem:[%s8800_s24 + $0x2d0] sm:$0xff]  ;;  %v4032_v37 = vld [vmem:[%s8800_s24 + $0x2f8] sm:$0xff] }
 0x467   : > { %v6900_v33 = vpack.c.bf16 %v4008_v49, %v4006_v45  ;;  %v4030_v20 = vld [vmem:[%s8800_s24 + $0x2e8] sm:$0xff]  ;;  %v4044_v45 = vld [vmem:[%s8800_s24 + $0x358] sm:$0xff] }
 0x468   : > { %v3861_v32 = vcombine.high %v3853_v27, %v3853_v27  ;;  %v3862_v0 = vcombine.high %v3860_v43, %v3860_v43  ;;  %v3863_v61 = vcombine.low %v3839_v16, %v3840_v29  ;;  %v3864_v30 = vcombine.high %v3839_v16, %v3840_v29  ;;  %v4031_v29 = vld [vmem:[%s8800_s24 + $0x2f0] sm:$0xff] }
 0x469   : > { %v6922_v16 = vpack.c.bf16 %v4027_v53, %v4025_v26  ;;  %v4065_v53 = vld [vmem:[%s8800_s24 + $0x400] sm:$0xff] }
 0x46a   : > { %v3871_v36 = vrot.slane %v3863_v61, %v3852_v24  ;;  %v3878_v31 = vrot.slane %v3864_v30, %v3852_v24  ;;  %v3889_v46 = vmax.f32 %v3853_v27, %v3861_v32  ;;  %v3890_v44 = vmax.f32 %v3860_v43, %v3862_v0  ;;  %v4029_v43 = vld [vmem:[%s8800_s24 + $0x2e0] sm:$0xff]  ;;  %v4034_v32 = vld [vmem:[%s8800_s24 + $0x308] sm:$0xff]  ;;  %v4036_v0 = vld [vmem:[%s8800_s24 + $0x318] sm:$0xff] }
 0x46b   : > { %v6924_v27 = vpack.c.bf16 %v4032_v37, %v4030_v20  ;;  %v6926_v61 = vpack.c.bf16 %v4031_v29, %v4029_v43  ;;  %v6928_v30 = vpack.c.bf16 %v4036_v0, %v4034_v32  ;;  %v4067_v20 = vld [vmem:[%s8800_s24 + $0x410] sm:$0xff]  ;;  %v4070_v37 = vld [vmem:[%s8800_s24 + $0x428] sm:$0xff]  ;;  %v4069_v29 = vld [vmem:[%s8800_s24 + $0x420] sm:$0xff] }
 0x46c   : > { %v3879_v54 = vcombine.high %v3871_v36, %v3871_v36  ;;  %v3880_v38 = vcombine.high %v3878_v31, %v3878_v31  ;;  %v3900_v47 = vrot.slane %v3889_v46, %v3852_v24  ;;  %v8997_v63 = vrot.slane %v3890_v44, %v3852_v24  ;;  %v4038_v46 = vld [vmem:[%s8800_s24 + $0x328] sm:$0xff]  ;;  %v4040_v44 = vld [vmem:[%s8800_s24 + $0x338] sm:$0xff]  ;;  %v4071_v32 = vld [vmem:[%s8800_s24 + $0x430] sm:$0xff] }
 0x46d   : > { %v6932_v40 = vpack.c.bf16 %v4040_v44, %v4038_v46  ;;  %v4075_v46 = vld [vmem:[%s8800_s24 + $0x450] sm:$0xff]  ;;  %v4078_v44 = vld [vmem:[%s8800_s24 + $0x468] sm:$0xff] }
 0x46e   : > { %v3901_v60 = vcombine.high %v3900_v47, %v3900_v47  ;;  %v3891_v25 = vmax.f32 %v3871_v36, %v3879_v54  ;;  %v3892_v51 = vmax.f32 %v3878_v31, %v3880_v38  ;;  %v3912_v52 = vcombine.high %v8997_v63, %v8997_v63  ;;  %v4033_v36 = vld [vmem:[%s8800_s24 + $0x300] sm:$0xff]  ;;  %v4035_v31 = vld [vmem:[%s8800_s24 + $0x310] sm:$0xff] }
 0x46f   : > { %v6930_v5 = vpack.c.bf16 %v4035_v31, %v4033_v36  ;;  %v4037_v54 = vld [vmem:[%s8800_s24 + $0x320] sm:$0xff]  ;;  %v4039_v38 = vld [vmem:[%s8800_s24 + $0x330] sm:$0xff]  ;;  %v6966_v31 = vpack.c.bf16 %v4071_v32, %v4069_v29 }
 0x470   : > { %4269 = vmatprep.mubr.f32.mxu1 %v3901_v60  ;;  %v9007_v56 = vrot.slane %v3891_v25, %v3852_v24  ;;  %v9009_v57 = vrot.slane %v3892_v51, %v3852_v24  ;;  %v4028_v24 = vld [vmem:[%s8800_s24 + $0x2d8] sm:$0xff]  ;;  %v6934_v49 = vpack.c.bf16 %v4039_v38, %v4037_v54  ;;  %v4043_v25 = vld [vmem:[%s8800_s24 + $0x350] sm:$0xff]  ;;  %v4046_v51 = vld [vmem:[%s8800_s24 + $0x368] sm:$0xff] }
 0x471   : > { %4270 = vmatmul.mubr.f32.vlgmr.msra.gmra.mrb[40].mxu1 %v3900_v47  ;;  %v6920_v39 = vpack.c.bf16 %v4028_v24, %v4026_v19  ;;  %v4042_v47 = vld [vmem:[%s8800_s24 + $0x348] sm:$0xff]  ;;  %v4063_v19 = vld [vmem:[%s8800_s24 + $0x3f0] sm:$0xff]  ;;  %v4073_v36 = vld [vmem:[%s8800_s24 + $0x440] sm:$0xff] }
 0x472   : > { %6899 = vmatpush1.bf16.msra.mxu1 %v6898_v42  ;;  %4340 = vmatprep.mubr.f32.mxu1 %v3912_v52  ;;  %v6936_v60 = vpack.c.bf16 %v4044_v45, %v4042_v47  ;;  %v4041_v42 = vld [vmem:[%s8800_s24 + $0x340] sm:$0xff]  ;;  %v4066_v24 = vld [vmem:[%s8800_s24 + $0x408] sm:$0xff]  ;;  %v3923_v0 = vcombine.high %v9007_v56, %v9007_v56 }
 0x473   : > { %6901 = vmatprep.subr.bf16.mxu1 %v6900_v33  ;;  %v4048_v33 = vld [vmem:[%s8800_s24 + $0x378] sm:$0xff]  ;;  %v6938_v23 = vpack.c.bf16 %v4043_v25, %v4041_v42  ;;  %v4045_v52 = vld [vmem:[%s8800_s24 + $0x360] sm:$0xff]  ;;  %v4506_v54 = vld [vmem:[%s9086_s13 + $0x88] sm:$0xff] }
 0x474   : > { %v6940_v50 = vpack.c.bf16 %v4048_v33, %v4046_v51  ;;  %v4489_v38 = vld [vmem:[%s9086_s13] sm:$0xff]  ;;  %v4490_v45 = vld [vmem:[%s9086_s13 + $0x8] sm:$0xff]  ;;  %v4491_v51 = vld [vmem:[%s9086_s13 + $0x10] sm:$0xff] }
 0x475   : > { %v7090_v42 = vpack.c.bf16 %v4490_v45, %v4489_v38  ;;  %v4492_v33 = vld [vmem:[%s9086_s13 + $0x18] sm:$0xff]  ;;  %v4095_v45 = vld [vmem:[%s8800_s24 + $0x4f0] sm:$0xff] }
 0x476   : > { %6903 = vmatpush1.bf16.msra.mxu1 %v6902_v48  ;;  %v4052_v48 = vld [vmem:[%s8800_s24 + $0x398] sm:$0xff] }
 0x477   : > { %6905 = vmatprep.subr.bf16.mxu1 %v6904_v15  ;;  %v6942_v15 = vpack.c.bf16 %v4047_v41, %v4045_v52  ;;  %v6944_v7 = vpack.c.bf16 %v4052_v48, %v4050_v55  ;;  %v4510_v52 = vld [vmem:[%s9086_s13 + $0xa8] sm:$0xff]  ;;  %v4077_v55 = vld [vmem:[%s8800_s24 + $0x460] sm:$0xff]  ;;  %v4079_v48 = vld [vmem:[%s8800_s24 + $0x470] sm:$0xff] }
 0x47a   : > { %6907 = vmatpush1.bf16.msra.mxu1 %v6906_v11  ;;  %v4056_v11 = vld [vmem:[%s8800_s24 + $0x3b8] sm:$0xff] }
 0x47b   : > { %6909 = vmatprep.subr.bf16.mxu1 %v6908_v12  ;;  %v6946_v12 = vpack.c.bf16 %v4051_v6, %v4049_v8  ;;  %v6948_v58 = vpack.c.bf16 %v4056_v11, %v4054_v10  ;;  %v4084_v8 = vld [vmem:[%s8800_s24 + $0x498] sm:$0xff]  ;;  %v4493_v10 = vld [vmem:[%s9086_s13 + $0x20] sm:$0xff]  ;;  %v4494_v11 = vld [vmem:[%s9086_s13 + $0x28] sm:$0xff] }
 0x47e   : > { %6911 = vmatpush1.bf16.msra.mxu1 %v6910_v4  ;;  %v4060_v4 = vld [vmem:[%s8800_s24 + $0x3d8] sm:$0xff] }
 0x47f   : > { %6913 = vmatprep.subr.bf16.mxu1 %v6912_v21  ;;  %v6950_v21 = vpack.c.bf16 %v4055_v13, %v4053_v62  ;;  %v6952_v14 = vpack.c.bf16 %v4060_v4, %v4058_v28  ;;  %v6974_v62 = vpack.c.bf16 %v4079_v48, %v4077_v55  ;;  %v4081_v28 = vld [vmem:[%s8800_s24 + $0x480] sm:$0xff]  ;;  %v4083_v4 = vld [vmem:[%s8800_s24 + $0x490] sm:$0xff]  ;;  %v4102_v48 = vld [vmem:[%s8800_s24 + $0x528] sm:$0xff] }
 0x482   : > { %6915 = vmatpush1.bf16.msra.mxu1 %v6914_v1  ;;  %v4064_v1 = vld [vmem:[%s8800_s24 + $0x3f8] sm:$0xff] }
 0x483   : > { %6917 = vmatprep.subr.bf16.mxu1 %v6916_v3  ;;  %v6954_v3 = vpack.c.bf16 %v4059_v17, %v4057_v59  ;;  %v6956_v9 = vpack.c.bf16 %v4064_v1, %v4062_v2  ;;  %v4088_v59 = vld [vmem:[%s8800_s24 + $0x4b8] sm:$0xff]  ;;  %v4495_v2 = vld [vmem:[%s9086_s13 + $0x30] sm:$0xff] }
 0x484   : > { %v4496_v1 = vld [vmem:[%s9086_s13 + $0x38] sm:$0xff] }
 0x486   : > { %6919 = vmatpush1.bf16.msra.mxu1 %v6918_v18  ;;  %v4068_v18 = vld [vmem:[%s8800_s24 + $0x418] sm:$0xff] }
 0x487   : > { %6921 = vmatprep.subr.bf16.mxu1 %v6920_v39  ;;  %v6958_v39 = vpack.c.bf16 %v4063_v19, %v4061_v22  ;;  %v6960_v26 = vpack.c.bf16 %v4068_v18, %v4066_v24  ;;  %v6978_v22 = vpack.c.bf16 %v4083_v4, %v4081_v28  ;;  %v4085_v24 = vld [vmem:[%s8800_s24 + $0x4a0] sm:$0xff]  ;;  %v4087_v18 = vld [vmem:[%s8800_s24 + $0x4b0] sm:$0xff]  ;;  %v4110_v4 = vld [vmem:[%s8800_s24 + $0x568] sm:$0xff] }
 0x488   : > { %v6982_v29 = vpack.c.bf16 %v4087_v18, %v4085_v24  ;;  %v4107_v28 = vld [vmem:[%s8800_s24 + $0x550] sm:$0xff]  ;;  %v4118_v18 = vld [vmem:[%s8800_s24 + $0x5a8] sm:$0xff] }
 0x489   : > { %v4115_v24 = vld [vmem:[%s8800_s24 + $0x590] sm:$0xff] }
 0x48a   : > { %6923 = vmatpush1.bf16.msra.mxu1 %v6922_v16  ;;  %v4072_v16 = vld [vmem:[%s8800_s24 + $0x438] sm:$0xff] }
 0x48b   : > { %6925 = vmatprep.subr.bf16.mxu1 %v6924_v27  ;;  %v6962_v27 = vpack.c.bf16 %v4067_v20, %v4065_v53  ;;  %v6964_v43 = vpack.c.bf16 %v4072_v16, %v4070_v37  ;;  %v4092_v53 = vld [vmem:[%s8800_s24 + $0x4d8] sm:$0xff]  ;;  %v4497_v37 = vld [vmem:[%s9086_s13 + $0x40] sm:$0xff]  ;;  %v4498_v16 = vld [vmem:[%s9086_s13 + $0x48] sm:$0xff] }
 0x48e   : > { %6927 = vmatpush1.bf16.msra.mxu1 %v6926_v61  ;;  %v4074_v61 = vld [vmem:[%s8800_s24 + $0x448] sm:$0xff] }
 0x48f   : > { %6929 = vmatprep.subr.bf16.mxu1 %v6928_v30  ;;  %v4076_v30 = vld [vmem:[%s8800_s24 + $0x458] sm:$0xff] }
 0x492   : > { %6931 = vmatpush1.bf16.msra.mxu1 %v6930_v5  ;;  %v4080_v5 = vld [vmem:[%s8800_s24 + $0x478] sm:$0xff] }
 0x493   : > { %6933 = vmatprep.subr.bf16.mxu1 %v6932_v40  ;;  %v4505_v40 = vld [vmem:[%s9086_s13 + $0x80] sm:$0xff]  ;;  %v6972_v41 = vpack.c.bf16 %v4080_v5, %v4078_v44  ;;  %v4499_v44 = vld [vmem:[%s9086_s13 + $0x50] sm:$0xff]  ;;  %v4500_v5 = vld [vmem:[%s9086_s13 + $0x58] sm:$0xff] }
 0x494   : > { %v7088_v47 = vpack.c.bf16 %v4506_v54, %v4505_v40  ;;  %v4518_v40 = vld [vmem:[%s9086_s13 + $0xe8] sm:$0xff] }
 0x496   : > { %6935 = vmatpush1.bf16.msra.mxu1 %v6934_v49  ;;  %v4507_v49 = vld [vmem:[%s9086_s13 + $0x90] sm:$0xff]  ;;  %7089 = vmatprep.subr.bf16.mxu0 %v7088_v47  ;;  %v4093_v47 = vld [vmem:[%s8800_s24 + $0x4e0] sm:$0xff] }
 0x497   : > { %6937 = vmatprep.subr.bf16.mxu1 %v6936_v60  ;;  %v4508_v60 = vld [vmem:[%s9086_s13 + $0x98] sm:$0xff]  ;;  %7091 = vmatpush3.bf16.msra.mxu0 %v7090_v42 }
 0x498   : > { %v7092_v25 = vpack.c.bf16 %v4508_v60, %v4507_v49  ;;  %v4098_v49 = vld [vmem:[%s8800_s24 + $0x508] sm:$0xff]  ;;  %v7110_v60 = vpack.c.bf16 %v4500_v5, %v4499_v44  ;;  %v4100_v42 = vld [vmem:[%s8800_s24 + $0x518] sm:$0xff]  ;;  %v4127_v44 = vld [vmem:[%s8800_s24 + $0x5f0] sm:$0xff] }
 0x499   : > { %v4130_v5 = vld [vmem:[%s8800_s24 + $0x608] sm:$0xff] }
 0x49a   : > { %6939 = vmatpush1.bf16.msra.mxu1 %v6938_v23  ;;  %v4509_v23 = vld [vmem:[%s9086_s13 + $0xa0] sm:$0xff]  ;;  %7093 = vmatprep.subr.bf16.mxu0 %v7092_v25 }
 0x49b   : > { %6941 = vmatprep.subr.bf16.mxu1 %v6940_v50  ;;  %v6970_v50 = vpack.c.bf16 %v4075_v46, %v4073_v36  ;;  %v7096_v6 = vpack.c.bf16 %v4510_v52, %v4509_v23  ;;  %v7106_v36 = vpack.c.bf16 %v4498_v16, %v4497_v37  ;;  %v6990_v23 = vpack.c.bf16 %v4095_v45, %v4093_v47  ;;  %v4097_v52 = vld [vmem:[%s8800_s24 + $0x500] sm:$0xff]  ;;  %v4119_v37 = vld [vmem:[%s8800_s24 + $0x5b0] sm:$0xff]  ;;  %v4122_v16 = vld [vmem:[%s8800_s24 + $0x5c8] sm:$0xff] }
 0x49c   : > { %v4131_v47 = vld [vmem:[%s8800_s24 + $0x610] sm:$0xff]  ;;  %v4134_v45 = vld [vmem:[%s8800_s24 + $0x628] sm:$0xff] }
 0x49e   : > { %6943 = vmatpush1.bf16.msra.mxu1 %v6942_v15  ;;  %v4082_v15 = vld [vmem:[%s8800_s24 + $0x488] sm:$0xff] }
 0x49f   : > { %6945 = vmatprep.subr.bf16.mxu1 %v6944_v7  ;;  %v7094_v7 = vpack.c.bf16 %v4492_v33, %v4491_v51  ;;  %v6976_v13 = vpack.c.bf16 %v4084_v8, %v4082_v15  ;;  %v4501_v51 = vld [vmem:[%s9086_s13 + $0x60] sm:$0xff]  ;;  %v4502_v33 = vld [vmem:[%s9086_s13 + $0x68] sm:$0xff]  ;;  %v4104_v15 = vld [vmem:[%s8800_s24 + $0x538] sm:$0xff] }
 0x4a0   : > { %v7114_v55 = vpack.c.bf16 %v4502_v33, %v4501_v51  ;;  %v6996_v8 = vpack.c.bf16 %v4104_v15, %v4102_v48  ;;  %v4135_v51 = vld [vmem:[%s8800_s24 + $0x630] sm:$0xff]  ;;  %v3934_v33 = vcombine.high %v9009_v57, %v9009_v57  ;;  %v4142_v15 = vld [vmem:[%s8800_s24 + $0x668] sm:$0xff] }
 0x4a1   : > { %7095 = vmatpush3.bf16.msra.mxu0 %v7094_v7  ;;  %v4139_v48 = vld [vmem:[%s8800_s24 + $0x650] sm:$0xff] }
 0x4a2   : > { %6947 = vmatpush1.bf16.msra.mxu1 %v6946_v12  ;;  %v4511_v12 = vld [vmem:[%s9086_s13 + $0xb0] sm:$0xff]  ;;  %7097 = vmatprep.subr.bf16.mxu0 %v7096_v6  ;;  %v4101_v6 = vld [vmem:[%s8800_s24 + $0x520] sm:$0xff] }
 0x4a3   : > { %6949 = vmatprep.subr.bf16.mxu1 %v6948_v58  ;;  %v4512_v58 = vld [vmem:[%s9086_s13 + $0xb8] sm:$0xff] }
 0x4a4   : > { %v7100_v17 = vpack.c.bf16 %v4512_v58, %v4511_v12  ;;  %v4108_v12 = vld [vmem:[%s8800_s24 + $0x558] sm:$0xff] }
 0x4a6   : > { %6951 = vmatpush1.bf16.msra.mxu1 %v6950_v21  ;;  %v4086_v21 = vld [vmem:[%s8800_s24 + $0x4a8] sm:$0xff] }
 0x4a7   : > { %6953 = vmatprep.subr.bf16.mxu1 %v6952_v14  ;;  %v7098_v14 = vpack.c.bf16 %v4494_v11, %v4493_v10  ;;  %v6980_v19 = vpack.c.bf16 %v4088_v59, %v4086_v21  ;;  %v4103_v10 = vld [vmem:[%s8800_s24 + $0x530] sm:$0xff]  ;;  %v4106_v11 = vld [vmem:[%s8800_s24 + $0x548] sm:$0xff]  ;;  %v4112_v21 = vld [vmem:[%s8800_s24 + $0x578] sm:$0xff] }
 0x4a8   : > { %v6998_v58 = vpack.c.bf16 %v4103_v10, %v4101_v6  ;;  %v7004_v59 = vpack.c.bf16 %v4112_v21, %v4110_v4  ;;  %v4143_v10 = vld [vmem:[%s8800_s24 + $0x670] sm:$0xff]  ;;  %v4150_v4 = vld [vmem:[%s8800_s24 + $0x6a8] sm:$0xff]  ;;  %v4152_v21 = vld [vmem:[%s8800_s24 + $0x6b8] sm:$0xff] }
 0x4a9   : > { %7099 = vmatpush3.bf16.msra.mxu0 %v7098_v14 }
 0x4aa   : > { %6955 = vmatpush1.bf16.msra.mxu1 %v6954_v3  ;;  %v4513_v3 = vld [vmem:[%s9086_s13 + $0xc0] sm:$0xff]  ;;  %7101 = vmatprep.subr.bf16.mxu0 %v7100_v17 }
 0x4ab   : > { %6957 = vmatprep.subr.bf16.mxu1 %v6956_v9  ;;  %v4514_v9 = vld [vmem:[%s9086_s13 + $0xc8] sm:$0xff]  ;;  %v4109_v17 = vld [vmem:[%s8800_s24 + $0x560] sm:$0xff] }
 0x4ac   : > { %v7104_v20 = vpack.c.bf16 %v4514_v9, %v4513_v3  ;;  %v4116_v3 = vld [vmem:[%s8800_s24 + $0x598] sm:$0xff] }
 0x4ae   : > { %6959 = vmatpush1.bf16.msra.mxu1 %v6958_v39  ;;  %v4090_v39 = vld [vmem:[%s8800_s24 + $0x4c8] sm:$0xff] }
 0x4af   : > { %6961 = vmatprep.subr.bf16.mxu1 %v6960_v26  ;;  %v7102_v26 = vpack.c.bf16 %v4496_v1, %v4495_v2  ;;  %v6984_v32 = vpack.c.bf16 %v4092_v53, %v4090_v39  ;;  %v4111_v2 = vld [vmem:[%s8800_s24 + $0x570] sm:$0xff]  ;;  %v4114_v1 = vld [vmem:[%s8800_s24 + $0x588] sm:$0xff]  ;;  %v4120_v39 = vld [vmem:[%s8800_s24 + $0x5b8] sm:$0xff] }
 0x4b0   : > { %v7006_v9 = vpack.c.bf16 %v4111_v2, %v4109_v17  ;;  %v7012_v53 = vpack.c.bf16 %v4120_v39, %v4118_v18  ;;  %v4149_v17 = vld [vmem:[%s8800_s24 + $0x6a0] sm:$0xff]  ;;  %v4151_v2 = vld [vmem:[%s8800_s24 + $0x6b0] sm:$0xff]  ;;  %v4158_v18 = vld [vmem:[%s8800_s24 + $0x6e8] sm:$0xff] }
 0x4b1   : > { %4341 = vmatmul.mubr.f32.vlgmr.msra.gmra.mrb[40].mxu1 %v8997_v63  ;;  %v6968_v63 = vpack.c.bf16 %v4076_v30, %v4074_v61  ;;  %v4091_v61 = vld [vmem:[%s8800_s24 + $0x4d0] sm:$0xff]  ;;  %v4094_v30 = vld [vmem:[%s8800_s24 + $0x4e8] sm:$0xff]  ;;  %7103 = vmatpush3.bf16.msra.mxu0 %v7102_v26  ;;  %v4160_v39 = vld [vmem:[%s8800_s24 + $0x6f8] sm:$0xff] }
 0x4b2   : > { %6963 = vmatpush1.bf16.msra.mxu1 %v6962_v27  ;;  %4411 = vmatprep.mubr.f32.mxu1 %v3923_v0  ;;  %v4515_v27 = vld [vmem:[%s9086_s13 + $0xd0] sm:$0xff]  ;;  %v4089_v0 = vld [vmem:[%s8800_s24 + $0x4c0] sm:$0xff] }
 0x4b3   : > { %6965 = vmatprep.subr.bf16.mxu1 %v6964_v43  ;;  %v4516_v43 = vld [vmem:[%s9086_s13 + $0xd8] sm:$0xff]  ;;  %7105 = vmatprep.subr.bf16.mxu0 %v7104_v20  ;;  %v6986_v54 = vpack.c.bf16 %v4091_v61, %v4089_v0  ;;  %v4117_v20 = vld [vmem:[%s8800_s24 + $0x5a0] sm:$0xff]  ;;  %v4123_v0 = vld [vmem:[%s8800_s24 + $0x5d0] sm:$0xff] }
 0x4b4   : > { %v7108_v46 = vpack.c.bf16 %v4516_v43, %v4515_v27  ;;  %v4124_v27 = vld [vmem:[%s8800_s24 + $0x5d8] sm:$0xff]  ;;  %v7014_v43 = vpack.c.bf16 %v4119_v37, %v4117_v20  ;;  %v4126_v61 = vld [vmem:[%s8800_s24 + $0x5e8] sm:$0xff]  ;;  %v4157_v20 = vld [vmem:[%s8800_s24 + $0x6e0] sm:$0xff] }
 0x4b5   : > { %7107 = vmatpush3.bf16.msra.mxu0 %v7106_v36  ;;  %v4159_v37 = vld [vmem:[%s8800_s24 + $0x6f0] sm:$0xff] }
 0x4b6   : > { %6967 = vmatpush1.bf16.msra.mxu1 %v6966_v31  ;;  %v4096_v31 = vld [vmem:[%s8800_s24 + $0x4f8] sm:$0xff]  ;;  %7109 = vmatprep.subr.bf16.mxu0 %v7108_v46  ;;  %v4125_v46 = vld [vmem:[%s8800_s24 + $0x5e0] sm:$0xff] }
 0x4b7   : > { %6969 = vmatprep.subr.bf16.mxu1 %v6968_v63  ;;  %v4517_v63 = vld [vmem:[%s9086_s13 + $0xe0] sm:$0xff]  ;;  %v6988_v38 = vpack.c.bf16 %v4096_v31, %v4094_v30  ;;  %v4128_v30 = vld [vmem:[%s8800_s24 + $0x5f8] sm:$0xff] }
 0x4b8   : > { %v7112_v25 = vpack.c.bf16 %v4518_v40, %v4517_v63  ;;  %v7020_v31 = vpack.c.bf16 %v4128_v30, %v4126_v61  ;;  %v4132_v63 = vld [vmem:[%s8800_s24 + $0x618] sm:$0xff]  ;;  %v7022_v40 = vpack.c.bf16 %v4127_v44, %v4125_v46  ;;  %v4166_v61 = vld [vmem:[%s8800_s24 + $0x728] sm:$0xff]  ;;  %v4165_v46 = vld [vmem:[%s8800_s24 + $0x720] sm:$0xff] }
 0x4b9   : > { %7111 = vmatpush3.bf16.msra.mxu0 %v7110_v60  ;;  %v4168_v30 = vld [vmem:[%s8800_s24 + $0x738] sm:$0xff]  ;;  %v4167_v44 = vld [vmem:[%s8800_s24 + $0x730] sm:$0xff] }
 0x4ba   : > { %6971 = vmatpush1.bf16.msra.mxu1 %v6970_v50  ;;  %v6992_v50 = vpack.c.bf16 %v4100_v42, %v4098_v49  ;;  %7113 = vmatprep.subr.bf16.mxu0 %v7112_v25  ;;  %v4136_v49 = vld [vmem:[%s8800_s24 + $0x638] sm:$0xff]  ;;  %v4133_v25 = vld [vmem:[%s8800_s24 + $0x620] sm:$0xff] }
 0x4bb   : > { %6973 = vmatprep.subr.bf16.mxu1 %v6972_v41  ;;  %v4099_v41 = vld [vmem:[%s8800_s24 + $0x510] sm:$0xff]  ;;  %v7028_v42 = vpack.c.bf16 %v4136_v49, %v4134_v45  ;;  %v4174_v45 = vld [vmem:[%s8800_s24 + $0x768] sm:$0xff]  ;;  %v4176_v49 = vld [vmem:[%s8800_s24 + $0x778] sm:$0xff] }
 0x4bc   : > { %v6994_v7 = vpack.c.bf16 %v4099_v41, %v4097_v52  ;;  %v7030_v52 = vpack.c.bf16 %v4135_v51, %v4133_v25  ;;  %v4173_v25 = vld [vmem:[%s8800_s24 + $0x760] sm:$0xff]  ;;  %v4175_v51 = vld [vmem:[%s8800_s24 + $0x770] sm:$0xff] }
 0x4bd   : > { %7115 = vmatpush3.bf16.msra.mxu0 %v7114_v55  ;;  %v4137_v55 = vld [vmem:[%s8800_s24 + $0x640] sm:$0xff] }
 0x4be   : > { %6975 = vmatpush1.bf16.msra.mxu1 %v6974_v62  ;;  %v7000_v62 = vpack.c.bf16 %v4108_v12, %v4106_v11  ;;  %v4146_v11 = vld [vmem:[%s8800_s24 + $0x688] sm:$0xff]  ;;  %v4148_v12 = vld [vmem:[%s8800_s24 + $0x698] sm:$0xff] }
 0x4bf   : > { %6977 = vmatprep.subr.bf16.mxu1 %v6976_v13  ;;  %v4105_v13 = vld [vmem:[%s8800_s24 + $0x540] sm:$0xff] }
 0x4c0   : > { %v7002_v14 = vpack.c.bf16 %v4107_v28, %v4105_v13  ;;  %v4145_v13 = vld [vmem:[%s8800_s24 + $0x680] sm:$0xff]  ;;  %v4147_v28 = vld [vmem:[%s8800_s24 + $0x690] sm:$0xff] }
 0x4c2   : > { %6979 = vmatpush1.bf16.msra.mxu1 %v6978_v22  ;;  %v7008_v22 = vpack.c.bf16 %v4116_v3, %v4114_v1  ;;  %v4154_v1 = vld [vmem:[%s8800_s24 + $0x6c8] sm:$0xff]  ;;  %v4156_v3 = vld [vmem:[%s8800_s24 + $0x6d8] sm:$0xff] }
 0x4c3   : > { %6981 = vmatprep.subr.bf16.mxu1 %v6980_v19  ;;  %v4113_v19 = vld [vmem:[%s8800_s24 + $0x580] sm:$0xff] }
 0x4c4   : > { %v7010_v26 = vpack.c.bf16 %v4115_v24, %v4113_v19  ;;  %v4153_v19 = vld [vmem:[%s8800_s24 + $0x6c0] sm:$0xff]  ;;  %v4155_v24 = vld [vmem:[%s8800_s24 + $0x6d0] sm:$0xff] }
 0x4c6   : > { %6983 = vmatpush1.bf16.msra.mxu1 %v6982_v29  ;;  %v7016_v29 = vpack.c.bf16 %v4124_v27, %v4122_v16  ;;  %v4162_v16 = vld [vmem:[%s8800_s24 + $0x708] sm:$0xff]  ;;  %v4164_v27 = vld [vmem:[%s8800_s24 + $0x718] sm:$0xff] }
 0x4c7   : > { %6985 = vmatprep.subr.bf16.mxu1 %v6984_v32  ;;  %v4121_v32 = vld [vmem:[%s8800_s24 + $0x5c0] sm:$0xff] }
 0x4c8   : > { %v7018_v36 = vpack.c.bf16 %v4123_v0, %v4121_v32  ;;  %v4161_v32 = vld [vmem:[%s8800_s24 + $0x700] sm:$0xff]  ;;  %v4163_v0 = vld [vmem:[%s8800_s24 + $0x710] sm:$0xff] }
 0x4ca   : > { %6987 = vmatpush1.bf16.msra.mxu1 %v6986_v54  ;;  %v7024_v54 = vpack.c.bf16 %v4132_v63, %v4130_v5  ;;  %v4170_v5 = vld [vmem:[%s8800_s24 + $0x748] sm:$0xff]  ;;  %v4172_v63 = vld [vmem:[%s8800_s24 + $0x758] sm:$0xff] }
 0x4cb   : > { %6989 = vmatprep.subr.bf16.mxu1 %v6988_v38  ;;  %v4129_v38 = vld [vmem:[%s8800_s24 + $0x600] sm:$0xff] }
 0x4cc   : > { %v7026_v60 = vpack.c.bf16 %v4131_v47, %v4129_v38  ;;  %v4169_v38 = vld [vmem:[%s8800_s24 + $0x740] sm:$0xff]  ;;  %v4171_v47 = vld [vmem:[%s8800_s24 + $0x750] sm:$0xff] }
 0x4ce   : > { %6991 = vmatpush1.bf16.msra.mxu1 %v6990_v23  ;;  %v4138_v23 = vld [vmem:[%s8800_s24 + $0x648] sm:$0xff] }
 0x4cf   : > { %6993 = vmatprep.subr.bf16.mxu1 %v6992_v50  ;;  %v4140_v50 = vld [vmem:[%s8800_s24 + $0x658] sm:$0xff] }
 0x4d0   : > { %v7032_v41 = vpack.c.bf16 %v4140_v50, %v4138_v23  ;;  %v4180_v23 = vld [vmem:[%s8800_s24 + $0x798] sm:$0xff]  ;;  %v7070_v50 = vpack.c.bf16 %v4175_v51, %v4173_v25 }
 0x4d2   : > { %6995 = vmatpush1.bf16.msra.mxu1 %v6994_v7  ;;  %v4144_v7 = vld [vmem:[%s8800_s24 + $0x678] sm:$0xff] }
 0x4d3   : > { %6997 = vmatprep.subr.bf16.mxu1 %v6996_v8  ;;  %v7034_v8 = vpack.c.bf16 %v4139_v48, %v4137_v55  ;;  %v7036_v6 = vpack.c.bf16 %v4144_v7, %v4142_v15  ;;  %v4179_v55 = vld [vmem:[%s8800_s24 + $0x790] sm:$0xff]  ;;  %v4182_v48 = vld [vmem:[%s8800_s24 + $0x7a8] sm:$0xff]  ;;  %v4184_v15 = vld [vmem:[%s8800_s24 + $0x7b8] sm:$0xff] }
 0x4d6   : > { %6999 = vmatpush1.bf16.msra.mxu1 %v6998_v58 }
 0x4d7   : > { %7001 = vmatprep.subr.bf16.mxu1 %v7000_v62  ;;  %v7040_v62 = vpack.c.bf16 %v4148_v12, %v4146_v11  ;;  %v4188_v11 = vld [vmem:[%s8800_s24 + $0x7d8] sm:$0xff] }
 0x4da   : > { %7003 = vmatpush1.bf16.msra.mxu1 %v7002_v14  ;;  %v7042_v14 = vpack.c.bf16 %v4147_v28, %v4145_v13  ;;  %v4187_v13 = vld [vmem:[%s8800_s24 + $0x7d0] sm:$0xff]  ;;  %v4190_v28 = vld [vmem:[%s8800_s24 + $0x7e8] sm:$0xff] }
 0x4db   : > { %7005 = vmatprep.subr.bf16.mxu1 %v7004_v59  ;;  %v7044_v59 = vpack.c.bf16 %v4152_v21, %v4150_v4  ;;  %v4192_v4 = vld [vmem:[%s8800_s24 + $0x7f8] sm:$0xff] }
 0x4de   : > { %7007 = vmatpush1.bf16.msra.mxu1 %v7006_v9  ;;  %v7046_v9 = vpack.c.bf16 %v4151_v2, %v4149_v17  ;;  %v4191_v17 = vld [vmem:[%s8800_s24 + $0x7f0] sm:$0xff] }
 0x4df   : > { %7009 = vmatprep.subr.bf16.mxu1 %v7008_v22  ;;  %v7048_v22 = vpack.c.bf16 %v4156_v3, %v4154_v1  ;;  %v4519_v1 = vld [vmem:[%s9086_s13 + $0xf0] sm:$0xff]  ;;  %v4520_v3 = vld [vmem:[%s9086_s13 + $0xf8] sm:$0xff] }
 0x4e2   : > { %7011 = vmatpush1.bf16.msra.mxu1 %v7010_v26  ;;  %v7050_v26 = vpack.c.bf16 %v4155_v24, %v4153_v19  ;;  %v4504_v19 = vld [vmem:[%s9086_s13 + $0x78] sm:$0xff] }
 0x4e3   : > { %7013 = vmatprep.subr.bf16.mxu1 %v7012_v53  ;;  %v7052_v53 = vpack.c.bf16 %v4160_v39, %v4158_v18  ;;  %v4193_v18 = vld [vmem:[%s443_s18] sm:$0x3] }
 0x4e4   : > { %v4202_v39 = vrot.slane %v4193_v18, %v7842_v35 }
 0x4e6   : > { %7015 = vmatpush1.bf16.msra.mxu1 %v7014_v43  ;;  %v7054_v43 = vpack.c.bf16 %v4159_v37, %v4157_v20 }
 0x4e7   : > { %7017 = vmatprep.subr.bf16.mxu1 %v7016_v29  ;;  %v7056_v29 = vpack.c.bf16 %v4164_v27, %v4162_v16 }
 0x4ea   : > { %7019 = vmatpush1.bf16.msra.mxu1 %v7018_v36  ;;  %v7058_v36 = vpack.c.bf16 %v4163_v0, %v4161_v32 }
 0x4eb   : > { %7021 = vmatprep.subr.bf16.mxu1 %v7020_v31  ;;  %v7060_v31 = vpack.c.bf16 %v4168_v30, %v4166_v61 }
 0x4ee   : > { %7023 = vmatpush1.bf16.msra.mxu1 %v7022_v40  ;;  %v7062_v40 = vpack.c.bf16 %v4167_v44, %v4165_v46 }
 0x4ef   : > { %7025 = vmatprep.subr.bf16.mxu1 %v7024_v54  ;;  %v7064_v54 = vpack.c.bf16 %v4172_v63, %v4170_v5 }
 0x4f1   : > { %4412 = vmatmul.mubr.f32.vlgmr.msra.gmra.mrb[40].mxu1 %v9007_v56  ;;  %v4141_v56 = vld [vmem:[%s8800_s24 + $0x660] sm:$0xff] }
 0x4f2   : > { %7027 = vmatpush1.bf16.msra.mxu1 %v7026_v60  ;;  %4482 = vmatprep.mubr.f32.mxu1 %v3934_v33  ;;  %v7038_v58 = vpack.c.bf16 %v4143_v10, %v4141_v56  ;;  %v7066_v60 = vpack.c.bf16 %v4171_v47, %v4169_v38  ;;  %v4178_v33 = vld [vmem:[%s8800_s24 + $0x788] sm:$0xff]  ;;  %v4183_v56 = vld [vmem:[%s8800_s24 + $0x7b0] sm:$0xff] }
 0x4f3   : > { %7029 = vmatprep.subr.bf16.mxu1 %v7028_v42  ;;  %v7068_v42 = vpack.c.bf16 %v4176_v49, %v4174_v45  ;;  %v4186_v10 = vld [vmem:[%s8800_s24 + $0x7c8] sm:$0xff] }
 0x4f6   : > { %7031 = vmatpush1.bf16.msra.mxu1 %v7030_v52  ;;  %v7072_v52 = vpack.c.bf16 %v4180_v23, %v4178_v33 }
 0x4f7   : > { %7033 = vmatprep.subr.bf16.mxu1 %v7032_v41  ;;  %v4177_v41 = vld [vmem:[%s8800_s24 + $0x780] sm:$0xff] }
 0x4f8   : > { %v7074_v7 = vpack.c.bf16 %v4179_v55, %v4177_v41 }
 0x4fa   : > { %7035 = vmatpush1.bf16.msra.mxu1 %v7034_v8  ;;  %v7076_v8 = vpack.c.bf16 %v4184_v15, %v4182_v48 }
 0x4fb   : > { %7037 = vmatprep.subr.bf16.mxu1 %v7036_v6  ;;  %v4181_v6 = vld [vmem:[%s8800_s24 + $0x7a0] sm:$0xff] }
 0x4fc   : > { %v7078_v12 = vpack.c.bf16 %v4183_v56, %v4181_v6 }
 0x4fe   : > { %7039 = vmatpush1.bf16.msra.mxu1 %v7038_v58  ;;  %v7080_v58 = vpack.c.bf16 %v4188_v11, %v4186_v10 }
 0x4ff   : > { %7041 = vmatprep.subr.bf16.mxu1 %v7040_v62  ;;  %v4185_v62 = vld [vmem:[%s8800_s24 + $0x7c0] sm:$0xff] }
 0x500   : > { %v7082_v21 = vpack.c.bf16 %v4187_v13, %v4185_v62 }
 0x502   : > { %7043 = vmatpush1.bf16.msra.mxu1 %v7042_v14  ;;  %v7084_v14 = vpack.c.bf16 %v4192_v4, %v4190_v28 }
 0x503   : > { %7045 = vmatprep.subr.bf16.mxu1 %v7044_v59  ;;  %v4189_v59 = vld [vmem:[%s8800_s24 + $0x7e0] sm:$0xff] }
 0x504   : > { %v7086_v2 = vpack.c.bf16 %v4191_v17, %v4189_v59 }
 0x506   : > { %7047 = vmatpush1.bf16.msra.mxu1 %v7046_v9  ;;  %v7116_v9 = vpack.c.bf16 %v4520_v3, %v4519_v1 }
 0x507   : > { %7049 = vmatprep.subr.bf16.mxu1 %v7048_v22  ;;  %v4503_v22 = vld [vmem:[%s9086_s13 + $0x70] sm:$0xff] }
 0x508   : > { %v7118_v24 = vpack.c.bf16 %v4504_v19, %v4503_v22  ;;  %7117 = vmatprep.subr.bf16.mxu0 %v7116_v9 }
 0x50a   : > { %7051 = vmatpush1.bf16.msra.mxu1 %v7050_v26  ;;  %7119 = vmatpush3.bf16.msra.mxu0 %v7118_v24 }
 0x50b   : > { %7053 = vmatprep.subr.bf16.mxu1 %v7052_v53 }
 0x50e   : > { %7055 = vmatpush1.bf16.msra.mxu1 %v7054_v43  ;;  %v5526_v43 = vld [vmem:[%s451_s20] ss:$0 sm:$0xff] }
 0x50f   : > { %7057 = vmatprep.subr.bf16.mxu1 %v7056_v29 }
 0x512   : > { %7059 = vmatpush1.bf16.msra.mxu1 %v7058_v36 }
 0x513   : > { %7061 = vmatprep.subr.bf16.mxu1 %v7060_v31 }
 0x516   : > { %7063 = vmatpush1.bf16.msra.mxu1 %v7062_v40 }
 0x517   : > { %7065 = vmatprep.subr.bf16.mxu1 %v7064_v54 }
 0x51a   : > { %7067 = vmatpush1.bf16.msra.mxu1 %v7066_v60 }
 0x51b   : > { %7069 = vmatprep.subr.bf16.mxu1 %v7068_v42 }
 0x51e   : > { %7071 = vmatpush1.bf16.msra.mxu1 %v7070_v50 }
 0x51f   : > { %7073 = vmatprep.subr.bf16.mxu1 %v7072_v52 }
 0x522   : > { %7075 = vmatpush1.bf16.msra.mxu1 %v7074_v7 }
 0x523   : > { %7077 = vmatprep.subr.bf16.mxu1 %v7076_v8 }
 0x526   : > { %7079 = vmatpush1.bf16.msra.mxu1 %v7078_v12 }
 0x527   : > { %7081 = vmatprep.subr.bf16.mxu1 %v7080_v58 }
 0x52a   : > { %7083 = vmatpush1.bf16.msra.mxu1 %v7082_v21 }
 0x52b   : > { %7085 = vmatprep.subr.bf16.mxu1 %v7084_v14 }
 0x52e   : > { %7087 = vmatpush1.bf16.msra.mxu1 %v7086_v2 }
 0x531   : > { %4483 = vmatmul.mubr.f32.vlgmr.msra.gmra.mrb[40].mxu1 %v9009_v57  ;;  %v4198_v57 = vrot.slane %v4193_v18, %v7839_v34 }
 0x604   : > { %v4484_v26 = vpop.f32.mrb[40].mxu1 }
 0x605   : > { %v4486_v53 = vpop.f32.mrb[41].mxu1  ;;  %v7148_v37 = vadd.f32 %v4484_v26, %v4198_v57 }
 0x606   : > { %v7149_v20 = vadd.f32 %v4486_v53, %v4202_v39 }
 0x608   : > { %4592 = vmatprep.mubr.f32.mxu0 %v7149_v20 }
 0x609   : > { %4593 = vmatmul.mubr.f32.vlgmr.msra.gmra.mrb[32].mxu0 %v7148_v37 }
 0x6dc   : > { %v5659_v16 = vpop.f32.mrb[32].mxu0 }
 0x6dd   : > { %v5660_v27 = vpop.f32.mrb[33].mxu0 }
 0x6de   : > { %v5661_v29 = vadd.f32 %v5660_v27, %v5659_v16 }
 0x6e0   : > { %v4595_v32 = vadd.f32 %v5661_v29, %v5526_v43 }
 0x6e2   : > { %v4598_v35 = vsel %vm2960_vm2, %v4595_v32, -inf }
 0x6e3   : > { %4599 = vmax.xlane.f32.xlu0 %v4598_v35 }
 0x770   : > { %v4600_v34 = vpop.xlane.xlu0 %4599 }
 0x771   : > { %v4601_v0 = vsub.f32 %v4595_v32, %v4600_v34 }
 0x773   : > { %v4602_v61 = vmul.f32 1.442695, %v4601_v0 }
 0x775   : > { %7261 = vpow2.f32 %v4602_v61 }
 0x77f   : > { %v7262_v30 = vpop.eup %7261 }
 0x780   : > { %v4604_v36 = vsel %vm2960_vm2, %v7262_v30, 0.0 }
 0x781   : > { %4605 = vadd.xlane.f32.xlu0 %v4604_v36 }
 0x80e   : > { %v4606_v31 = vpop.xlane.xlu0 %4605 }
 0x80f   : > { %7263 = vrcp.f32 %v4606_v31 }
 0x819   : > { %v7264_v46 = vpop.eup %7263 }
 0x81a   : > { %v4608_v44 = vmul.f32 %v7264_v46, %v7262_v30 }
 0x81c   : > { %4609 = vst [vmem:[%s455_s23] sm:$0x3] %v4608_v44 }
 0x81d PF: > { %s19_s30 = sadd.s32 1, %s7271_s30  }
 0x81e   : > { %p16_p4 = scmp.ge.s32.totalorder %s19_s30, 4  }
 0x820   :  { %18 = sbr.rel (!%p16_p4) target bundleno = 1 (0x1), region = 111 }

</bundles_post_ra>
